<compile_context>
chip_gen: v6e
topology: v6e:2x2x1
jax: 0.10.0
libtpu: 0.0.40
codegen_flags: <defaults>
</compile_context>

<pallas_src>
import functools

import jax
import jax.numpy as jnp
from jax.experimental import pallas as pl
from jax.experimental.pallas import tpu as pltpu

CIN_PAD = 8      # conv1 input channels padded 6 -> 8
N_PAD = 128      # lane-friendly padded width for lin2 / head outputs


# ----------------------------------------------------------------------------
# Fused Pallas kernel: 3 convs (+ReLU) + lin1 + lin2 + head, 6 matmuls total
# ----------------------------------------------------------------------------
def _dqn_kernel(x_ref,
                cw1_ref, cb1_ref, cw2_ref, cb2_ref, cw3_ref, cb3_ref,
                wl1_ref, bl1_ref, wl2_ref, bl2_ref, wh_ref, bh_ref,
                o_ref, *, conv_dims):

    def conv_relu(x, w_ref, b_ref, kh, kw):
        # x: (B, H, W, C) f32 NHWC; w_ref: (kh*kw*C, Cout), rows ordered (dy, dx, c).
        B, H, W, C = x.shape
        OH, OW = H - kh + 1, W - kw + 1
        cout = w_ref.shape[-1]
        # Cast once (no-op for f32, halves concat traffic for bf16 operands).
        xc = x.astype(w_ref.dtype)
        # Concat-K patch: fold all kh*kw taps into the contraction dimension so
        # the layer is ONE MXU matmul instead of kh*kw K-starved ones.
        taps = [xc[:, dy:dy + OH, dx:dx + OW, :]
                for dy in range(kh) for dx in range(kw)]
        patch = jnp.concatenate(taps, axis=-1).reshape(B * OH * OW, kh * kw * C)
        acc = jnp.dot(patch, w_ref[...], preferred_element_type=jnp.float32)
        acc = jnp.maximum(acc + b_ref[...], 0.0)          # bias + ReLU in f32 (VPU)
        return acc.reshape(B, OH, OW, cout)

    def linear(h, w_ref, b_ref, relu):
        y = jnp.dot(h.astype(w_ref.dtype), w_ref[...],
                    preferred_element_type=jnp.float32) + b_ref[...]
        return jnp.maximum(y, 0.0) if relu else y

    x = x_ref[...]                                       # (B, H, W, CIN_PAD), f32
    x = conv_relu(x, cw1_ref, cb1_ref, *conv_dims[0])    # conv1 + relu   K=120
    x = conv_relu(x, cw2_ref, cb2_ref, *conv_dims[1])    # conv2 + relu   K=1152
    x = conv_relu(x, cw3_ref, cb3_ref, *conv_dims[2])    # conv3 + relu   K=2304
    # lin1: NHWC flatten + single K=384 matmul.  Its weight rows were permuted
    # at prep time to NHWC order, so this equals PyTorch's NCHW Flatten+Linear.
    h = x.reshape(x.shape[0], -1)                        # (B, h3*w3*128)
    h = linear(h, wl1_ref, bl1_ref, relu=True)           # (B, 128)
    h = linear(h, wl2_ref, bl2_ref, relu=True)           # (B, 128), cols 32.. == 0
    o_ref[...] = linear(h, wh_ref, bh_ref, relu=False).astype(o_ref.dtype)


# ----------------------------------------------------------------------------
# One-time parameter layout conversion (trace/init time; free at runtime)
# ----------------------------------------------------------------------------
def _conv_weight(w, cin_pad=None, dtype=jnp.float32):
    """PyTorch OIHW (Cout, Cin, kh, kw) -> (kh*kw*Cin[_pad], Cout), rows (dy, dx, c)."""
    cout, cin, kh, kw = w.shape
    w = jnp.transpose(w, (2, 3, 1, 0))                   # (kh, kw, cin, cout)
    if cin_pad is not None and cin_pad > cin:
        w = jnp.pad(w, ((0, 0), (0, 0), (0, cin_pad - cin), (0, 0)))
    return w.reshape(kh * kw * w.shape[2], cout).astype(dtype)


def prepare_params(params, h, w, outputs, matmul_dtype=jnp.float32):
    h1, w1 = h - 2, w - 4          # conv1 (3, 5)
    h2, w2 = h1 - 2, w1 - 2        # conv2 (3, 3)
    h3, w3 = h2 - 2, w2 - 2        # conv3 (3, 3)
    c3 = params["conv3_w"].shape[0]
    assert h3 >= 1 and w3 >= 1 and c3 * h3 * w3 == params["lin1_w"].shape[1], \
        "spatial size incompatible with lin1 input features"
    assert outputs <= N_PAD
    hidden2 = params["lin2_w"].shape[0]                  # 32

    # lin1 (out, in) with `in` ordered NCHW (c, h, w) -> rows ordered NHWC (h, w, c).
    wl1 = params["lin1_w"].T.reshape(c3, h3, w3, -1)     # (c, h, w, out)
    wl1 = jnp.transpose(wl1, (1, 2, 0, 3)).reshape(h3 * w3 * c3, -1)

    # Zero pads below are exact in bf16 too, so the head padding invariant holds.
    wl2 = jnp.pad(params["lin2_w"].T, ((0, 0), (0, N_PAD - hidden2)))
    bl2 = jnp.pad(params["lin2_b"], (0, N_PAD - hidden2)).reshape(1, -1)
    wh = jnp.pad(params["head_w"].T, ((0, N_PAD - hidden2), (0, N_PAD - outputs)))
    bh = jnp.pad(params["head_b"], (0, N_PAD - outputs)).reshape(1, -1)

    return {
        "cw1": _conv_weight(params["conv1_w"], CIN_PAD, matmul_dtype),
        "cb1": params["conv1_b"].reshape(1, -1),
        "cw2": _conv_weight(params["conv2_w"], None, matmul_dtype),
        "cb2": params["conv2_b"].reshape(1, -1),
        "cw3": _conv_weight(params["conv3_w"], None, matmul_dtype),
        "cb3": params["conv3_b"].reshape(1, -1),
        "wl1": wl1.astype(matmul_dtype), "bl1": params["lin1_b"].reshape(1, -1),
        "wl2": wl2.astype(matmul_dtype), "bl2": bl2,
        "wh": wh.astype(matmul_dtype), "bh": bh,
    }


# ----------------------------------------------------------------------------
# Forward pass: NCHW->NHWC + Cin pad, one pallas_call, slice padded head output
# ----------------------------------------------------------------------------
def dqn_forward(weights, x_nchw, *, outputs):
    B, cin, H, W = x_nchw.shape
    assert cin <= CIN_PAD
    h3, w3 = H - 6, W - 8                    # spatial extent left after the 3 convs
    conv_dims = ((3, 5), (3, 3), (3, 3))
    c3 = weights["cw3"].shape[-1]
    assert weights["wl1"].shape[0] == h3 * w3 * c3, "weights prepared for different (h, w)"

    # TODO(synk): for large replay batches, add a batch-tiled grid axis marked
    # "parallel" (uses both v7x TensorCores), move this transpose/pad into the
    # kernel on the per-tile slab, mark the constant-index weight specs
    # pipeline_mode=pl.Buffered(1), and size the B-tile so B*OH*OW is a
    # multiple of 8 and the tile fits v7x's 64 MiB VMEM / v5e's 16 MiB default
    # scoped limit.  Unnecessary at B=2 (launch-latency bound).
    x = jnp.transpose(x_nchw.astype(jnp.float32), (0, 2, 3, 1))      # NCHW -> NHWC
    x = jnp.pad(x, ((0, 0), (0, 0), (0, 0), (0, CIN_PAD - cin)))     # Cin 6 -> 8

    args = (x,
            weights["cw1"], weights["cb1"],
            weights["cw2"], weights["cb2"],
            weights["cw3"], weights["cb3"],
            weights["wl1"], weights["bl1"],
            weights["wl2"], weights["bl2"],
            weights["wh"], weights["bh"])

    def full(shape):
        return pl.BlockSpec(shape, lambda i: (0,) * len(shape))

    out = pl.pallas_call(
        functools.partial(_dqn_kernel, conv_dims=conv_dims),
        out_shape=jax.ShapeDtypeStruct((B, N_PAD), jnp.float32),
        grid=(1,),
        in_specs=[full(a.shape) for a in args],
        out_specs=full((B, N_PAD)),
        compiler_params=pltpu.CompilerParams(dimension_semantics=("arbitrary",)),
    )(*args)
    return out[:, :outputs]


# ----------------------------------------------------------------------------
# Deterministic params (PyTorch shapes), pure-JAX reference, and smoke test
# ----------------------------------------------------------------------------
def init_params(key, outputs):
    shapes = {
        "conv1_w": (128, 6, 3, 5),   "conv1_b": (128,),
        "conv2_w": (256, 128, 3, 3), "conv2_b": (256,),
        "conv3_w": (128, 256, 3, 3), "conv3_b": (128,),
        "lin1_w": (128, 384),        "lin1_b": (128,),
        "lin2_w": (32, 128),         "lin2_b": (32,),
        "head_w": (outputs, 32),     "head_b": (outputs,),
    }
    params = {}
    keys = jax.random.split(key, len(shapes))
    for k, (name, shape) in zip(keys, sorted(shapes.items())):
        params[name] = (0.05 * jax.random.normal(k, shape)).astype(jnp.float32)
    return params


def dqn_reference(params, x_nchw):
    x = x_nchw.astype(jnp.float32)

    def conv(x, w, b):
        y = jax.lax.conv_general_dilated(
            x, w, window_strides=(1, 1), padding="VALID",
            dimension_numbers=("NCHW", "OIHW", "NCHW"),
            precision=jax.lax.Precision.HIGHEST)
        return jax.nn.relu(y + b[None, :, None, None])

    x = conv(x, params["conv1_w"], params["conv1_b"])
    x = conv(x, params["conv2_w"], params["conv2_b"])
    x = conv(x, params["conv3_w"], params["conv3_b"])
    x = x.reshape(x.shape[0], -1)                               # NCHW flatten
    mm = lambda a, w: jnp.dot(a, w.T, precision=jax.lax.Precision.HIGHEST)
    x = jax.nn.relu(mm(x, params["lin1_w"]) + params["lin1_b"])
    x = jax.nn.relu(mm(x, params["lin2_w"]) + params["lin2_b"])
    return mm(x, params["head_w"]) + params["head_b"]


if __name__ == "__main__":
    # Spatial size chosen so the flatten matches lin1's 384 input features:
    # h=7, w=11 -> conv1: 5x7 -> conv2: 3x5 -> conv3: 1x3, 128*1*3 = 384.
    OUTPUTS = 4
    H, W = 7, 11
    key = jax.random.PRNGKey(0)
    k_params, k_x = jax.random.split(key)
    params = init_params(k_params, OUTPUTS)
    x = jax.random.normal(k_x, (2, 6, H, W), dtype=jnp.float32)   # NCHW input
    ref = dqn_reference(params, x)

    fwd = jax.jit(functools.partial(dqn_forward, outputs=OUTPUTS))

    # f32 MXU operands: tight match against the XLA reference.
    weights_f32 = prepare_params(params, H, W, OUTPUTS, matmul_dtype=jnp.float32)
    out = fwd(weights_f32, x)
    jax.block_until_ready(out)
    assert out.shape == (2, OUTPUTS) and out.dtype == jnp.float32
    assert jnp.allclose(out, ref, atol=1e-3, rtol=1e-3), \
        f"f32 max abs diff {jnp.max(jnp.abs(out - ref))}"

    # bf16 MXU operands (v5e/v6e/v7x perf path): f32 accumulate + f32 bias/ReLU.
    weights_bf16 = prepare_params(params, H, W, OUTPUTS, matmul_dtype=jnp.bfloat16)
    out_bf16 = jax.block_until_ready(fwd(weights_bf16, x))
    assert jnp.allclose(out_bf16, ref, atol=1e-2, rtol=1e-2), \
        f"bf16 max abs diff {jnp.max(jnp.abs(out_bf16 - ref))}"

    print("KERNEL_OK")
</pallas_src>

<mosaic_0001>
module attributes {stable_mosaic.version = 11 : i64} {
  func.func @_dqn_kernel(%arg0: i32, %arg1: memref<2x7x11x8xf32, #tpu.memory_space<vmem>>, %arg2: memref<120x128xf32, #tpu.memory_space<vmem>>, %arg3: memref<1x128xf32, #tpu.memory_space<vmem>>, %arg4: memref<1152x256xf32, #tpu.memory_space<vmem>>, %arg5: memref<1x256xf32, #tpu.memory_space<vmem>>, %arg6: memref<2304x128xf32, #tpu.memory_space<vmem>>, %arg7: memref<1x128xf32, #tpu.memory_space<vmem>>, %arg8: memref<384x128xf32, #tpu.memory_space<vmem>>, %arg9: memref<1x128xf32, #tpu.memory_space<vmem>>, %arg10: memref<128x128xf32, #tpu.memory_space<vmem>>, %arg11: memref<1x128xf32, #tpu.memory_space<vmem>>, %arg12: memref<128x128xf32, #tpu.memory_space<vmem>>, %arg13: memref<1x128xf32, #tpu.memory_space<vmem>>, %arg14: memref<2x128xf32, #tpu.memory_space<vmem>>) attributes {dimension_semantics = [#tpu.dimension_semantics<arbitrary>], iteration_bounds = array<i64: 1>, scalar_prefetch = 0 : i64, scratch_operands = 0 : i64, tpu.core_type = #tpu.core_type<tc>, window_params = [{pipeline_mode = #tpu.pipeline_mode<synchronous>, transform_indices = @transform_0, window_bounds = array<i64: 2, 7, 11, 8>}, {pipeline_mode = #tpu.pipeline_mode<synchronous>, transform_indices = @transform_1, window_bounds = array<i64: 120, 128>}, {pipeline_mode = #tpu.pipeline_mode<synchronous>, transform_indices = @transform_2, window_bounds = array<i64: 1, 128>}, {pipeline_mode = #tpu.pipeline_mode<synchronous>, transform_indices = @transform_3, window_bounds = array<i64: 1152, 256>}, {pipeline_mode = #tpu.pipeline_mode<synchronous>, transform_indices = @transform_4, window_bounds = array<i64: 1, 256>}, {pipeline_mode = #tpu.pipeline_mode<synchronous>, transform_indices = @transform_5, window_bounds = array<i64: 2304, 128>}, {pipeline_mode = #tpu.pipeline_mode<synchronous>, transform_indices = @transform_6, window_bounds = array<i64: 1, 128>}, {pipeline_mode = #tpu.pipeline_mode<synchronous>, transform_indices = @transform_7, window_bounds = array<i64: 384, 128>}, {pipeline_mode = #tpu.pipeline_mode<synchronous>, transform_indices = @transform_8, window_bounds = array<i64: 1, 128>}, {pipeline_mode = #tpu.pipeline_mode<synchronous>, transform_indices = @transform_9, window_bounds = array<i64: 128, 128>}, {pipeline_mode = #tpu.pipeline_mode<synchronous>, transform_indices = @transform_10, window_bounds = array<i64: 1, 128>}, {pipeline_mode = #tpu.pipeline_mode<synchronous>, transform_indices = @transform_11, window_bounds = array<i64: 128, 128>}, {pipeline_mode = #tpu.pipeline_mode<synchronous>, transform_indices = @transform_12, window_bounds = array<i64: 1, 128>}, {pipeline_mode = #tpu.pipeline_mode<synchronous>, transform_indices = @transform_13, window_bounds = array<i64: 2, 128>}]} {
    %c0 = arith.constant 0 : index
    %c0_0 = arith.constant 0 : index
    %c0_1 = arith.constant 0 : index
    %c0_2 = arith.constant 0 : index
    %0 = vector.load %arg1[%c0, %c0_0, %c0_1, %c0_2] : memref<2x7x11x8xf32, #tpu.memory_space<vmem>>, vector<2x7x11x8xf32>
    %1 = vector.extract_strided_slice %0 {offsets = [0, 0, 0, 0], sizes = [2, 5, 7, 8], strides = [1, 1, 1, 1]} : vector<2x7x11x8xf32> to vector<2x5x7x8xf32>
    %2 = vector.extract_strided_slice %0 {offsets = [0, 0, 1, 0], sizes = [2, 5, 7, 8], strides = [1, 1, 1, 1]} : vector<2x7x11x8xf32> to vector<2x5x7x8xf32>
    %3 = vector.extract_strided_slice %0 {offsets = [0, 0, 2, 0], sizes = [2, 5, 7, 8], strides = [1, 1, 1, 1]} : vector<2x7x11x8xf32> to vector<2x5x7x8xf32>
    %4 = vector.extract_strided_slice %0 {offsets = [0, 0, 3, 0], sizes = [2, 5, 7, 8], strides = [1, 1, 1, 1]} : vector<2x7x11x8xf32> to vector<2x5x7x8xf32>
    %5 = vector.extract_strided_slice %0 {offsets = [0, 0, 4, 0], sizes = [2, 5, 7, 8], strides = [1, 1, 1, 1]} : vector<2x7x11x8xf32> to vector<2x5x7x8xf32>
    %6 = vector.extract_strided_slice %0 {offsets = [0, 1, 0, 0], sizes = [2, 5, 7, 8], strides = [1, 1, 1, 1]} : vector<2x7x11x8xf32> to vector<2x5x7x8xf32>
    %7 = vector.extract_strided_slice %0 {offsets = [0, 1, 1, 0], sizes = [2, 5, 7, 8], strides = [1, 1, 1, 1]} : vector<2x7x11x8xf32> to vector<2x5x7x8xf32>
    %8 = vector.extract_strided_slice %0 {offsets = [0, 1, 2, 0], sizes = [2, 5, 7, 8], strides = [1, 1, 1, 1]} : vector<2x7x11x8xf32> to vector<2x5x7x8xf32>
    %9 = vector.extract_strided_slice %0 {offsets = [0, 1, 3, 0], sizes = [2, 5, 7, 8], strides = [1, 1, 1, 1]} : vector<2x7x11x8xf32> to vector<2x5x7x8xf32>
    %10 = vector.extract_strided_slice %0 {offsets = [0, 1, 4, 0], sizes = [2, 5, 7, 8], strides = [1, 1, 1, 1]} : vector<2x7x11x8xf32> to vector<2x5x7x8xf32>
    %11 = vector.extract_strided_slice %0 {offsets = [0, 2, 0, 0], sizes = [2, 5, 7, 8], strides = [1, 1, 1, 1]} : vector<2x7x11x8xf32> to vector<2x5x7x8xf32>
    %12 = vector.extract_strided_slice %0 {offsets = [0, 2, 1, 0], sizes = [2, 5, 7, 8], strides = [1, 1, 1, 1]} : vector<2x7x11x8xf32> to vector<2x5x7x8xf32>
    %13 = vector.extract_strided_slice %0 {offsets = [0, 2, 2, 0], sizes = [2, 5, 7, 8], strides = [1, 1, 1, 1]} : vector<2x7x11x8xf32> to vector<2x5x7x8xf32>
    %14 = vector.extract_strided_slice %0 {offsets = [0, 2, 3, 0], sizes = [2, 5, 7, 8], strides = [1, 1, 1, 1]} : vector<2x7x11x8xf32> to vector<2x5x7x8xf32>
    %15 = vector.extract_strided_slice %0 {offsets = [0, 2, 4, 0], sizes = [2, 5, 7, 8], strides = [1, 1, 1, 1]} : vector<2x7x11x8xf32> to vector<2x5x7x8xf32>
    %16 = tpu.concatenate %1, %2, %3, %4, %5, %6, %7, %8, %9, %10, %11, %12, %13, %14, %15 in 3 : vector<2x5x7x8xf32>, vector<2x5x7x8xf32>, vector<2x5x7x8xf32>, vector<2x5x7x8xf32>, vector<2x5x7x8xf32>, vector<2x5x7x8xf32>, vector<2x5x7x8xf32>, vector<2x5x7x8xf32>, vector<2x5x7x8xf32>, vector<2x5x7x8xf32>, vector<2x5x7x8xf32>, vector<2x5x7x8xf32>, vector<2x5x7x8xf32>, vector<2x5x7x8xf32>, vector<2x5x7x8xf32> -> vector<2x5x7x120xf32>
    %17 = vector.shape_cast %16 : vector<2x5x7x120xf32> to vector<70x120xf32>
    %c0_3 = arith.constant 0 : index
    %c0_4 = arith.constant 0 : index
    %18 = vector.load %arg2[%c0_3, %c0_4] : memref<120x128xf32, #tpu.memory_space<vmem>>, vector<120x128xf32>
    %cst = arith.constant dense<0.000000e+00> : vector<70x128xf32>
    %19 = tpu.matmul %17, %18, %cst {dimension_numbers = #tpu.dot_dimension_numbers<[1], [0], [0], [1], [0, 0, 1, 1], [], []>} : vector<70x120xf32>, vector<120x128xf32>, vector<70x128xf32> -> vector<70x128xf32>
    %c0_5 = arith.constant 0 : index
    %c0_6 = arith.constant 0 : index
    %20 = vector.load %arg3[%c0_5, %c0_6] : memref<1x128xf32, #tpu.memory_space<vmem>>, vector<1x128xf32>
    %21 = vector.broadcast %20 : vector<1x128xf32> to vector<70x128xf32>
    %22 = arith.addf %19, %21 : vector<70x128xf32>
    %cst_7 = arith.constant 0.000000e+00 : f32
    %23 = vector.broadcast %cst_7 : f32 to vector<70x128xf32>
    %24 = arith.maximumf %22, %23 : vector<70x128xf32>
    %25 = vector.shape_cast %24 : vector<70x128xf32> to vector<2x5x7x128xf32>
    %26 = vector.extract_strided_slice %25 {offsets = [0, 0, 0, 0], sizes = [2, 3, 5, 128], strides = [1, 1, 1, 1]} : vector<2x5x7x128xf32> to vector<2x3x5x128xf32>
    %27 = vector.extract_strided_slice %25 {offsets = [0, 0, 1, 0], sizes = [2, 3, 5, 128], strides = [1, 1, 1, 1]} : vector<2x5x7x128xf32> to vector<2x3x5x128xf32>
    %28 = vector.extract_strided_slice %25 {offsets = [0, 0, 2, 0], sizes = [2, 3, 5, 128], strides = [1, 1, 1, 1]} : vector<2x5x7x128xf32> to vector<2x3x5x128xf32>
    %29 = vector.extract_strided_slice %25 {offsets = [0, 1, 0, 0], sizes = [2, 3, 5, 128], strides = [1, 1, 1, 1]} : vector<2x5x7x128xf32> to vector<2x3x5x128xf32>
    %30 = vector.extract_strided_slice %25 {offsets = [0, 1, 1, 0], sizes = [2, 3, 5, 128], strides = [1, 1, 1, 1]} : vector<2x5x7x128xf32> to vector<2x3x5x128xf32>
    %31 = vector.extract_strided_slice %25 {offsets = [0, 1, 2, 0], sizes = [2, 3, 5, 128], strides = [1, 1, 1, 1]} : vector<2x5x7x128xf32> to vector<2x3x5x128xf32>
    %32 = vector.extract_strided_slice %25 {offsets = [0, 2, 0, 0], sizes = [2, 3, 5, 128], strides = [1, 1, 1, 1]} : vector<2x5x7x128xf32> to vector<2x3x5x128xf32>
    %33 = vector.extract_strided_slice %25 {offsets = [0, 2, 1, 0], sizes = [2, 3, 5, 128], strides = [1, 1, 1, 1]} : vector<2x5x7x128xf32> to vector<2x3x5x128xf32>
    %34 = vector.extract_strided_slice %25 {offsets = [0, 2, 2, 0], sizes = [2, 3, 5, 128], strides = [1, 1, 1, 1]} : vector<2x5x7x128xf32> to vector<2x3x5x128xf32>
    %35 = tpu.concatenate %26, %27, %28, %29, %30, %31, %32, %33, %34 in 3 : vector<2x3x5x128xf32>, vector<2x3x5x128xf32>, vector<2x3x5x128xf32>, vector<2x3x5x128xf32>, vector<2x3x5x128xf32>, vector<2x3x5x128xf32>, vector<2x3x5x128xf32>, vector<2x3x5x128xf32>, vector<2x3x5x128xf32> -> vector<2x3x5x1152xf32>
    %36 = vector.shape_cast %35 : vector<2x3x5x1152xf32> to vector<30x1152xf32>
    %c0_8 = arith.constant 0 : index
    %c0_9 = arith.constant 0 : index
    %37 = vector.load %arg4[%c0_8, %c0_9] : memref<1152x256xf32, #tpu.memory_space<vmem>>, vector<1152x256xf32>
    %cst_10 = arith.constant dense<0.000000e+00> : vector<30x256xf32>
    %38 = tpu.matmul %36, %37, %cst_10 {dimension_numbers = #tpu.dot_dimension_numbers<[1], [0], [0], [1], [0, 0, 1, 1], [], []>} : vector<30x1152xf32>, vector<1152x256xf32>, vector<30x256xf32> -> vector<30x256xf32>
    %c0_11 = arith.constant 0 : index
    %c0_12 = arith.constant 0 : index
    %39 = vector.load %arg5[%c0_11, %c0_12] : memref<1x256xf32, #tpu.memory_space<vmem>>, vector<1x256xf32>
    %40 = vector.broadcast %39 : vector<1x256xf32> to vector<30x256xf32>
    %41 = arith.addf %38, %40 : vector<30x256xf32>
    %cst_13 = arith.constant 0.000000e+00 : f32
    %42 = vector.broadcast %cst_13 : f32 to vector<30x256xf32>
    %43 = arith.maximumf %41, %42 : vector<30x256xf32>
    %44 = vector.shape_cast %43 : vector<30x256xf32> to vector<2x3x5x256xf32>
    %45 = vector.extract_strided_slice %44 {offsets = [0, 0, 0, 0], sizes = [2, 1, 3, 256], strides = [1, 1, 1, 1]} : vector<2x3x5x256xf32> to vector<2x1x3x256xf32>
    %46 = vector.extract_strided_slice %44 {offsets = [0, 0, 1, 0], sizes = [2, 1, 3, 256], strides = [1, 1, 1, 1]} : vector<2x3x5x256xf32> to vector<2x1x3x256xf32>
    %47 = vector.extract_strided_slice %44 {offsets = [0, 0, 2, 0], sizes = [2, 1, 3, 256], strides = [1, 1, 1, 1]} : vector<2x3x5x256xf32> to vector<2x1x3x256xf32>
    %48 = vector.extract_strided_slice %44 {offsets = [0, 1, 0, 0], sizes = [2, 1, 3, 256], strides = [1, 1, 1, 1]} : vector<2x3x5x256xf32> to vector<2x1x3x256xf32>
    %49 = vector.extract_strided_slice %44 {offsets = [0, 1, 1, 0], sizes = [2, 1, 3, 256], strides = [1, 1, 1, 1]} : vector<2x3x5x256xf32> to vector<2x1x3x256xf32>
    %50 = vector.extract_strided_slice %44 {offsets = [0, 1, 2, 0], sizes = [2, 1, 3, 256], strides = [1, 1, 1, 1]} : vector<2x3x5x256xf32> to vector<2x1x3x256xf32>
    %51 = vector.extract_strided_slice %44 {offsets = [0, 2, 0, 0], sizes = [2, 1, 3, 256], strides = [1, 1, 1, 1]} : vector<2x3x5x256xf32> to vector<2x1x3x256xf32>
    %52 = vector.extract_strided_slice %44 {offsets = [0, 2, 1, 0], sizes = [2, 1, 3, 256], strides = [1, 1, 1, 1]} : vector<2x3x5x256xf32> to vector<2x1x3x256xf32>
    %53 = vector.extract_strided_slice %44 {offsets = [0, 2, 2, 0], sizes = [2, 1, 3, 256], strides = [1, 1, 1, 1]} : vector<2x3x5x256xf32> to vector<2x1x3x256xf32>
    %54 = tpu.concatenate %45, %46, %47, %48, %49, %50, %51, %52, %53 in 3 : vector<2x1x3x256xf32>, vector<2x1x3x256xf32>, vector<2x1x3x256xf32>, vector<2x1x3x256xf32>, vector<2x1x3x256xf32>, vector<2x1x3x256xf32>, vector<2x1x3x256xf32>, vector<2x1x3x256xf32>, vector<2x1x3x256xf32> -> vector<2x1x3x2304xf32>
    %55 = vector.shape_cast %54 : vector<2x1x3x2304xf32> to vector<6x2304xf32>
    %c0_14 = arith.constant 0 : index
    %c0_15 = arith.constant 0 : index
    %56 = vector.load %arg6[%c0_14, %c0_15] : memref<2304x128xf32, #tpu.memory_space<vmem>>, vector<2304x128xf32>
    %cst_16 = arith.constant dense<0.000000e+00> : vector<6x128xf32>
    %57 = tpu.matmul %55, %56, %cst_16 {dimension_numbers = #tpu.dot_dimension_numbers<[1], [0], [0], [1], [0, 0, 1, 1], [], []>} : vector<6x2304xf32>, vector<2304x128xf32>, vector<6x128xf32> -> vector<6x128xf32>
    %c0_17 = arith.constant 0 : index
    %c0_18 = arith.constant 0 : index
    %58 = vector.load %arg7[%c0_17, %c0_18] : memref<1x128xf32, #tpu.memory_space<vmem>>, vector<1x128xf32>
    %59 = vector.broadcast %58 : vector<1x128xf32> to vector<6x128xf32>
    %60 = arith.addf %57, %59 : vector<6x128xf32>
    %cst_19 = arith.constant 0.000000e+00 : f32
    %61 = vector.broadcast %cst_19 : f32 to vector<6x128xf32>
    %62 = arith.maximumf %60, %61 : vector<6x128xf32>
    %63 = vector.shape_cast %62 : vector<6x128xf32> to vector<2x1x3x128xf32>
    %64 = vector.shape_cast %63 : vector<2x1x3x128xf32> to vector<2x384xf32>
    %c0_20 = arith.constant 0 : index
    %c0_21 = arith.constant 0 : index
    %65 = vector.load %arg8[%c0_20, %c0_21] : memref<384x128xf32, #tpu.memory_space<vmem>>, vector<384x128xf32>
    %cst_22 = arith.constant dense<0.000000e+00> : vector<2x128xf32>
    %66 = tpu.matmul %64, %65, %cst_22 {dimension_numbers = #tpu.dot_dimension_numbers<[1], [0], [0], [1], [0, 0, 1, 1], [], []>} : vector<2x384xf32>, vector<384x128xf32>, vector<2x128xf32> -> vector<2x128xf32>
    %c0_23 = arith.constant 0 : index
    %c0_24 = arith.constant 0 : index
    %67 = vector.load %arg9[%c0_23, %c0_24] : memref<1x128xf32, #tpu.memory_space<vmem>>, vector<1x128xf32>
    %68 = vector.broadcast %67 : vector<1x128xf32> to vector<2x128xf32>
    %69 = arith.addf %66, %68 : vector<2x128xf32>
    %cst_25 = arith.constant 0.000000e+00 : f32
    %70 = vector.broadcast %cst_25 : f32 to vector<2x128xf32>
    %71 = arith.maximumf %69, %70 : vector<2x128xf32>
    %c0_26 = arith.constant 0 : index
    %c0_27 = arith.constant 0 : index
    %72 = vector.load %arg10[%c0_26, %c0_27] : memref<128x128xf32, #tpu.memory_space<vmem>>, vector<128x128xf32>
    %cst_28 = arith.constant dense<0.000000e+00> : vector<2x128xf32>
    %73 = tpu.matmul %71, %72, %cst_28 {dimension_numbers = #tpu.dot_dimension_numbers<[1], [0], [0], [1], [0, 0, 1, 1], [], []>} : vector<2x128xf32>, vector<128x128xf32>, vector<2x128xf32> -> vector<2x128xf32>
    %c0_29 = arith.constant 0 : index
    %c0_30 = arith.constant 0 : index
    %74 = vector.load %arg11[%c0_29, %c0_30] : memref<1x128xf32, #tpu.memory_space<vmem>>, vector<1x128xf32>
    %75 = vector.broadcast %74 : vector<1x128xf32> to vector<2x128xf32>
    %76 = arith.addf %73, %75 : vector<2x128xf32>
    %cst_31 = arith.constant 0.000000e+00 : f32
    %77 = vector.broadcast %cst_31 : f32 to vector<2x128xf32>
    %78 = arith.maximumf %76, %77 : vector<2x128xf32>
    %c0_32 = arith.constant 0 : index
    %c0_33 = arith.constant 0 : index
    %79 = vector.load %arg12[%c0_32, %c0_33] : memref<128x128xf32, #tpu.memory_space<vmem>>, vector<128x128xf32>
    %cst_34 = arith.constant dense<0.000000e+00> : vector<2x128xf32>
    %80 = tpu.matmul %78, %79, %cst_34 {dimension_numbers = #tpu.dot_dimension_numbers<[1], [0], [0], [1], [0, 0, 1, 1], [], []>} : vector<2x128xf32>, vector<128x128xf32>, vector<2x128xf32> -> vector<2x128xf32>
    %c0_35 = arith.constant 0 : index
    %c0_36 = arith.constant 0 : index
    %81 = vector.load %arg13[%c0_35, %c0_36] : memref<1x128xf32, #tpu.memory_space<vmem>>, vector<1x128xf32>
    %82 = vector.broadcast %81 : vector<1x128xf32> to vector<2x128xf32>
    %83 = arith.addf %80, %82 : vector<2x128xf32>
    %c0_37 = arith.constant 0 : index
    %c0_38 = arith.constant 0 : index
    %84 = vector.load %arg14[%c0_37, %c0_38] : memref<2x128xf32, #tpu.memory_space<vmem>>, vector<2x128xf32>
    tpu.vector_store %arg14[%c0_37, %c0_38], %83 {strides = array<i32>} : memref<2x128xf32, #tpu.memory_space<vmem>>, vector<2x128xf32>,
    return
  }
  func.func @transform_0(%arg0: i32) -> (i32, i32, i32, i32) {
    %c0_i32 = arith.constant 0 : i32
    %c0_i32_0 = arith.constant 0 : i32
    %c0_i32_1 = arith.constant 0 : i32
    %c0_i32_2 = arith.constant 0 : i32
    %c0_i32_3 = arith.constant 0 : i32
    return %c0_i32, %c0_i32_0, %c0_i32_1, %c0_i32_2 : i32, i32, i32, i32
  }
  func.func @transform_1(%arg0: i32) -> (i32, i32) {
    %c0_i32 = arith.constant 0 : i32
    %c0_i32_0 = arith.constant 0 : i32
    %c0_i32_1 = arith.constant 0 : i32
    return %c0_i32, %c0_i32_0 : i32, i32
  }
  func.func @transform_2(%arg0: i32) -> (i32, i32) {
    %c0_i32 = arith.constant 0 : i32
    %c0_i32_0 = arith.constant 0 : i32
    %c0_i32_1 = arith.constant 0 : i32
    return %c0_i32, %c0_i32_0 : i32, i32
  }
  func.func @transform_3(%arg0: i32) -> (i32, i32) {
    %c0_i32 = arith.constant 0 : i32
    %c0_i32_0 = arith.constant 0 : i32
    %c0_i32_1 = arith.constant 0 : i32
    return %c0_i32, %c0_i32_0 : i32, i32
  }
  func.func @transform_4(%arg0: i32) -> (i32, i32) {
    %c0_i32 = arith.constant 0 : i32
    %c0_i32_0 = arith.constant 0 : i32
    %c0_i32_1 = arith.constant 0 : i32
    return %c0_i32, %c0_i32_0 : i32, i32
  }
  func.func @transform_5(%arg0: i32) -> (i32, i32) {
    %c0_i32 = arith.constant 0 : i32
    %c0_i32_0 = arith.constant 0 : i32
    %c0_i32_1 = arith.constant 0 : i32
    return %c0_i32, %c0_i32_0 : i32, i32
  }
  func.func @transform_6(%arg0: i32) -> (i32, i32) {
    %c0_i32 = arith.constant 0 : i32
    %c0_i32_0 = arith.constant 0 : i32
    %c0_i32_1 = arith.constant 0 : i32
    return %c0_i32, %c0_i32_0 : i32, i32
  }
  func.func @transform_7(%arg0: i32) -> (i32, i32) {
    %c0_i32 = arith.constant 0 : i32
    %c0_i32_0 = arith.constant 0 : i32
    %c0_i32_1 = arith.constant 0 : i32
    return %c0_i32, %c0_i32_0 : i32, i32
  }
  func.func @transform_8(%arg0: i32) -> (i32, i32) {
    %c0_i32 = arith.constant 0 : i32
    %c0_i32_0 = arith.constant 0 : i32
    %c0_i32_1 = arith.constant 0 : i32
    return %c0_i32, %c0_i32_0 : i32, i32
  }
  func.func @transform_9(%arg0: i32) -> (i32, i32) {
    %c0_i32 = arith.constant 0 : i32
    %c0_i32_0 = arith.constant 0 : i32
    %c0_i32_1 = arith.constant 0 : i32
    return %c0_i32, %c0_i32_0 : i32, i32
  }
  func.func @transform_10(%arg0: i32) -> (i32, i32) {
    %c0_i32 = arith.constant 0 : i32
    %c0_i32_0 = arith.constant 0 : i32
    %c0_i32_1 = arith.constant 0 : i32
    return %c0_i32, %c0_i32_0 : i32, i32
  }
  func.func @transform_11(%arg0: i32) -> (i32, i32) {
    %c0_i32 = arith.constant 0 : i32
    %c0_i32_0 = arith.constant 0 : i32
    %c0_i32_1 = arith.constant 0 : i32
    return %c0_i32, %c0_i32_0 : i32, i32
  }
  func.func @transform_12(%arg0: i32) -> (i32, i32) {
    %c0_i32 = arith.constant 0 : i32
    %c0_i32_0 = arith.constant 0 : i32
    %c0_i32_1 = arith.constant 0 : i32
    return %c0_i32, %c0_i32_0 : i32, i32
  }
  func.func @transform_13(%arg0: i32) -> (i32, i32) {
    %c0_i32 = arith.constant 0 : i32
    %c0_i32_0 = arith.constant 0 : i32
    %c0_i32_1 = arith.constant 0 : i32
    return %c0_i32, %c0_i32_0 : i32, i32
  }
}

</mosaic_0001>

<bundles_post_ra>
// kernel: dqn_forward.1
= control target key start
LH: loop header
LB: loop body
LE: loop exit
PB: predicated region body
PF: predicated region fallthrough
CT: control target
= control target key end

     0   :  { %18 = vsyncpa [#allocation3], 0  ;;  %s12352_s0 = inlined_call_operand.vmem [shape: f32[2,7,11,8], index: 0, kind: input, shape index: {}]   ;;  %s12353_s1 = inlined_call_operand.hbm [shape: f32[120,128], index: 1, kind: input, shape index: {}]   ;;  %s12354_s2 = inlined_call_operand.hbm [shape: f32[1,128], index: 2, kind: input, shape index: {}]   ;;  %s12355_s3 = inlined_call_operand.hbm [shape: f32[1152,256], index: 3, kind: input, shape index: {}]   ;;  %s12356_s4 = inlined_call_operand.hbm [shape: f32[1,256], index: 4, kind: input, shape index: {}]   ;;  %s12357_s5 = inlined_call_operand.hbm [shape: f32[2304,128], index: 5, kind: input, shape index: {}]   ;;  %s12358_s6 = inlined_call_operand.hbm [shape: f32[1,128], index: 6, kind: input, shape index: {}]   ;;  %s12359_s7 = inlined_call_operand.hbm [shape: f32[384,128], index: 7, kind: input, shape index: {}]   ;;  %s12360_s8 = inlined_call_operand.hbm [shape: f32[1,128], index: 8, kind: input, shape index: {}]   ;;  %s12361_s9 = inlined_call_operand.hbm [shape: f32[128,128], index: 9, kind: input, shape index: {}]   ;;  %s12362_s10 = inlined_call_operand.hbm [shape: f32[1,128], index: 10, kind: input, shape index: {}]   ;;  %s12363_s11 = inlined_call_operand.hbm [shape: f32[128,128], index: 11, kind: input, shape index: {}]   ;;  %s12364_s12 = inlined_call_operand.hbm [shape: f32[1,128], index: 12, kind: input, shape index: {}]   ;;  %s12365_s13 = inlined_call_operand.hbm [shape: f32[2,128], index: 13, kind: output, shape index: {}]  }
   0x1   :  { %19 = vsyncpa [#allocation6], 0 }
   0x2   :  { %20 = vsyncpa [#allocation9], 0 }
   0x3   :  { %21 = vsyncpa [#allocation12], 0 }
   0x4   :  { %22 = vsyncpa [#allocation15], 0 }
   0x5   :  { %23 = vsyncpa [#allocation18], 0 }
   0x6   :  { %24 = vsyncpa [#allocation21], 0 }
   0x7   :  { %25 = vsyncpa [#allocation4], 0  ;;  %s9757_s25 = smov [#allocation5]   ;;  %s9758_s27 = smov [#allocation8]  }
   0x8   :  { %s46_s26 = sshll.u32 %s9757_s25, 4  ;;  %s68_s28 = sshll.u32 %s9758_s27, 4  ;;  %s47_s26 = int_to_ptr.vmem [resolvable:$true] %s46_s26  ;;  %s69_s28 = int_to_ptr.vmem [resolvable:$true] %s68_s28 }
   0x9   :  { %s9489_s29 = scalar_lea.vmem %s47_s26, 16  ;;  %s9493_s30 = scalar_lea.vmem %s47_s26, 32 }
   0xa   :  { %p9490_p0 = scmp.ne.s32.totalorder %s47_s26, %s9489_s29  ;;  %p9494_p1 = scmp.lt.s32.totalorder %s47_s26, %s47_s26 }
   0xb   :  { %p9495_p2 = scmp.lt.s32.totalorder %s9493_s30, %s9489_s29 }
   0xd   :  { %p9496_p3 = por %p9495_p2, %p9494_p1 }
   0xf   :  { %p9497_p4 = pnand %p9496_p3, %p9490_p0 }
  0x11   :  { %9500 = shalt.err (!%p9497_p4)
}
  0x12   :  { %49 = dma.hbm_to_vmem [thread:$0]  %s12354_s2, 16, %s47_s26, [#allocation6]  }
  0x13   :  { %s9509_s16 = scalar_lea.vmem %s69_s28, 32  ;;  %p9514_p6 = scmp.lt.s32.totalorder %s69_s28, %s69_s28 }
  0x14   :  { %p9510_p5 = scmp.ne.s32.totalorder %s69_s28, %s9509_s16  ;;  %p9515_p7 = scmp.lt.s32.totalorder %s9509_s16, %s9509_s16 }
  0x16   :  { %p9516_p8 = por %p9515_p7, %p9514_p6 }
  0x18   :  { %p9517_p9 = pnand %p9516_p8, %p9510_p5 }
  0x1a   :  { %9520 = shalt.err (!%p9517_p9)
}
  0x1b   :  { %71 = dma.hbm_to_vmem [thread:$0]  %s12356_s4, 32, %s69_s28, [#allocation9]  }
  0x1c   :  { %s9759_s19 = smov [#allocation11]   ;;  %s9760_s21 = smov [#allocation14]  }
  0x1d   :  { %s90_s20 = sshll.u32 %s9759_s19, 4  ;;  %s112_s22 = sshll.u32 %s9760_s21, 4  ;;  %s91_s20 = int_to_ptr.vmem [resolvable:$true] %s90_s20  ;;  %s113_s22 = int_to_ptr.vmem [resolvable:$true] %s112_s22 }
  0x1e   :  { %s9529_s23 = scalar_lea.vmem %s91_s20, 16  ;;  %s9533_s2 = scalar_lea.vmem %s91_s20, 32 }
  0x1f   :  { %p9530_p10 = scmp.ne.s32.totalorder %s91_s20, %s9529_s23  ;;  %p9534_p11 = scmp.lt.s32.totalorder %s91_s20, %s91_s20 }
  0x20   :  { %p9535_p12 = scmp.lt.s32.totalorder %s9533_s2, %s9529_s23 }
  0x22   :  { %p9536_p13 = por %p9535_p12, %p9534_p11 }
  0x24   :  { %p9537_p0 = pnand %p9536_p13, %p9530_p10 }
  0x26   :  { %9540 = shalt.err (!%p9537_p0)
}
  0x27   :  { %93 = dma.hbm_to_vmem [thread:$0]  %s12358_s6, 16, %s91_s20, [#allocation12]  }
  0x28   :  { %s9549_s26 = scalar_lea.vmem %s113_s22, 16  ;;  %s9553_s4 = scalar_lea.vmem %s113_s22, 32 }
  0x29   :  { %p9550_p1 = scmp.ne.s32.totalorder %s113_s22, %s9549_s26  ;;  %p9554_p2 = scmp.lt.s32.totalorder %s113_s22, %s113_s22 }
  0x2a   :  { %p9555_p3 = scmp.lt.s32.totalorder %s9553_s4, %s9549_s26 }
  0x2c   :  { %p9556_p4 = por %p9555_p3, %p9554_p2 }
  0x2e   :  { %p9557_p5 = pnand %p9556_p4, %p9550_p1 }
  0x30   :  { %9560 = shalt.err (!%p9557_p5)
}
  0x31   :  { %115 = dma.hbm_to_vmem [thread:$0]  %s12360_s8, 16, %s113_s22, [#allocation15]  }
  0x32   :  { %s9761_s29 = smov [#allocation17]   ;;  %s9762_s14 = smov [#allocation2]  }
  0x33   :  { %s134_s30 = sshll.u32 %s9761_s29, 4  ;;  %s33_s15 = sshll.u32 %s9762_s14, 4  ;;  %s135_s30 = int_to_ptr.vmem [resolvable:$true] %s134_s30  ;;  %s34_s15 = int_to_ptr.vmem [resolvable:$true] %s33_s15 }
  0x34   :  { %s9569_s16 = scalar_lea.vmem %s135_s30, 16  ;;  %s9573_s6 = scalar_lea.vmem %s135_s30, 32 }
  0x35   :  { %p9570_p6 = scmp.ne.s32.totalorder %s135_s30, %s9569_s16  ;;  %p9574_p7 = scmp.lt.s32.totalorder %s135_s30, %s135_s30 }
  0x36   :  { %p9575_p8 = scmp.lt.s32.totalorder %s9573_s6, %s9569_s16 }
  0x38   :  { %p9576_p9 = por %p9575_p8, %p9574_p7 }
  0x3a   :  { %p9577_p10 = pnand %p9576_p9, %p9570_p6 }
  0x3c   :  { %9580 = shalt.err (!%p9577_p10)
}
  0x3d   :  { %137 = dma.hbm_to_vmem [thread:$0]  %s12362_s10, 16, %s135_s30, [#allocation18]  }
  0x3e   :  { %s9589_s19 = scalar_lea.vmem %s34_s15, 1920  ;;  %p9594_p12 = scmp.lt.s32.totalorder %s34_s15, %s34_s15 }
  0x3f   :  { %p9590_p11 = scmp.ne.s32.totalorder %s34_s15, %s9589_s19  ;;  %p9595_p13 = scmp.lt.s32.totalorder %s9589_s19, %s9589_s19 }
  0x41   :  { %p9596_p0 = por %p9595_p13, %p9594_p12 }
  0x43   :  { %p9597_p1 = pnand %p9596_p0, %p9590_p11 }
  0x45   :  { %9600 = shalt.err (!%p9597_p1)
}
  0x46   :  { %s9763_s8 = smov 128   ;;  %s9764_s20 = smov 8  }
  0x47   :  { %39 = dma.hbm_to_vmem [thread:$0]  %s12353_s1, 1920, %s34_s15, [#allocation3], %s9763_s8, %s9763_s8, %s9764_s20  }
  0x48   :  { %s9765_s23 = smov [#allocation7]  }
  0x49   :  { %s55_s2 = sshll.u32 %s9765_s23, 4  ;;  %s56_s2 = int_to_ptr.vmem [resolvable:$true] %s55_s2 }
  0x4a   :  { %s9609_s10 = scalar_lea.vmem %s56_s2, 36864  ;;  %p9614_p3 = scmp.lt.s32.totalorder %s56_s2, %s56_s2 }
  0x4b   :  { %p9610_p2 = scmp.ne.s32.totalorder %s56_s2, %s9609_s10  ;;  %p9615_p4 = scmp.lt.s32.totalorder %s9609_s10, %s9609_s10 }
  0x4d   :  { %p9616_p5 = por %p9615_p4, %p9614_p3 }
  0x4f   :  { %p9617_p6 = pnand %p9616_p5, %p9610_p2 }
  0x51   :  { %9620 = shalt.err (!%p9617_p6)
}
  0x52   :  { %s9766_s24 = smov 256   ;;  %s9767_s25 = smov 16  }
  0x53   :  { %61 = dma.hbm_to_vmem [thread:$0]  %s12355_s3, 36864, %s56_s2, [#allocation6], %s9766_s24, %s9766_s24, %s9767_s25  }
  0x54   :  { %s9768_s27 = smov [#allocation10]   ;;  %s9769_s1 = smov [#allocation13]  }
  0x55   :  { %s77_s28 = sshll.u32 %s9768_s27, 4  ;;  %s99_s29 = sshll.u32 %s9769_s1, 4  ;;  %s78_s28 = int_to_ptr.vmem [resolvable:$true] %s77_s28  ;;  %s100_s29 = int_to_ptr.vmem [resolvable:$true] %s99_s29 }
  0x56   :  { %s9629_s30 = scalar_lea.vmem %s78_s28, 36864  ;;  %p9634_p8 = scmp.lt.s32.totalorder %s78_s28, %s78_s28 }
  0x57   :  { %p9630_p7 = scmp.ne.s32.totalorder %s78_s28, %s9629_s30  ;;  %p9635_p9 = scmp.lt.s32.totalorder %s9629_s30, %s9629_s30 }
  0x59   :  { %p9636_p10 = por %p9635_p9, %p9634_p8 }
  0x5b   :  { %p9637_p11 = pnand %p9636_p10, %p9630_p7 }
  0x5d   :  { %9640 = shalt.err (!%p9637_p11)
}
  0x5e   :  { %83 = dma.hbm_to_vmem [thread:$0]  %s12357_s5, 36864, %s78_s28, [#allocation9], %s9763_s8, %s9763_s8, %s9764_s20  }
  0x5f   :  { %s9649_s3 = scalar_lea.vmem %s100_s29, 6144  ;;  %p9654_p13 = scmp.lt.s32.totalorder %s100_s29, %s100_s29 }
  0x60   :  { %p9650_p12 = scmp.ne.s32.totalorder %s100_s29, %s9649_s3  ;;  %p9655_p0 = scmp.lt.s32.totalorder %s9649_s3, %s9649_s3 }
  0x62   :  { %p9656_p1 = por %p9655_p0, %p9654_p13 }
  0x64   :  { %p9657_p2 = pnand %p9656_p1, %p9650_p12 }
  0x66   :  { %9660 = shalt.err (!%p9657_p2)
}
  0x67   :  { %105 = dma.hbm_to_vmem [thread:$0]  %s12359_s7, 6144, %s100_s29, [#allocation12], %s9763_s8, %s9763_s8, %s9764_s20  }
  0x68   :  { %s9770_s17 = smov [#allocation16]   ;;  %s9771_s19 = smov [#allocation19]  }
  0x69   :  { %s121_s18 = sshll.u32 %s9770_s17, 4  ;;  %s143_s5 = sshll.u32 %s9771_s19, 4  ;;  %s122_s18 = int_to_ptr.vmem [resolvable:$true] %s121_s18  ;;  %s144_s5 = int_to_ptr.vmem [resolvable:$true] %s143_s5 }
  0x6a   :  { %s9669_s21 = scalar_lea.vmem %s122_s18, 2048  ;;  %p9674_p4 = scmp.lt.s32.totalorder %s122_s18, %s122_s18 }
  0x6b   :  { %p9670_p3 = scmp.ne.s32.totalorder %s122_s18, %s9669_s21  ;;  %p9675_p5 = scmp.lt.s32.totalorder %s9669_s21, %s9669_s21 }
  0x6d   :  { %p9676_p6 = por %p9675_p5, %p9674_p4 }
  0x6f   :  { %p9677_p7 = pnand %p9676_p6, %p9670_p3 }
  0x71   :  { %9680 = shalt.err (!%p9677_p7)
}
  0x72   :  { %127 = dma.hbm_to_vmem [thread:$0]  %s12361_s9, 2048, %s122_s18, [#allocation15], %s9763_s8, %s9763_s8, %s9764_s20  }
  0x73   :  { %s9689_s7 = scalar_lea.vmem %s144_s5, 2048  ;;  %p9694_p9 = scmp.lt.s32.totalorder %s144_s5, %s144_s5 }
  0x74   :  { %p9690_p8 = scmp.ne.s32.totalorder %s144_s5, %s9689_s7  ;;  %p9695_p10 = scmp.lt.s32.totalorder %s9689_s7, %s9689_s7 }
  0x76   :  { %p9696_p11 = por %p9695_p10, %p9694_p9 }
  0x78   :  { %p9697_p12 = pnand %p9696_p11, %p9690_p8 }
  0x7a   :  { %9700 = shalt.err (!%p9697_p12)
}
  0x7b   :  { %149 = dma.hbm_to_vmem [thread:$0]  %s12363_s11, 2048, %s144_s5, [#allocation18], %s9763_s8, %s9763_s8, %s9764_s20  }
  0x7c   :  { %s9772_s24 = smov [#allocation20]  }
  0x7d   :  { %s156_s26 = sshll.u32 %s9772_s24, 4  ;;  %s157_s26 = int_to_ptr.vmem [resolvable:$true] %s156_s26 }
  0x7e   :  { %s9709_s4 = scalar_lea.vmem %s157_s26, 16  ;;  %s9713_s9 = scalar_lea.vmem %s157_s26, 32 }
  0x7f   :  { %p9710_p13 = scmp.ne.s32.totalorder %s157_s26, %s9709_s4  ;;  %p9714_p0 = scmp.lt.s32.totalorder %s157_s26, %s157_s26 }
  0x80   :  { %p9715_p1 = scmp.lt.s32.totalorder %s9713_s9, %s9709_s4 }
  0x82   :  { %p9716_p2 = por %p9715_p1, %p9714_p0 }
  0x84   :  { %p9717_p3 = pnand %p9716_p2, %p9710_p13 }
  0x86   :  { %9720 = shalt.err (!%p9717_p3)
}
  0x87   :  { %159 = dma.hbm_to_vmem [thread:$0]  %s12364_s12, 16, %s157_s26, [#allocation21]  }
  0x88   :  { %9741 = dma.done.wait [#allocation3], 1920  }
  0x89   :  { %9742 = vsyncadd [#allocation3], 4294965376 }
  0x8a   :  { %9743 = dma.done.wait [#allocation6], 36880  }
  0x8b   :  { %9744 = vsyncadd [#allocation6], 4294930416 }
  0x8c   :  { %9745 = dma.done.wait [#allocation9], 36896  }
  0x8d   :  { %9746 = vsyncadd [#allocation9], 4294930400 }
  0x8e   :  { %9747 = dma.done.wait [#allocation12], 6160  }
  0x8f   :  { %9748 = vsyncadd [#allocation12], 4294961136 }
  0x90   :  { %9749 = dma.done.wait [#allocation15], 2064  }
  0x91   :  { %9750 = vsyncadd [#allocation15], 4294965232 }
  0x92   :  { %9751 = dma.done.wait [#allocation18], 2064  }
  0x93   :  { %9752 = vsyncadd [#allocation18], 4294965232 }
  0x94   :  { %9753 = dma.done.wait [#allocation21], 16  }
  0x95   :  { %9754 = vsyncadd [#allocation21], 4294967280  ;;  %v9914_v0 = vld [vmem:[%s12352_s0 + $0x10] sm:$0xff]  ;;  %v9919_v1 = vld [vmem:[%s12352_s0] sm:$0xff]  ;;  %vm12371_vm0 = vcmask 1044480   ;;  %s9773_s14 = smov 40  }
  0x96   :  { %v197_v2 = vld [vmem:[%s12352_s0 + $0x8] sm:$0x7]  ;;  %469 = vrot.lane.b32.xlu1 %v9914_v0, %s9773_s14  ;;  %v234_v3 = vrot.slane %v9919_v1, 1  ;;  %v346_v4 = vrot.slane %v9919_v1, 3  ;;  %v407_v6 = vrot.slane %v9919_v1, 4  ;;  %v235_v9 = vrot.slane %v9914_v0, 1 }
  0x97   :  { %v347_v5 = vrot.slane %v197_v2, 3  ;;  %v408_v7 = vrot.slane %v197_v2, 4  ;;  %vm12369_vm1 = vcmask 1043456   ;;  %v285_v10 = vrot.slane %v9919_v1, 2  ;;  %s9774_s15 = smov 24   ;;  %s9775_s6 = smov 32  }
  0x98   :  { %244 = vrot.lane.b32.xlu0 %v234_v3, %s9764_s20  ;;  %v286_v11 = vrot.slane %v197_v2, 2  ;;  %vm12370_vm2 = vcmask 1045504   ;;  %v199_v12 = vld [vmem:[%s12352_s0 + $0x18] sm:$0x7]  ;;  %v288_v15 = vrot.slane %v9914_v0, 2  ;;  %v349_v17 = vrot.slane %v9914_v0, 3 }
  0x99   :  { %v348_v8 = vsel %vm12371_vm0, %v346_v4, %v347_v5  ;;  %v409_v13 = vsel %vm12369_vm1, %v407_v6, %v408_v7  ;;  %v289_v16 = vrot.slane %v199_v12, 2  ;;  %v350_v18 = vrot.slane %v199_v12, 3  ;;  %v9947_v19 = vld [vmem:[%s12352_s0 + $0x20] sm:$0xff]  ;;  %v201_v20 = vld [vmem:[%s12352_s0 + $0x28] sm:$0x7]  ;;  %s9776_s21 = smov 48  }
  0x9a   :  { %376 = vrot.lane.b32.xlu1 %v348_v8, %s9774_s15  ;;  %v287_v14 = vsel %vm12370_vm2, %v285_v10, %v286_v11  ;;  %v291_v23 = vrot.slane %v9947_v19, 2  ;;  %v292_v24 = vrot.slane %v201_v20, 2  ;;  %v236_v25 = vrot.slane %v9947_v19, 1  ;;  %s9777_s22 = smov 56   ;;  %s9778_s23 = smov 64   ;;  %v9979_v36 = vld [vmem:[%s12352_s0 + $0x30] sm:$0xff] }
  0x9b   :  { %v290_v21 = vsel %vm12370_vm2, %v288_v15, %v289_v16  ;;  %v351_v22 = vsel %vm12371_vm0, %v349_v17, %v350_v18  ;;  %v410_v27 = vrot.slane %v9914_v0, 4  ;;  %v411_v28 = vrot.slane %v199_v12, 4  ;;  %s9779_s7 = smov 72   ;;  %s9780_s24 = smov 80   ;;  %v203_v38 = vld [vmem:[%s12352_s0 + $0x38] sm:$0x7] }
  0x9c   :  { %246 = vrot.lane.b32.xlu0 %v235_v9, %s9764_s20  ;;  %v293_v26 = vsel %vm12370_vm2, %v291_v23, %v292_v24  ;;  %v352_v30 = vrot.slane %v9947_v19, 3  ;;  %v353_v31 = vrot.slane %v201_v20, 3  ;;  %v413_v32 = vrot.slane %v9947_v19, 4  ;;  %s9781_s9 = smov 88   ;;  %s9782_s27 = smov 96   ;;  %v10019_v48 = vld [vmem:[%s12352_s0 + $0x40] sm:$0xff] }
  0x9d   :  { %v412_v29 = vsel %vm12369_vm1, %v410_v27, %v411_v28  ;;  %v414_v33 = vrot.slane %v201_v20, 4  ;;  %v237_v37 = vrot.slane %v9979_v36, 1  ;;  %v294_v39 = vrot.slane %v9979_v36, 2  ;;  %s9783_s28 = smov 104   ;;  %s9784_s12 = smov 112   ;;  %v1473_v52 = vld [vmem:[#allocation2 + $0x70] sm:$0xff] }
  0x9e   :  { %437 = vrot.lane.b32.xlu1 %v409_v13, %s9775_s6  ;;  %v354_v34 = vsel %vm12371_vm0, %v352_v30, %v353_v31  ;;  %v295_v40 = vrot.slane %v203_v38, 2  ;;  %v355_v42 = vrot.slane %v9979_v36, 3  ;;  %v356_v43 = vrot.slane %v203_v38, 3  ;;  %v205_v50 = vld [vmem:[%s12352_s0 + $0x48] sm:$0x7]  ;;  %v1471_v56 = vld [vmem:[#allocation2 + $0x60] sm:$0xff] }
  0x9f   :  { %v415_v35 = vsel %vm12369_vm1, %v413_v32, %v414_v33  ;;  %v416_v45 = vrot.slane %v9979_v36, 4  ;;  %v417_v46 = vrot.slane %v203_v38, 4  ;;  %v238_v49 = vrot.slane %v10019_v48, 1  ;;  %v1472_v53 = vld [vmem:[#allocation2 + $0x68] sm:$0xff]  ;;  %v1470_v57 = vld [vmem:[#allocation2 + $0x58] sm:$0xff]  ;;  %v1469_v59 = vld [vmem:[#allocation2 + $0x50] sm:$0xff] }
  0xa0   :  { %315 = vrot.lane.b32.xlu0 %v287_v14, %s9767_s25  ;;  %v296_v41 = vsel %vm12370_vm2, %v294_v39, %v295_v40  ;;  %v10001_v44 = vsel %vm12371_vm0, %v355_v42, %v356_v43  ;;  %v12373_v51 = vmov 0.0   ;;  %v297_v54 = vrot.slane %v10019_v48, 2  ;;  %v1468_v60 = vld [vmem:[#allocation2 + $0x48] sm:$0xff]  ;;  %v1467_v63 = vld [vmem:[#allocation2 + $0x40] sm:$0xff]  ;;  %v1466_v3 = vld [vmem:[#allocation2 + $0x38] sm:$0xff] }
  0xa1   :  { %v10010_v47 = vsel %vm12369_vm1, %v416_v45, %v417_v46  ;;  %9285 = vmatprep.subr.mxu0 %v12373_v51  ;;  %v298_v55 = vrot.slane %v205_v50, 2  ;;  %v358_v61 = vrot.slane %v10019_v48, 3  ;;  %v359_v62 = vrot.slane %v205_v50, 3  ;;  %v1465_v4 = vld [vmem:[#allocation2 + $0x30] sm:$0xff]  ;;  %v1464_v7 = vld [vmem:[#allocation2 + $0x28] sm:$0xff]  ;;  %v1463_v8 = vld [vmem:[#allocation2 + $0x20] sm:$0xff] }
  0xa2   :  { %501 = vrot.lane.b32.xlu1 %v235_v9, %s9776_s21  ;;  %9286 = vmatpush3.msra.mxu0 %v1473_v52  ;;  %v419_v5 = vrot.slane %v10019_v48, 4  ;;  %v420_v6 = vrot.slane %v205_v50, 4  ;;  %v1462_v10 = vld [vmem:[#allocation2 + $0x18] sm:$0xff]  ;;  %v1461_v11 = vld [vmem:[#allocation2 + $0x10] sm:$0xff]  ;;  %v1460_v12 = vld [vmem:[#allocation2 + $0x8] sm:$0xff]  ;;  %vm12366_vm3 = vmmov 0  }
  0xa3   :  { %9287 = vmatprep.subr.mxu0 %v12373_v51  ;;  %v299_v58 = vsel %vm12370_vm2, %v297_v54, %v298_v55  ;;  %v360_v2 = vsel %vm12371_vm0, %v358_v61, %v359_v62  ;;  %v206_v13 = vld [vmem:[%s12352_s0 + $0x50] sm:$0xff]  ;;  %v1459_v14 = vld [vmem:[#allocation2] sm:$0xff]  ;;  %9315 = vmatprep.mubr.msk.f32.mxu0 %vm12366_vm3, %v12373_v51  ;;  %v207_v16 = vld [vmem:[%s12352_s0 + $0x58] sm:$0x7]  ;;  %vm815_vm4 = vcmask 64512   ;;  %vm826_vm5 = vcmask 130048  }
  0xa4   :  { %317 = vrot.lane.b32.xlu0 %v290_v21, %s9767_s25  ;;  %9288 = vmatpush3.msra.mxu0 %v1472_v53  ;;  %v421_v9 = vsel %vm12369_vm1, %v419_v5, %v420_v6  ;;  %v499_v15 = vrot.slane %v206_v13, 1  ;;  %v533_v17 = vrot.slane %v206_v13, 2  ;;  %v534_v18 = vrot.slane %v207_v16, 2  ;;  %v208_v31 = vld [vmem:[%s12352_s0 + $0x60] sm:$0xff]  ;;  %v209_v32 = vld [vmem:[%s12352_s0 + $0x68] sm:$0x7] }
  0xa5   :  { %9289 = vmatprep.subr.mxu0 %v12373_v51  ;;  %v570_v23 = vrot.slane %v207_v16, 3  ;;  %v605_v27 = vrot.slane %v206_v13, 4  ;;  %v606_v28 = vrot.slane %v207_v16, 4  ;;  %v780_v42 = vrot.slane %v209_v32, 4  ;;  %v10123_v45 = vld [vmem:[%s12352_s0 + $0x70] sm:$0xff] }
  0xa6   :  { %378 = vrot.lane.b32.xlu1 %v351_v22, %s9774_s15  ;;  %9290 = vmatpush3.msra.mxu0 %v1471_v56  ;;  %v211_v46 = vld [vmem:[%s12352_s0 + $0x78] sm:$0x7]  ;;  %v300_v53 = vrot.slane %v10123_v45, 2  ;;  %v239_v62 = vrot.slane %v10123_v45, 1  ;;  %vm837_vm6 = vcmask 195584   ;;  %vm848_vm7 = vcmask 261120  }
  0xa7   :  { %9291 = vmatprep.subr.mxu0 %v12373_v51  ;;  %v607_v33 = vsel %vm12369_vm1, %v605_v27, %v606_v28  ;;  %v301_v54 = vrot.slane %v211_v46, 2  ;;  %vm859_vm8 = vcmask 326656   ;;  %vm870_vm9 = vcmask 392192  }
  0xa8   :  { %248 = vrot.lane.b32.xlu0 %v236_v25, %s9764_s20  ;;  %9292 = vmatpush3.msra.mxu0 %v1470_v57  ;;  %vm881_vm10 = vcmask 457728   ;;  %vm892_vm11 = vcmask 523264   ;;  %vm12368_vm12 = vcmask 588800   ;;  %vm914_vm13 = vcmask 654336  }
  0xa9   :  { %9293 = vmatprep.subr.mxu0 %v12373_v51  ;;  %vm925_vm14 = vcmask 719872   ;;  %vm936_vm15 = vcmask 785408   ;;  %vm947_vm3 = vcmask 850944  }
  0xaa   :  { %319 = vrot.lane.b32.xlu1 %v293_v26, %s9767_s25  ;;  %9294 = vmatpush3.msra.mxu0 %v1469_v59  ;;  %v422_v59 = vrot.slane %v10123_v45, 4 }
  0xab   :  { %9295 = vmatprep.subr.mxu0 %v12373_v51 }
  0xac   :  { %539 = vrot.lane.b32.xlu0 %v290_v21, %s9777_s22  ;;  %9296 = vmatpush3.msra.mxu0 %v1468_v60  ;;  %v535_v21 = vsel %vm12370_vm2, %v533_v17, %v534_v18  ;;  %v423_v60 = vrot.slane %v211_v46, 4 }
  0xad   :  { %9297 = vmatprep.subr.mxu0 %v12373_v51 }
  0xae   :  { %575 = vrot.lane.b32.xlu1 %v351_v22, %s9778_s23  ;;  %9298 = vmatpush3.msra.mxu0 %v1467_v63  ;;  %v569_v22 = vrot.slane %v206_v13, 3  ;;  %v361_v63 = vrot.slane %v10123_v45, 3 }
  0xaf   :  { %9299 = vmatprep.subr.mxu0 %v12373_v51 }
  0xb0   :  { %439 = vrot.lane.b32.xlu0 %v412_v29, %s9775_s6  ;;  %9300 = vmatpush3.msra.mxu0 %v1466_v3 }
  0xb1   :  { %9301 = vmatprep.subr.mxu0 %v12373_v51 }
  0xb2   :  { %471 = vrot.lane.b32.xlu1 %v9947_v19, %s9773_s14  ;;  %9302 = vmatpush3.msra.mxu0 %v1465_v4  ;;  %v424_v4 = vsel %vm12369_vm1, %v422_v59, %v423_v60 }
  0xb3   :  { %9303 = vmatprep.subr.mxu0 %v12373_v51 }
  0xb4   :  { %380 = vrot.lane.b32.xlu0 %v354_v34, %s9774_s15  ;;  %9304 = vmatpush3.msra.mxu0 %v1464_v7  ;;  %v10158_v7 = vld [vmem:[%s12352_s0 + $0x80] sm:$0xff] }
  0xb5   :  { %9305 = vmatprep.subr.mxu0 %v12373_v51  ;;  %v364_v17 = vrot.slane %v10158_v7, 3 }
  0xb6   :  { %441 = vrot.lane.b32.xlu1 %v415_v35, %s9775_s6  ;;  %9306 = vmatpush3.msra.mxu0 %v1463_v8 }
  0xb7   :  { %9307 = vmatprep.subr.mxu0 %v12373_v51 }
  0xb8   :  { %611 = vrot.lane.b32.xlu0 %v412_v29, %s9779_s7  ;;  %9308 = vmatpush3.msra.mxu0 %v1462_v10 }
  0xb9   :  { %9309 = vmatprep.subr.mxu0 %v12373_v51 }
  0xba   :  { %643 = vrot.lane.b32.xlu1 %v9947_v19, %s9780_s24  ;;  %9310 = vmatpush3.msra.mxu0 %v1461_v11  ;;  %v240_v11 = vrot.slane %v10158_v7, 1 }
  0xbb   :  { %9311 = vmatprep.subr.mxu0 %v12373_v51 }
  0xbc   :  { %503 = vrot.lane.b32.xlu0 %v236_v25, %s9776_s21  ;;  %9312 = vmatpush3.msra.mxu0 %v1460_v12  ;;  %v303_v12 = vrot.slane %v10158_v7, 2 }
  0xbd   :  { %9313 = vmatprep.subr.mxu0 %v12373_v51 }
  0xbe   :  { %473 = vrot.lane.b32.xlu1 %v9979_v36, %s9773_s14  ;;  %9314 = vmatpush3.msra.mxu0 %v1459_v14 }
  0xc0   :  { %250 = vrot.lane.b32.xlu0 %v237_v37, %s9764_s20 }
  0xc2   :  { %675 = vrot.lane.b32.xlu1 %v236_v25, %s9781_s9 }
  0xc4   :  { %541 = vrot.lane.b32.xlu0 %v293_v26, %s9777_s22 }
  0xc6   :  { %505 = vrot.lane.b32.xlu1 %v237_v37, %s9776_s21 }
  0xc8   :  { %321 = vrot.lane.b32.xlu0 %v296_v41, %s9767_s25 }
  0xca   :  { %713 = vrot.lane.b32.xlu1 %v293_v26, %s9782_s27  ;;  %v571_v26 = vsel %vm12371_vm0, %v569_v22, %v570_v23 }
  0xcc   :  { %577 = vrot.lane.b32.xlu0 %v354_v34, %s9778_s23 }
  0xce   :  { %543 = vrot.lane.b32.xlu1 %v296_v41, %s9777_s22 }
  0xd0   :  { %382 = vrot.lane.b32.xlu0 %v10001_v44, %s9774_s15 }
  0xd2   :  { %749 = vrot.lane.b32.xlu1 %v354_v34, %s9783_s28 }
  0xd4   :  { %613 = vrot.lane.b32.xlu0 %v415_v35, %s9779_s7 }
  0xd6   :  { %579 = vrot.lane.b32.xlu1 %v10001_v44, %s9778_s23 }
  0xd8   :  { %443 = vrot.lane.b32.xlu0 %v10010_v47, %s9775_s6 }
  0xda   :  { %785 = vrot.lane.b32.xlu1 %v415_v35, %s9784_s12  ;;  %v707_v35 = vrot.slane %v208_v31, 2 }
  0xdc   :  { %645 = vrot.lane.b32.xlu0 %v9979_v36, %s9780_s24 }
  0xde   :  { %475 = vrot.lane.b32.xlu1 %v10019_v48, %s9773_s14 }
  0xe0   :  { %252 = vrot.lane.b32.xlu0 %v238_v49, %s9764_s20 }
  0xe2   :  { %677 = vrot.lane.b32.xlu1 %v237_v37, %s9781_s9  ;;  %v708_v37 = vrot.slane %v209_v32, 2 }
  0xe4   :  { %615 = vrot.lane.b32.xlu0 %v10010_v47, %s9779_s7  ;;  %v709_v40 = vsel %vm12370_vm2, %v707_v35, %v708_v37 }
  0xe6   :  { %507 = vrot.lane.b32.xlu1 %v238_v49, %s9776_s21 }
  0xe8   :  { %323 = vrot.lane.b32.xlu0 %v299_v58, %s9767_s25 }
  0xea   :  { %715 = vrot.lane.b32.xlu1 %v296_v41, %s9782_s27  ;;  %v779_v41 = vrot.slane %v208_v31, 4 }
  0xec   :  { %647 = vrot.lane.b32.xlu0 %v10019_v48, %s9780_s24  ;;  %v781_v52 = vsel %vm12369_vm1, %v779_v41, %v780_v42 }
  0xee   :  { %545 = vrot.lane.b32.xlu1 %v299_v58, %s9777_s22 }
  0xf0   :  { %384 = vrot.lane.b32.xlu0 %v360_v2, %s9774_s15 }
  0xf2   :  { %751 = vrot.lane.b32.xlu1 %v10001_v44, %s9783_s28  ;;  %v673_v44 = vrot.slane %v208_v31, 1 }
  0xf4   :  { %679 = vrot.lane.b32.xlu0 %v238_v49, %s9781_s9  ;;  %v744_v49 = vrot.slane %v209_v32, 3  ;;  %v10197_v32 = vld [vmem:[%s12352_s0 + $0x90] sm:$0xff] }
  0xf5   :  { %v428_v60 = vrot.slane %v10197_v32, 4 }
  0xf6   :  { %581 = vrot.lane.b32.xlu1 %v360_v2, %s9778_s23 }
  0xf8   :  { %445 = vrot.lane.b32.xlu0 %v421_v9, %s9775_s6 }
  0xfa   :  { %787 = vrot.lane.b32.xlu1 %v10010_v47, %s9784_s12  ;;  %v743_v47 = vrot.slane %v208_v31, 3 }
  0xfc   :  { %717 = vrot.lane.b32.xlu0 %v299_v58, %s9782_s27  ;;  %v745_v56 = vsel %vm12371_vm0, %v743_v47, %v744_v49  ;;  %v302_v58 = vsel %vm12370_vm2, %v300_v53, %v301_v54  ;;  %v367_v54 = vrot.slane %v10197_v32, 3 }
  0xfe   :  { %617 = vrot.lane.b32.xlu1 %v421_v9, %s9779_s7 }
 0x100   :  { %477 = vrot.lane.b32.xlu0 %v206_v13, %s9773_s14 }
 0x102   :  { %509 = vrot.lane.b32.xlu1 %v499_v15, %s9776_s21 }
 0x104   :  { %753 = vrot.lane.b32.xlu0 %v360_v2, %s9783_s28  ;;  %v362_v2 = vrot.slane %v211_v46, 3 }
 0x106   :  { %789 = vrot.lane.b32.xlu1 %v421_v9, %s9784_s12  ;;  %v363_v6 = vsel %vm12371_vm0, %v361_v63, %v362_v2  ;;  %v213_v9 = vld [vmem:[%s12352_s0 + $0x88] sm:$0x7] }
 0x107   :  { %v365_v18 = vrot.slane %v213_v9, 3  ;;  %v426_v27 = vrot.slane %v213_v9, 4 }
 0x108   :  { %v10083_v20 = vpop.permute.xlu1 %469  ;;  %649 = vrot.lane.b32.xlu0 %v206_v13, %s9780_s24  ;;  %v304_v13 = vrot.slane %v213_v9, 2 }
 0x109   :  { %v366_v23 = vsel %vm12371_vm0, %v364_v17, %v365_v18 }
 0x10a   :  { %681 = vrot.lane.b32.xlu1 %v499_v15, %s9781_s9  ;;  %v10088_v24 = vpop.permute.xlu0 %244  ;;  %v305_v16 = vsel %vm12370_vm2, %v303_v12, %v304_v13  ;;  %v10258_v13 = vld [vmem:[%s12352_s0 + $0xa0] sm:$0xff] }
 0x10b   :  { %v816_v59 = vsel %vm815_vm4, %v9919_v1, %v10088_v24  ;;  %v10269_v18 = vrot.slane %v10258_v13, 1 }
 0x10c   :  { %v10090_v25 = vpop.permute.xlu1 %376  ;;  %547 = vrot.lane.b32.xlu0 %v535_v21, %s9777_s22 }
 0x10e   :  { %719 = vrot.lane.b32.xlu1 %v535_v21, %s9782_s27  ;;  %v10095_v29 = vpop.permute.xlu0 %246 }
 0x110   :  { %v10097_v30 = vpop.permute.xlu1 %437  ;;  %583 = vrot.lane.b32.xlu0 %v571_v26, %s9778_s23 }
 0x112   :  { %755 = vrot.lane.b32.xlu1 %v571_v26, %s9783_s28  ;;  %v10108_v34 = vpop.permute.xlu0 %315  ;;  %v425_v26 = vrot.slane %v10158_v7, 4 }
 0x113   :  { %v827_v63 = vsel %vm826_vm5, %v816_v59, %v10108_v34 }
 0x114   :  { %v10110_v38 = vpop.permute.xlu1 %501  ;;  %619 = vrot.lane.b32.xlu0 %v607_v33, %s9779_s7  ;;  %v427_v35 = vsel %vm12369_vm1, %v425_v26, %v426_v27  ;;  %v838_v9 = vsel %vm837_vm6, %v827_v63, %v10090_v25  ;;  %v9787_v27 = vmov 1966171168  }
 0x115   :  { %v849_v34 = vsel %vm848_vm7, %v838_v9, %v10097_v30 }
 0x116   :  { %791 = vrot.lane.b32.xlu1 %v607_v33, %s9784_s12  ;;  %v10114_v39 = vpop.permute.xlu0 %317  ;;  %v215_v33 = vld [vmem:[%s12352_s0 + $0x98] sm:$0x7]  ;;  %v860_v25 = vsel %vm859_vm8, %v849_v34, %v10083_v20 }
 0x117   :  { %v307_v41 = vrot.slane %v215_v33, 2 }
 0x118   :  { %v10117_v43 = vpop.permute.xlu1 %378  ;;  %651 = vrot.lane.b32.xlu0 %v208_v31, %s9780_s24 }
 0x11a   :  { %721 = vrot.lane.b32.xlu1 %v709_v40, %s9782_s27  ;;  %v10129_v50 = vpop.permute.xlu0 %248  ;;  %v306_v40 = vrot.slane %v10197_v32, 2 }
 0x11c   :  { %v10133_v55 = vpop.permute.xlu1 %319  ;;  %683 = vrot.lane.b32.xlu0 %v673_v44, %s9781_s9  ;;  %v241_v44 = vrot.slane %v10197_v32, 1  ;;  %v308_v47 = vsel %vm12370_vm2, %v306_v40, %v307_v41  ;;  %v309_v41 = vrot.slane %v10258_v13, 2 }
 0x11e   :  { %793 = vrot.lane.b32.xlu1 %v781_v52, %s9784_s12  ;;  %v10138_v57 = vpop.permute.xlu0 %539 }
 0x120   :  { %v10142_v61 = vpop.permute.xlu1 %575  ;;  %757 = vrot.lane.b32.xlu0 %v745_v56, %s9783_s28  ;;  %v368_v56 = vrot.slane %v215_v33, 3 }
 0x122   :  { %325 = vrot.lane.b32.xlu1 %v302_v58, %s9767_s25  ;;  %v10148_v3 = vpop.permute.xlu0 %439 }
 0x124   :  { %v10151_v5 = vpop.permute.xlu1 %471  ;;  %254 = vrot.lane.b32.xlu0 %v239_v62, %s9764_s20  ;;  %v429_v62 = vrot.slane %v215_v33, 4  ;;  %v981_v33 = vunpack.c.l.s4 %v9787_v27 }
 0x126   :  { %447 = vrot.lane.b32.xlu1 %v424_v4, %s9775_s6  ;;  %v10161_v8 = vpop.permute.xlu0 %380  ;;  %v369_v4 = vsel %vm12371_vm0, %v367_v54, %v368_v56  ;;  %v430_v1 = vsel %vm12369_vm1, %v428_v60, %v429_v62  ;;  %v982_v54 = vunpack.c.0.s8 %v981_v33 }
 0x128   :  { %v10166_v10 = vpop.permute.xlu1 %441  ;;  %386 = vrot.lane.b32.xlu0 %v363_v6, %s9774_s15 }
 0x12a   :  { %479 = vrot.lane.b32.xlu1 %v10158_v7, %s9773_s14  ;;  %v10173_v14 = vpop.permute.xlu0 %611 }
 0x12c   :  { %v10175_v15 = vpop.permute.xlu1 %643  ;;  %256 = vrot.lane.b32.xlu0 %v240_v11, %s9764_s20 }
 0x12e   :  { %511 = vrot.lane.b32.xlu1 %v240_v11, %s9776_s21  ;;  %v10181_v21 = vpop.permute.xlu0 %503 }
 0x130   :  { %v10183_v22 = vpop.permute.xlu1 %473  ;;  %327 = vrot.lane.b32.xlu0 %v305_v16, %s9767_s25 }
 0x132   :  { %549 = vrot.lane.b32.xlu1 %v305_v16, %s9777_s22  ;;  %v10189_v28 = vpop.permute.xlu0 %250  ;;  %v871_v16 = vsel %vm870_vm9, %v860_v25, %v10110_v38  ;;  %v217_v38 = vld [vmem:[%s12352_s0 + $0xa8] sm:$0x7]  ;;  %v370_v25 = vrot.slane %v10258_v13, 3 }
 0x133   :  { %v882_v20 = vsel %vm881_vm10, %v871_v16, %v10138_v57  ;;  %v371_v16 = vrot.slane %v217_v38, 3 }
 0x134   :  { %v10191_v31 = vpop.permute.xlu1 %675  ;;  %388 = vrot.lane.b32.xlu0 %v366_v23, %s9774_s15  ;;  %v893_v26 = vsel %vm892_vm11, %v882_v20, %v10142_v61 }
 0x135   :  { %v904_v57 = vsel %vm12368_vm12, %v893_v26, %v10173_v14  ;;  %vm12372_vm12 = vcmask 916480  }
 0x136   :  { %585 = vrot.lane.b32.xlu1 %v366_v23, %s9778_s23  ;;  %v10204_v37 = vpop.permute.xlu0 %541  ;;  %v915_v61 = vsel %vm914_vm13, %v904_v57, %v10175_v15 }
 0x137   :  { %v926_v14 = vsel %vm925_vm14, %v915_v61, %v10191_v31 }
 0x138   :  { %v10207_v42 = vpop.permute.xlu1 %505  ;;  %449 = vrot.lane.b32.xlu0 %v427_v35, %s9775_s6 }
 0x13a   :  { %481 = vrot.lane.b32.xlu1 %v10197_v32, %s9773_s14  ;;  %v10213_v46 = vpop.permute.xlu0 %321 }
 0x13c   :  { %v10216_v49 = vpop.permute.xlu1 %713  ;;  %258 = vrot.lane.b32.xlu0 %v241_v44, %s9764_s20 }
 0x13d   :  { %v937_v62 = vsel %vm936_vm15, %v926_v14, %v10216_v49 }
 0x13e   :  { %329 = vrot.lane.b32.xlu1 %v308_v47, %s9767_s25  ;;  %v10220_v52 = vpop.permute.xlu0 %577 }
 0x140   :  { %v10222_v53 = vpop.permute.xlu1 %543  ;;  %621 = vrot.lane.b32.xlu0 %v427_v35, %s9779_s7  ;;  %v983_v35 = vlaneseq }
 0x142   :  { %653 = vrot.lane.b32.xlu1 %v10197_v32, %s9780_s24  ;;  %v10228_v58 = vpop.permute.xlu0 %382  ;;  %v10294_v56 = vshrl.u32 %v983_v35, 7 }
 0x144   :  { %v750_v2 = vpop.permute.xlu1 %749  ;;  %513 = vrot.lane.b32.xlu0 %v241_v44, %s9776_s21  ;;  %v10313_v9 = vsub.s32 %v982_v54, %v10294_v56 }
 0x145   :  { %v948_v63 = vsel %vm947_vm3, %v937_v62, %v750_v2 }
 0x146   :  { %551 = vrot.lane.b32.xlu1 %v308_v47, %s9777_s22  ;;  %v10239_v6 = vpop.permute.xlu0 %613 }
 0x148   :  { %v10244_v24 = vpop.permute.xlu1 %579  ;;  %390 = vrot.lane.b32.xlu0 %v369_v4, %s9774_s15 }
 0x14a   :  { %451 = vrot.lane.b32.xlu1 %v430_v1, %s9775_s6  ;;  %v10250_v11 = vpop.permute.xlu0 %443 }
 0x14c   :  { %v786_v12 = vpop.permute.xlu1 %785  ;;  %685 = vrot.lane.b32.xlu0 %v241_v44, %s9781_s9  ;;  %v310_v44 = vrot.slane %v217_v38, 2 }
 0x14d   :  { %v959_v31 = vsel %vm12372_vm12, %v948_v63, %v786_v12 }
 0x14e   :  { %723 = vrot.lane.b32.xlu1 %v308_v47, %s9782_s27  ;;  %v10261_v30 = vpop.permute.xlu0 %645  ;;  %v311_v60 = vsel %vm12370_vm2, %v309_v41, %v310_v44  ;;  %v979_v20 = vcombine.high %v959_v31, %v959_v31  ;;  %v986_v26 = vrot.slane %v959_v31, %v10313_v9  ;;  %v818_v44 = vsel %vm815_vm4, %v9947_v19, %v10129_v50 }
 0x14f   :  { %v829_v19 = vsel %vm826_vm5, %v818_v44, %v10133_v55 }
 0x150   :  { %v10265_v17 = vpop.permute.xlu1 %475  ;;  %587 = vrot.lane.b32.xlu0 %v369_v4, %s9778_s23  ;;  %v994_v57 = vcombine.high %v986_v26, %v986_v26 }
 0x152   :  { %483 = vrot.lane.b32.xlu1 %v10258_v13, %s9773_s14  ;;  %v10275_v23 = vpop.permute.xlu0 %252 }
 0x154   :  { %v10282_v40 = vpop.permute.xlu1 %677  ;;  %260 = vrot.lane.b32.xlu0 %v10269_v18, %s9764_s20 }
 0x156   :  { %759 = vrot.lane.b32.xlu1 %v369_v4, %s9783_s28  ;;  %v10290_v47 = vpop.permute.xlu0 %615  ;;  %v817_v4 = vsel %vm815_vm4, %v9914_v0, %v10095_v29  ;;  %v431_v0 = vrot.slane %v10258_v13, 4  ;;  %v432_v29 = vrot.slane %v217_v38, 4  ;;  %v993_v38 = vrot.slane %v979_v20, %v10313_v9 }
 0x157   :  { %v828_v49 = vsel %vm826_vm5, %v817_v4, %v10114_v39 }
 0x158   :  { %v10296_v59 = vpop.permute.xlu1 %507  ;;  %623 = vrot.lane.b32.xlu0 %v430_v1, %s9779_s7  ;;  %v839_v12 = vsel %vm837_vm6, %v828_v49, %v10117_v43  ;;  %v10339_v43 = vsel %vm12369_vm1, %v431_v0, %v432_v29  ;;  %v995_v14 = vcombine.high %v993_v38, %v993_v38  ;;  %vm12375_vm1 = vcmask 588800  }
 0x159   :  { %v850_v39 = vsel %vm848_vm7, %v839_v12, %v10148_v3 }
 0x15a   :  { %515 = vrot.lane.b32.xlu1 %v10269_v18, %s9776_s21  ;;  %v10306_v15 = vpop.permute.xlu0 %323  ;;  %v861_v35 = vsel %vm859_vm8, %v850_v39, %v10151_v5  ;;  %v1023_v55 = vrot.slane %v995_v14, %v10313_v9 }
 0x15b   :  { %v872_v3 = vsel %vm870_vm9, %v861_v35, %v10181_v21  ;;  %v1016_v21 = vrot.slane %v994_v57, %v10313_v9 }
 0x15c   :  { %v716_v34 = vpop.permute.xlu1 %715  ;;  %331 = vrot.lane.b32.xlu0 %v311_v60, %s9767_s25  ;;  %v883_v61 = vsel %vm881_vm10, %v872_v3, %v10204_v37  ;;  %v10369_v37 = vld [vmem:[%s12352_s0 + $0xb0] sm:$0xff] }
 0x15d   :  { %v894_v5 = vsel %vm892_vm11, %v883_v61, %v10220_v52  ;;  %v840_v52 = vsel %vm837_vm6, %v829_v19, %v10161_v8  ;;  %v10384_v8 = vrot.slane %v10369_v37, 1 }
 0x15e   :  { %795 = vrot.lane.b32.xlu1 %v430_v1, %s9784_s12  ;;  %v10321_v2 = vpop.permute.xlu0 %647  ;;  %v372_v1 = vsel %vm12371_vm0, %v370_v25, %v371_v16  ;;  %v905_v62 = vsel %vm12375_vm1, %v894_v5, %v10239_v6  ;;  %v1002_v6 = vrot.slane %v986_v26, %v10313_v9 }
 0x15f   :  { %v916_v50 = vsel %vm914_vm13, %v905_v62, %v10261_v30 }
 0x160   :  { %v10327_v27 = vpop.permute.xlu1 %545  ;;  %655 = vrot.lane.b32.xlu0 %v10258_v13, %s9780_s24  ;;  %v927_v4 = vsel %vm925_vm14, %v916_v50, %v10282_v40  ;;  %v1481_v31 = vcombine.low %v1002_v6, %v1016_v21  ;;  %v8730_v49 = vcombine.high %v1002_v6, %v1016_v21  ;;  %v10389_v40 = vld [vmem:[%s12352_s0 + $0xb8] sm:$0x7] }
 0x161   :  { %v938_v30 = vsel %vm936_vm15, %v927_v4, %v716_v34  ;;  %v1009_v34 = vrot.slane %v993_v38, %v10313_v9  ;;  %v313_v38 = vrot.slane %v10389_v40, 2 }
 0x162   :  { %553 = vrot.lane.b32.xlu1 %v311_v60, %s9777_s22  ;;  %v10335_v33 = vpop.permute.xlu0 %384  ;;  %v1491_v57 = vrot.slane %v1481_v31, %v10313_v9 }
 0x163   :  { %v1483_v35 = vcombine.low %v1009_v34, %v1023_v55  ;;  %v1025_v61 = vcombine.high %v1009_v34, %v1009_v34 }
 0x164   :  { %v752_v41 = vpop.permute.xlu1 %751  ;;  %392 = vrot.lane.b32.xlu0 %v372_v1, %s9774_s15 }
 0x165   :  { %v949_v25 = vsel %vm947_vm3, %v938_v30, %v752_v41  ;;  %v1498_v41 = vrot.slane %v8730_v49, %v10313_v9 }
 0x166   :  { %453 = vrot.lane.b32.xlu1 %v10339_v43, %s9775_s6  ;;  %v680_v54 = vpop.permute.xlu0 %679 }
 0x167   :  { %v1513_v6 = vcombine.low %v1491_v57, %v1498_v41 }
 0x168   :  { %v10358_v63 = vpop.permute.xlu1 %581  ;;  %687 = vrot.lane.b32.xlu0 %v10269_v18, %s9781_s9 }
 0x16a   :  { %725 = vrot.lane.b32.xlu1 %v311_v60, %s9782_s27  ;;  %v10377_v18 = vpop.permute.xlu0 %445  ;;  %v851_v60 = vsel %vm848_vm7, %v840_v52, %v10166_v10  ;;  %v312_v10 = vrot.slane %v10369_v37, 2  ;;  %v1505_v52 = vrot.slane %v1483_v35, %v10313_v9 }
 0x16b   :  { %v862_v0 = vsel %vm859_vm8, %v851_v60, %v10183_v22  ;;  %v373_v60 = vrot.slane %v10369_v37, 3 }
 0x16c   :  { %v788_v16 = vpop.permute.xlu1 %787  ;;  %589 = vrot.lane.b32.xlu0 %v372_v1, %s9778_s23  ;;  %v873_v39 = vsel %vm870_vm9, %v862_v0, %v10207_v42  ;;  %v1521_v0 = vrot.slane %v1513_v6, %v10313_v9 }
 0x16d   :  { %v960_v20 = vsel %vm12372_vm12, %v949_v25, %v788_v16  ;;  %v884_v42 = vsel %vm881_vm10, %v873_v39, %v10222_v53 }
 0x16e   :  { %v1027_v29 = vcombine.high %v960_v20, %v960_v20  ;;  %v1034_v12 = vrot.slane %v960_v20, %v10313_v9  ;;  %485 = vrot.lane.b32.xlu1 %v10369_v37, %s9773_s14  ;;  %v718_v26 = vpop.permute.xlu0 %717  ;;  %v895_v14 = vsel %vm892_vm11, %v884_v42, %v10244_v24  ;;  %v10430_v24 = vsel %vm12370_vm2, %v312_v10, %v313_v38 }
 0x16f   :  { %v906_v19 = vsel %vm12375_vm1, %v895_v14, %v10290_v47  ;;  %vm1913_vm1 = vcmask 982016   ;;  %v435_v42 = vrot.slane %v10389_v40, 4  ;;  %vm12376_vm2 = vmmov 0  }
 0x170   :  { %v1042_v22 = vcombine.high %v1034_v12, %v1034_v12  ;;  %v1050_v3 = vrot.slane %v1034_v12, %v10313_v9  ;;  %v10407_v44 = vpop.permute.xlu1 %617  ;;  %262 = vrot.lane.b32.xlu0 %v10384_v8, %s9764_s20  ;;  %v1041_v5 = vrot.slane %v1027_v29, %v10313_v9  ;;  %v917_v53 = vsel %vm914_vm13, %v906_v19, %v10321_v2 }
 0x171   :  { %v374_v29 = vrot.slane %v10389_v40, 3 }
 0x172   :  { %v1064_v62 = vrot.slane %v1042_v22, %v10313_v9  ;;  %761 = vrot.lane.b32.xlu1 %v372_v1, %s9783_s28  ;;  %v10418_v21 = vpop.permute.xlu0 %477  ;;  %v1484_v50 = vcombine.low %v1025_v61, %v1050_v3  ;;  %v928_v1 = vsel %vm925_vm14, %v917_v53, %v680_v54  ;;  %v1043_v55 = vcombine.high %v1041_v5, %v1041_v5 }
 0x173   :  { %v1057_v47 = vrot.slane %v1041_v5, %v10313_v9  ;;  %v939_v49 = vsel %vm936_vm15, %v928_v1, %v718_v26  ;;  %v819_v54 = vsel %vm815_vm4, %v9979_v36, %v10189_v28  ;;  %v1072_v34 = vcombine.high %v1050_v3, %v1050_v3 }
 0x174   :  { %v10425_v4 = vpop.permute.xlu1 %509  ;;  %625 = vrot.lane.b32.xlu0 %v10339_v43, %s9779_s7  ;;  %v1512_v30 = vrot.slane %v1484_v50, %v10313_v9  ;;  %v1074_v31 = vcombine.high %v1064_v62, %v1064_v62  ;;  %v1071_v12 = vrot.slane %v1043_v55, %v10313_v9  ;;  %v830_v10 = vsel %vm826_vm5, %v819_v54, %v10213_v46 }
 0x175   :  { %v1073_v26 = vcombine.high %v1057_v47, %v1057_v47  ;;  %v841_v41 = vsel %vm837_vm6, %v830_v10, %v10228_v58  ;;  %v434_v3 = vrot.slane %v10369_v37, 4  ;;  %v1530_v46 = vcombine.low %v1064_v62, %v1072_v34 }
 0x176   :  { %517 = vrot.lane.b32.xlu1 %v10384_v8, %s9776_s21  ;;  %v754_v2 = vpop.permute.xlu0 %753  ;;  %v1514_v25 = vcombine.low %v1505_v52, %v1512_v30  ;;  %v1531_v36 = vcombine.low %v1074_v31, %v1057_v47  ;;  %v852_v61 = vsel %vm848_vm7, %v841_v41, %v10250_v11  ;;  %v10468_v50 = vsel %vm12371_vm0, %v373_v60, %v374_v29 }
 0x177   :  { %v950_v16 = vsel %vm947_vm3, %v939_v49, %v754_v2  ;;  %v1532_v19 = vcombine.low %v1071_v12, %v1073_v26  ;;  %vm12377_vm0 = vcmask 1043456   ;;  %v1540_v53 = vrot.slane %v1530_v46, %v10313_v9 }
 0x178   :  { %v790_v20 = vpop.permute.xlu1 %789  ;;  %333 = vrot.lane.b32.xlu0 %v10430_v24, %s9767_s25  ;;  %v1528_v35 = vrot.slane %v1514_v25, %v10313_v9  ;;  %v1547_v40 = vrot.slane %v1531_v36, %v10313_v9  ;;  %v10484_v52 = vsel %vm12377_vm0, %v434_v3, %v435_v42  ;;  %v820_v47 = vsel %vm815_vm4, %v10019_v48, %v10275_v23 }
 0x179   :  { %v961_v39 = vsel %vm12372_vm12, %v950_v16, %v790_v20  ;;  %vm12378_vm0 = vcmask 588800   ;;  %v1554_v31 = vrot.slane %v1532_v19, %v10313_v9  ;;  %v831_v16 = vsel %vm826_vm5, %v820_v47, %v10306_v15 }
 0x17a   :  { %v1075_v28 = vcombine.high %v961_v39, %v961_v39  ;;  %v1082_v38 = vrot.slane %v961_v39, %v10313_v9  ;;  %797 = vrot.lane.b32.xlu1 %v10339_v43, %s9784_s12  ;;  %v650_v57 = vpop.permute.xlu0 %649  ;;  %v1529_v22 = vcombine.low %v1521_v0, %v1528_v35  ;;  %v863_v43 = vsel %vm859_vm8, %v852_v61, %v10265_v17 }
 0x17b   :  { %v1562_v25 = vcombine.low %v1540_v53, %v1547_v40  ;;  %v842_v23 = vsel %vm837_vm6, %v831_v16, %v10335_v33 }
 0x17c   :  { %v1090_v5 = vcombine.high %v1082_v38, %v1082_v38  ;;  %v682_v14 = vpop.permute.xlu1 %681  ;;  %657 = vrot.lane.b32.xlu0 %v10369_v37, %s9780_s24  ;;  %v1089_v58 = vrot.slane %v1075_v28, %v10313_v9  ;;  %9316 = vmatmul.mubr.msk.f32.vlgmr.msra.gmra.mxu0 %vm1913_vm1, %v1529_v22  ;;  %v10472_v11 = vrot.slane %v1082_v38, %v10313_v9 }
 0x17d   :  { %9318 = vmatprep.mubr.msk.f32.mxu0 %vm12376_vm2, %v12373_v51  ;;  %v874_v37 = vsel %vm870_vm9, %v863_v43, %v10296_v59  ;;  %v1570_v33 = vrot.slane %v1562_v25, %v10313_v9 }
 0x17e   :  { %v10475_v62 = vrot.slane %v1090_v5, %v10313_v9  ;;  %555 = vrot.lane.b32.xlu1 %v10430_v24, %s9777_s22  ;;  %v548_v17 = vpop.permute.xlu0 %547  ;;  %v885_v6 = vsel %vm881_vm10, %v874_v37, %v10327_v27  ;;  %v1091_v30 = vcombine.high %v1089_v58, %v1089_v58 }
 0x17f   :  { %v896_v59 = vsel %vm892_vm11, %v885_v6, %v10358_v63 }
 0x180   :  { %v1533_v1 = vcombine.low %v10472_v11, %v10475_v62  ;;  %v720_v55 = vpop.permute.xlu1 %719  ;;  %394 = vrot.lane.b32.xlu0 %v10468_v50, %s9774_s15  ;;  %v907_v27 = vsel %vm12378_vm0, %v896_v59, %v10407_v44  ;;  %v853_v44 = vsel %vm848_vm7, %v842_v23, %v10377_v18  ;;  %v1119_v54 = vrot.slane %v1091_v30, %v10313_v9  ;;  %v10526_v18 = vld [vmem:[%s12352_s0 + $0xc0] sm:$0xff] }
 0x181   :  { %v918_v48 = vsel %vm914_vm13, %v907_v27, %v650_v57  ;;  %v864_v34 = vsel %vm859_vm8, %v853_v44, %v10418_v21  ;;  %v500_v57 = vrot.slane %v10526_v18, 1  ;;  %v8731_v41 = vcombine.high %v10472_v11, %v10475_v62 }
 0x182   :  { %v1561_v49 = vrot.slane %v1533_v1, %v10313_v9  ;;  %455 = vrot.lane.b32.xlu1 %v10484_v52, %s9775_s6  ;;  %v584_v2 = vpop.permute.xlu0 %583  ;;  %v929_v15 = vsel %vm925_vm14, %v918_v48, %v682_v14  ;;  %v875_v26 = vsel %vm870_vm9, %v864_v34, %v10425_v4  ;;  %v536_v47 = vrot.slane %v10526_v18, 2 }
 0x183   :  { %v940_v29 = vsel %vm936_vm15, %v929_v15, %v720_v55  ;;  %v886_v10 = vsel %vm881_vm10, %v875_v26, %v548_v17  ;;  %v221_v17 = vld [vmem:[%s12352_s0 + $0xc8] sm:$0x7]  ;;  %v1589_v53 = vrot.slane %v8731_v41, %v10313_v9  ;;  %v572_v44 = vrot.slane %v10526_v18, 3 }
 0x184   :  { %v1563_v63 = vcombine.low %v1554_v31, %v1561_v49  ;;  %v756_v60 = vpop.permute.xlu1 %755  ;;  %689 = vrot.lane.b32.xlu0 %v10384_v8, %s9781_s9  ;;  %v1105_v8 = vrot.slane %v1089_v58, %v10313_v9  ;;  %v897_v4 = vsel %vm892_vm11, %v886_v10, %v584_v2  ;;  %v537_v31 = vrot.slane %v221_v17, 2 }
 0x185   :  { %v951_v21 = vsel %vm947_vm3, %v940_v29, %v756_v60  ;;  %v608_v26 = vrot.slane %v10526_v18, 4 }
 0x186   :  { %727 = vrot.lane.b32.xlu1 %v10430_v24, %s9782_s27  ;;  %v620_v20 = vpop.permute.xlu0 %619  ;;  %v1577_v0 = vrot.slane %v1563_v63, %v10313_v9  ;;  %v1580_v39 = vcombine.low %v1105_v8, %v1119_v54  ;;  %v1121_v14 = vcombine.high %v1105_v8, %v1105_v8  ;;  %v573_v54 = vrot.slane %v221_v17, 3 }
 0x187   :  { %v908_v22 = vsel %vm12378_vm0, %v897_v4, %v620_v20  ;;  %vm12379_vm0 = vcmask 1045504   ;;  %v223_v4 = vld [vmem:[%s12352_s0 + $0xd8] sm:$0x7] }
 0x188   :  { %v792_v12 = vpop.permute.xlu1 %791  ;;  %591 = vrot.lane.b32.xlu0 %v10468_v50, %s9778_s23  ;;  %v1578_v24 = vcombine.low %v1570_v33, %v1577_v0  ;;  %v1596_v5 = vrot.slane %v1580_v39, %v10313_v9  ;;  %v538_v20 = vsel %vm12379_vm0, %v536_v47, %v537_v31  ;;  %v609_v39 = vrot.slane %v221_v17, 4 }
 0x189   :  { %v962_v35 = vsel %vm12372_vm12, %v951_v21, %v792_v12 }
 0x18a   :  { %v1123_v36 = vcombine.high %v962_v35, %v962_v35  ;;  %v1130_v28 = vrot.slane %v962_v35, %v10313_v9  ;;  %627 = vrot.lane.b32.xlu1 %v10484_v52, %s9779_s7  ;;  %9319 = vmatmul.mubr.msk.f32.gmra.mxu0 %vm1913_vm1, %v1578_v24  ;;  %v652_v38 = vpop.permute.xlu0 %651  ;;  %v1611_v49 = vcombine.low %v1589_v53, %v1596_v5  ;;  %v222_v5 = vld [vmem:[%s12352_s0 + $0xd0] sm:$0xff]  ;;  %v783_v53 = vrot.slane %v223_v4, 4 }
 0x18b   :  { %9321 = vmatprep.mubr.msk.f32.mxu0 %vm12376_vm2, %v12373_v51  ;;  %v919_v43 = vsel %vm914_vm13, %v908_v22, %v652_v38  ;;  %v746_v47 = vrot.slane %v222_v5, 3 }
 0x18c   :  { %v1137_v3 = vrot.slane %v1123_v36, %v10313_v9  ;;  %v1138_v42 = vcombine.high %v1130_v28, %v1130_v28  ;;  %v1146_v61 = vrot.slane %v1130_v28, %v10313_v9  ;;  %v722_v46 = vpop.permute.xlu1 %721  ;;  %487 = vrot.lane.b32.xlu0 %v10526_v18, %s9773_s14  ;;  %v1619_v0 = vrot.slane %v1611_v49, %v10313_v9 }
 0x18e   :  { %v1139_v19 = vcombine.high %v1137_v3, %v1137_v3  ;;  %v1153_v58 = vrot.slane %v1137_v3, %v10313_v9  ;;  %v1160_v40 = vrot.slane %v1138_v42, %v10313_v9  ;;  %v1168_v11 = vcombine.high %v1146_v61, %v1146_v61  ;;  %519 = vrot.lane.b32.xlu1 %v500_v57, %s9776_s21  ;;  %v684_v62 = vpop.permute.xlu0 %683 }
 0x18f   :  { %v1581_v37 = vcombine.low %v1121_v14, %v1146_v61  ;;  %v930_v6 = vsel %vm925_vm14, %v919_v43, %v684_v62  ;;  %v710_v43 = vrot.slane %v222_v5, 2 }
 0x190   :  { %v1582_v1 = vcombine.low %v1160_v40, %v1168_v11  ;;  %v794_v55 = vpop.permute.xlu1 %793  ;;  %763 = vrot.lane.b32.xlu0 %v10468_v50, %s9783_s28  ;;  %v1167_v59 = vrot.slane %v1139_v19, %v10313_v9  ;;  %v1169_v30 = vcombine.high %v1153_v58, %v1153_v58  ;;  %v1170_v27 = vcombine.high %v1160_v40, %v1160_v40 }
 0x191   :  { %v1603_v2 = vrot.slane %v1581_v37, %v10313_v9  ;;  %v941_v16 = vsel %vm936_vm15, %v930_v6, %v722_v46  ;;  %v711_v19 = vrot.slane %v223_v4, 2  ;;  %v782_v6 = vrot.slane %v222_v5, 4 }
 0x192   :  { %v1610_v25 = vrot.slane %v1582_v1, %v10313_v9  ;;  %799 = vrot.lane.b32.xlu1 %v10484_v52, %s9784_s12  ;;  %v758_v48 = vpop.permute.xlu0 %757  ;;  %v1628_v34 = vcombine.low %v1170_v27, %v1153_v58  ;;  %v1629_v15 = vcombine.low %v1167_v59, %v1169_v30  ;;  %v747_v59 = vrot.slane %v223_v4, 3 }
 0x193   :  { %v952_v50 = vsel %vm947_vm3, %v941_v16, %v758_v48  ;;  %v712_v37 = vsel %vm12379_vm0, %v710_v43, %v711_v19  ;;  %vm12382_vm0 = vcmask 1044480  }
 0x194   :  { %v1612_v23 = vcombine.low %v1603_v2, %v1610_v25  ;;  %v10571_v63 = vsel %vm12372_vm12, %v952_v50, %v794_v55  ;;  %v10573_v60 = vpop.permute.xlu1 %325  ;;  %659 = vrot.lane.b32.xlu0 %v10526_v18, %s9780_s24  ;;  %vm12380_vm12 = vcmask 1044480   ;;  %v1638_v35 = vrot.slane %v1628_v34, %v10313_v9 }
 0x195   :  { %v1178_v52 = vrot.slane %v10571_v63, %v10313_v9  ;;  %v574_v24 = vsel %vm12380_vm12, %v572_v44, %v573_v54  ;;  %v1645_v10 = vrot.slane %v1629_v15, %v10313_v9  ;;  %vm12381_vm12 = vcmask 1043456  }
 0x196   :  { %691 = vrot.lane.b32.xlu1 %v500_v57, %s9781_s9  ;;  %v10582_v33 = vpop.permute.xlu0 %254  ;;  %v1626_v8 = vrot.slane %v1612_v23, %v10313_v9  ;;  %v610_v42 = vsel %vm12381_vm12, %v608_v26, %v609_v39  ;;  %v674_v55 = vrot.slane %v222_v5, 1  ;;  %v784_v27 = vsel %vm12381_vm12, %v782_v6, %v783_v53 }
 0x197   :  { %v1186_v29 = vcombine.high %v1178_v52, %v1178_v52  ;;  %v1194_v36 = vrot.slane %v1178_v52, %v10313_v9  ;;  %v1660_v61 = vcombine.low %v1638_v35, %v1645_v10  ;;  %v748_v49 = vsel %vm12382_vm0, %v746_v47, %v747_v59  ;;  %v4521_v47 = vld [vmem:[#allocation7 + $0xe0] sm:$0xff] }
 0x198   :  { %v10586_v21 = vpop.permute.xlu1 %447  ;;  %557 = vrot.lane.b32.xlu0 %v538_v20, %s9777_s22  ;;  %v1627_v12 = vcombine.low %v1619_v0, %v1626_v8  ;;  %v821_v52 = vsel %vm815_vm4, %v10123_v45, %v10582_v33  ;;  %v1171_v33 = vcombine.high %v10571_v63, %v10571_v63  ;;  %vm12383_vm12 = vcmask 588800   ;;  %v4585_v59 = vld [vmem:[#allocation7 + $0x2e0] sm:$0xff] }
 0x199   :  { %v1208_v28 = vrot.slane %v1186_v29, %v10313_v9  ;;  %v1668_v40 = vrot.slane %v1660_v61, %v10313_v9  ;;  %vm12384_vm0 = vcmask 916480  }
 0x19a   :  { %729 = vrot.lane.b32.xlu1 %v538_v20, %s9782_s27  ;;  %9322 = vmatmul.mubr.msk.f32.gmra.mxu0 %vm1913_vm1, %v1627_v12  ;;  %v387_v38 = vpop.permute.xlu0 %386 }
 0x19b   :  { %v1630_v57 = vcombine.low %v1194_v36, %v1208_v28  ;;  %v8732_v41 = vcombine.high %v1194_v36, %v1208_v28  ;;  %9324 = vmatprep.mubr.msk.f32.mxu0 %vm12376_vm2, %v12373_v51 }
 0x19c   :  { %v480_v18 = vpop.permute.xlu1 %479  ;;  %593 = vrot.lane.b32.xlu0 %v574_v24, %s9778_s23 }
 0x19d   :  { %v1652_v22 = vrot.slane %v1630_v57, %v10313_v9  ;;  %v1659_v3 = vrot.slane %v8732_v41, %v10313_v9 }
 0x19e   :  { %765 = vrot.lane.b32.xlu1 %v574_v24, %s9783_s28  ;;  %v10607_v46 = vpop.permute.xlu0 %256 }
 0x19f   :  { %v1661_v14 = vcombine.low %v1652_v22, %v1659_v3 }
 0x1a0   :  { %v512_v58 = vpop.permute.xlu1 %511  ;;  %629 = vrot.lane.b32.xlu0 %v610_v42, %s9779_s7 }
 0x1a1   :  { %v1675_v11 = vrot.slane %v1661_v14, %v10313_v9  ;;  %v4588_v14 = vld [vmem:[#allocation7 + $0x2f8] sm:$0xff] }
 0x1a2   :  { %801 = vrot.lane.b32.xlu1 %v610_v42, %s9784_s12  ;;  %v10616_v62 = vpop.permute.xlu0 %327  ;;  %5631 = vmatprep.subr.mxu0 %v4588_v14 }
 0x1a3   :  { %v1676_v17 = vcombine.low %v1668_v40, %v1675_v11  ;;  %v4587_v40 = vld [vmem:[#allocation7 + $0x2f0] sm:$0xff] }
 0x1a4   :  { %v550_v1 = vpop.permute.xlu1 %549  ;;  %661 = vrot.lane.b32.xlu0 %v222_v5, %s9780_s24  ;;  %v4524_v5 = vld [vmem:[#allocation7 + $0xf8] sm:$0xff]  ;;  %5632 = vmatpush1.msra.mxu0 %v4587_v40  ;;  %v4513_v40 = vld [vmem:[#allocation7 + $0xa0] sm:$0xff] }
 0x1a5   :  { %9325 = vmatmul.mubr.msk.f32.gmra.mxu0 %vm1913_vm1, %v1676_v17  ;;  %5542 = vmatprep.subr.mxu1 %v4524_v5  ;;  %v4578_v5 = vld [vmem:[#allocation7 + $0x2a8] sm:$0xff] }
 0x1a6   :  { %v10621_v30 = vpop.permute.xlu0 %388  ;;  %731 = vrot.lane.b32.xlu1 %v712_v37, %s9782_s27  ;;  %9327 = vmatprep.mubr.msk.f32.mxu0 %vm12376_vm2, %v12373_v51  ;;  %v4586_v37 = vld [vmem:[#allocation7 + $0x2e8] sm:$0xff] }
 0x1a7   :  { %5633 = vmatprep.subr.mxu0 %v4586_v37 }
 0x1a8   :  { %v586_v31 = vpop.permute.xlu1 %585  ;;  %693 = vrot.lane.b32.xlu0 %v674_v55, %s9781_s9  ;;  %5634 = vmatpush1.msra.mxu0 %v4585_v59  ;;  %v4574_v59 = vld [vmem:[#allocation7 + $0x288] sm:$0xff] }
 0x1aa   :  { %v10629_v2 = vpop.permute.xlu0 %449  ;;  %803 = vrot.lane.b32.xlu1 %v784_v27, %s9784_s12  ;;  %v4520_v27 = vld [vmem:[#allocation7 + $0xd8] sm:$0xff] }
 0x1ac   :  { %v10632_v25 = vpop.permute.xlu1 %481  ;;  %767 = vrot.lane.b32.xlu0 %v748_v49, %s9783_s28 }
 0x1ae   :  { %v259_v16 = vpop.permute.xlu0 %258 }
 0x1af   :  { %v823_v48 = vsel %vm815_vm4, %v10197_v32, %v259_v16  ;;  %v832_v32 = vsel %vm826_vm5, %v821_v52, %v10573_v60 }
 0x1b0   :  { %v330_v50 = vpop.permute.xlu1 %329  ;;  %v843_v8 = vsel %vm837_vm6, %v832_v32, %v387_v38  ;;  %v4518_v32 = vld [vmem:[#allocation7 + $0xc8] sm:$0xff] }
 0x1b1   :  { %v10638_v23 = vsel %vm826_vm5, %v823_v48, %v330_v50  ;;  %v854_v24 = vsel %vm848_vm7, %v843_v8, %v10586_v21  ;;  %v1185_v21 = vrot.slane %v1171_v33, %v10313_v9  ;;  %v4582_v8 = vld [vmem:[#allocation7 + $0x2c8] sm:$0xff]  ;;  %v4581_v33 = vld [vmem:[#allocation7 + $0x2c0] sm:$0xff] }
 0x1b2   :  { %v622_v44 = vpop.permute.xlu0 %621  ;;  %v865_v39 = vsel %vm859_vm8, %v854_v24, %v480_v18 }
 0x1b3   :  { %v876_v45 = vsel %vm870_vm9, %v865_v39, %v512_v58  ;;  %v1187_v22 = vcombine.high %v1185_v21, %v1185_v21  ;;  %v4523_v58 = vld [vmem:[#allocation7 + $0xf0] sm:$0xff]  ;;  %v1201_v11 = vrot.slane %v1185_v21, %v10313_v9 }
 0x1b4   :  { %v654_v54 = vpop.permute.xlu1 %653  ;;  %v887_v60 = vsel %vm881_vm10, %v876_v45, %v550_v1  ;;  %5543 = vmatpush1.msra.mxu1 %v4523_v58  ;;  %v4517_v45 = vld [vmem:[#allocation7 + $0xc0] sm:$0xff] }
 0x1b5   :  { %v898_v36 = vsel %vm892_vm11, %v887_v60, %v586_v31  ;;  %v1215_v6 = vrot.slane %v1187_v22, %v10313_v9  ;;  %v4584_v31 = vld [vmem:[#allocation7 + $0x2d8] sm:$0xff]  ;;  %v1217_v52 = vcombine.high %v1201_v11, %v1201_v11  ;;  %v4579_v22 = vld [vmem:[#allocation7 + $0x2b0] sm:$0xff] }
 0x1b6   :  { %v10640_v34 = vpop.permute.xlu0 %513  ;;  %v909_v28 = vsel %vm12383_vm12, %v898_v36, %v622_v44  ;;  %5635 = vmatprep.subr.mxu0 %v4584_v31  ;;  %v4519_v44 = vld [vmem:[#allocation7 + $0xd0] sm:$0xff]  ;;  %v4580_v36 = vld [vmem:[#allocation7 + $0x2b8] sm:$0xff] }
 0x1b7   :  { %v920_v41 = vsel %vm914_vm13, %v909_v28, %v654_v54  ;;  %v4583_v54 = vld [vmem:[#allocation7 + $0x2d0] sm:$0xff] }
 0x1b8   :  { %v10642_v15 = vpop.permute.xlu1 %551  ;;  %5636 = vmatpush1.msra.mxu0 %v4583_v54  ;;  %v4572_v54 = vld [vmem:[#allocation7 + $0x278] sm:$0xff] }
 0x1b9   :  { %5637 = vmatprep.subr.mxu0 %v4582_v8 }
 0x1ba   :  { %v10647_v20 = vpop.permute.xlu0 %390  ;;  %5638 = vmatpush1.msra.mxu0 %v4581_v33  ;;  %v4570_v33 = vld [vmem:[#allocation7 + $0x268] sm:$0xff] }
 0x1bb   :  { %5639 = vmatprep.subr.mxu0 %v4580_v36  ;;  %v4569_v36 = vld [vmem:[#allocation7 + $0x260] sm:$0xff] }
 0x1bc   :  { %v10649_v0 = vpop.permute.xlu1 %451  ;;  %5640 = vmatpush1.msra.mxu0 %v4579_v22 }
 0x1bd   :  { %5641 = vmatprep.subr.mxu0 %v4578_v5  ;;  %v4566_v5 = vld [vmem:[#allocation7 + $0x248] sm:$0xff] }
 0x1be   :  { %v686_v29 = vpop.permute.xlu0 %685 }
 0x1bf   :  { %v931_v18 = vsel %vm925_vm14, %v920_v41, %v686_v29  ;;  %v1677_v29 = vcombine.low %v1201_v11, %v1215_v6  ;;  %v4577_v11 = vld [vmem:[#allocation7 + $0x2a0] sm:$0xff] }
 0x1c0   :  { %v724_v12 = vpop.permute.xlu1 %723  ;;  %5642 = vmatpush1.msra.mxu0 %v4577_v11 }
 0x1c1   :  { %v942_v42 = vsel %vm936_vm15, %v931_v18, %v724_v12  ;;  %v4515_v18 = vld [vmem:[#allocation7 + $0xb0] sm:$0xff] }
 0x1c2   :  { %v10656_v26 = vpop.permute.xlu0 %587 }
 0x1c4   :  { %v10659_v35 = vpop.permute.xlu1 %483 }
 0x1c6   :  { %v261_v10 = vpop.permute.xlu0 %260 }
 0x1c7   :  { %v824_v63 = vsel %vm815_vm4, %v10258_v13, %v261_v10  ;;  %v4522_v13 = vld [vmem:[#allocation7 + $0xe8] sm:$0xff]  ;;  %v4516_v10 = vld [vmem:[#allocation7 + $0xb8] sm:$0xff] }
 0x1c8   :  { %v760_v38 = vpop.permute.xlu1 %759  ;;  %5544 = vmatprep.subr.mxu1 %v4522_v13 }
 0x1c9   :  { %v953_v43 = vsel %vm947_vm3, %v942_v42, %v760_v38  ;;  %5545 = vmatpush1.msra.mxu1 %v4521_v47  ;;  %v4514_v42 = vld [vmem:[#allocation7 + $0xa8] sm:$0xff] }
 0x1ca   :  { %v10668_v57 = vpop.permute.xlu0 %623  ;;  %5546 = vmatprep.subr.mxu1 %v4520_v27 }
 0x1cb   :  { %5547 = vmatpush1.msra.mxu1 %v4519_v44  ;;  %v4508_v44 = vld [vmem:[#allocation7 + $0x78] sm:$0xff] }
 0x1cc   :  { %v10672_v4 = vpop.permute.xlu1 %515  ;;  %5548 = vmatprep.subr.mxu1 %v4518_v32 }
 0x1cd   :  { %5549 = vmatpush1.msra.mxu1 %v4517_v45  ;;  %v4506_v45 = vld [vmem:[#allocation7 + $0x68] sm:$0xff] }
 0x1ce   :  { %v332_v3 = vpop.permute.xlu0 %331  ;;  %5550 = vmatprep.subr.mxu1 %v4516_v10  ;;  %v4505_v10 = vld [vmem:[#allocation7 + $0x60] sm:$0xff] }
 0x1cf   :  { %v10678_v61 = vsel %vm826_vm5, %v824_v63, %v332_v3  ;;  %v822_v63 = vsel %vm815_vm4, %v10158_v7, %v10607_v46  ;;  %5551 = vmatpush1.msra.mxu1 %v4515_v18  ;;  %v4512_v46 = vld [vmem:[#allocation7 + $0x98] sm:$0xff] }
 0x1d0   :  { %v796_v19 = vpop.permute.xlu1 %795  ;;  %v833_v14 = vsel %vm826_vm5, %v822_v63, %v10616_v62  ;;  %5552 = vmatprep.subr.mxu1 %v4514_v42  ;;  %v4567_v63 = vld [vmem:[#allocation7 + $0x250] sm:$0xff]  ;;  %v4502_v42 = vld [vmem:[#allocation7 + $0x48] sm:$0xff] }
 0x1d1   :  { %v964_v17 = vsel %vm12384_vm0, %v953_v43, %v796_v19  ;;  %v1687_v19 = vrot.slane %v1677_v29, %v10313_v9  ;;  %v844_v7 = vsel %vm837_vm6, %v833_v14, %v10621_v30  ;;  %5553 = vmatpush1.msra.mxu1 %v4513_v40  ;;  %v4510_v30 = vld [vmem:[#allocation7 + $0x88] sm:$0xff]  ;;  %v4507_v29 = vld [vmem:[#allocation7 + $0x70] sm:$0xff] }
 0x1d2   :  { %v1219_v53 = vcombine.high %v964_v17, %v964_v17  ;;  %v1226_v1 = vrot.slane %v964_v17, %v10313_v9  ;;  %v10685_v55 = vpop.permute.xlu0 %655  ;;  %v4576_v17 = vld [vmem:[#allocation7 + $0x298] sm:$0xff]  ;;  %v855_v47 = vsel %vm848_vm7, %v844_v7, %v10629_v2  ;;  %5554 = vmatprep.subr.mxu1 %v4512_v46 }
 0x1d3   :  { %5643 = vmatprep.subr.mxu0 %v4576_v17  ;;  %v4500_v7 = vld [vmem:[#allocation7 + $0x38] sm:$0xff] }
 0x1d4   :  { %v10688_v49 = vrot.slane %v1219_v53, %v10313_v9  ;;  %v1234_v16 = vcombine.high %v1226_v1, %v1226_v1  ;;  %v1242_v48 = vrot.slane %v1226_v1, %v10313_v9  ;;  %v10691_v50 = vpop.permute.xlu1 %553  ;;  %v4511_v53 = vld [vmem:[#allocation7 + $0x90] sm:$0xff]  ;;  %v4564_v46 = vld [vmem:[#allocation7 + $0x238] sm:$0xff] }
 0x1d5   :  { %v4575_v1 = vld [vmem:[#allocation7 + $0x290] sm:$0xff]  ;;  %5555 = vmatpush1.msra.mxu1 %v4511_v53 }
 0x1d6   :  { %v1256_v12 = vrot.slane %v1234_v16, %v10313_v9  ;;  %v1264_v24 = vcombine.high %v1242_v48, %v1242_v48  ;;  %v10694_v39 = vpop.permute.xlu0 %392  ;;  %v1678_v60 = vcombine.low %v1217_v52, %v1242_v48  ;;  %v10698_v28 = vrot.slane %v10688_v49, %v10313_v9  ;;  %5644 = vmatpush1.msra.mxu0 %v4575_v1  ;;  %v4509_v16 = vld [vmem:[#allocation7 + $0x80] sm:$0xff] }
 0x1d7   :  { %v4573_v48 = vld [vmem:[#allocation7 + $0x280] sm:$0xff]  ;;  %5556 = vmatprep.subr.mxu1 %v4510_v30  ;;  %5645 = vmatprep.subr.mxu0 %v4574_v59  ;;  %v866_v52 = vsel %vm859_vm8, %v855_v47, %v10632_v25 }
 0x1d8   :  { %v1266_v38 = vcombine.high %v1256_v12, %v1256_v12  ;;  %v1679_v21 = vcombine.low %v1256_v12, %v1264_v24  ;;  %v10700_v41 = vpop.permute.xlu1 %453  ;;  %v1694_v3 = vrot.slane %v1678_v60, %v10313_v9  ;;  %5557 = vmatpush1.msra.mxu1 %v4509_v16  ;;  %5646 = vmatpush1.msra.mxu0 %v4573_v48  ;;  %v4571_v12 = vld [vmem:[#allocation7 + $0x270] sm:$0xff]  ;;  %v4497_v1 = vld [vmem:[#allocation7 + $0x20] sm:$0xff]  ;;  %v4560_v16 = vld [vmem:[#allocation7 + $0x218] sm:$0xff] }
 0x1d9   :  { %v877_v24 = vsel %vm870_vm9, %v866_v52, %v10640_v34  ;;  %5558 = vmatprep.subr.mxu1 %v4508_v44  ;;  %5647 = vmatprep.subr.mxu0 %v4572_v54  ;;  %v4503_v34 = vld [vmem:[#allocation7 + $0x50] sm:$0xff]  ;;  %v4561_v47 = vld [vmem:[#allocation7 + $0x220] sm:$0xff]  ;;  %v1265_v59 = vcombine.high %v10698_v28, %v10698_v28 }
 0x1da   :  { %v1680_v43 = vcombine.low %v1266_v38, %v10698_v28  ;;  %v10710_v58 = vpop.permute.xlu0 %687  ;;  %v1701_v13 = vrot.slane %v1679_v21, %v10313_v9  ;;  %v1709_v37 = vcombine.low %v1687_v19, %v1694_v3  ;;  %5559 = vmatpush1.msra.mxu1 %v4507_v29  ;;  %5648 = vmatpush1.msra.mxu0 %v4571_v12  ;;  %v4504_v38 = vld [vmem:[#allocation7 + $0x58] sm:$0xff]  ;;  %v4565_v19 = vld [vmem:[#allocation7 + $0x240] sm:$0xff]  ;;  %v4495_v52 = vld [vmem:[#allocation7 + $0x10] sm:$0xff] }
 0x1db   :  { %5560 = vmatprep.subr.mxu1 %v4506_v45  ;;  %5649 = vmatprep.subr.mxu0 %v4570_v33  ;;  %v4568_v21 = vld [vmem:[#allocation7 + $0x258] sm:$0xff]  ;;  %v888_v18 = vsel %vm881_vm10, %v877_v24, %v10642_v15  ;;  %v4501_v15 = vld [vmem:[#allocation7 + $0x40] sm:$0xff]  ;;  %v4558_v29 = vld [vmem:[#allocation7 + $0x208] sm:$0xff] }
 0x1dc   :  { %v1708_v62 = vrot.slane %v1680_v43, %v10313_v9  ;;  %v10716_v6 = vpop.permute.xlu1 %725  ;;  %v1717_v2 = vrot.slane %v1709_v37, %v10313_v9  ;;  %5561 = vmatpush1.msra.mxu1 %v4505_v10  ;;  %v899_v3 = vsel %vm892_vm11, %v888_v18, %v10656_v26  ;;  %5650 = vmatpush1.msra.mxu0 %v4569_v36  ;;  %v4562_v37 = vld [vmem:[#allocation7 + $0x228] sm:$0xff]  ;;  %v4493_v45 = vld [vmem:[#allocation7] sm:$0xff]  ;;  %v4556_v10 = vld [vmem:[#allocation7 + $0x1f8] sm:$0xff] }
 0x1dd   :  { %v910_v14 = vsel %vm12383_vm12, %v899_v3, %v10668_v57  ;;  %5562 = vmatprep.subr.mxu1 %v4504_v38  ;;  %5651 = vmatprep.subr.mxu0 %v4568_v21  ;;  %v1235_v57 = vcombine.high %v10688_v49, %v10688_v49  ;;  %v4557_v33 = vld [vmem:[#allocation7 + $0x200] sm:$0xff]  ;;  %v4620_v36 = vld [vmem:[#allocation7 + $0x3f8] sm:$0xff]  ;;  %v845_v3 = vsel %vm837_vm6, %v10638_v23, %v10647_v20 }
 0x1de   :  { %v10720_v27 = vpop.permute.xlu0 %589  ;;  %v1710_v31 = vcombine.low %v1701_v13, %v1708_v62  ;;  %v921_v40 = vsel %vm914_vm13, %v910_v14, %v10685_v55  ;;  %5563 = vmatpush1.msra.mxu1 %v4503_v34  ;;  %5652 = vmatpush1.msra.mxu0 %v4567_v63  ;;  %v4499_v55 = vld [vmem:[#allocation7 + $0x30] sm:$0xff]  ;;  %v4498_v62 = vld [vmem:[#allocation7 + $0x28] sm:$0xff]  ;;  %v4616_v23 = vld [vmem:[#allocation7 + $0x3d8] sm:$0xff] }
 0x1df   :  { %v932_v26 = vsel %vm925_vm14, %v921_v40, %v10710_v58  ;;  %5564 = vmatprep.subr.mxu1 %v4502_v42  ;;  %5653 = vmatprep.subr.mxu0 %v4566_v5  ;;  %v4563_v13 = vld [vmem:[#allocation7 + $0x230] sm:$0xff]  ;;  %v1263_v30 = vrot.slane %v1235_v57, %v10313_v9  ;;  %v4554_v42 = vld [vmem:[#allocation7 + $0x1e8] sm:$0xff]  ;;  %v4553_v57 = vld [vmem:[#allocation7 + $0x1e0] sm:$0xff] }
 0x1e0   :  { %v10724_v32 = vpop.permute.xlu1 %485  ;;  %v1724_v8 = vrot.slane %v1710_v31, %v10313_v9  ;;  %5565 = vmatpush1.msra.mxu1 %v4501_v15  ;;  %5654 = vmatpush1.msra.mxu0 %v4565_v19  ;;  %v943_v58 = vsel %vm936_vm15, %v932_v26, %v10716_v6  ;;  %v4496_v6 = vld [vmem:[#allocation7 + $0x18] sm:$0xff]  ;;  %v4555_v34 = vld [vmem:[#allocation7 + $0x1f0] sm:$0xff]  ;;  %v4618_v5 = vld [vmem:[#allocation7 + $0x3e8] sm:$0xff] }
 0x1e1   :  { %5566 = vmatprep.subr.mxu1 %v4500_v7  ;;  %5655 = vmatprep.subr.mxu0 %v4564_v46  ;;  %v4619_v63 = vld [vmem:[#allocation7 + $0x3f0] sm:$0xff]  ;;  %v4617_v7 = vld [vmem:[#allocation7 + $0x3e0] sm:$0xff]  ;;  %v4552_v46 = vld [vmem:[#allocation7 + $0x1d8] sm:$0xff] }
 0x1e2   :  { %v10730_v60 = vpop.permute.xlu0 %262  ;;  %v1725_v25 = vcombine.low %v1717_v2, %v1724_v8  ;;  %5567 = vmatpush1.msra.mxu1 %v4499_v55  ;;  %5656 = vmatpush1.msra.mxu0 %v4563_v13  ;;  %v4559_v2 = vld [vmem:[#allocation7 + $0x210] sm:$0xff]  ;;  %v4494_v8 = vld [vmem:[#allocation7 + $0x8] sm:$0xff] }
 0x1e3   :  { %5568 = vmatprep.subr.mxu1 %v4498_v62  ;;  %5657 = vmatprep.subr.mxu0 %v4562_v37  ;;  %v4551_v62 = vld [vmem:[#allocation7 + $0x1d0] sm:$0xff] }
 0x1e4   :  { %v762_v22 = vpop.permute.xlu1 %761  ;;  %9328 = vmatmul.mubr.msk.f32.gmra.mxu0 %vm1913_vm1, %v1725_v25  ;;  %5569 = vmatpush1.msra.mxu1 %v4497_v1  ;;  %v1726_v25 = vcombine.low %v1263_v30, %v1265_v59  ;;  %v4615_v37 = vld [vmem:[#allocation7 + $0x3d0] sm:$0xff]  ;;  %v4614_v1 = vld [vmem:[#allocation7 + $0x3c8] sm:$0xff] }
 0x1e5   :  { %9330 = vmatprep.mubr.msk.f32.mxu0 %vm12376_vm2, %v12373_v51  ;;  %v954_v53 = vsel %vm947_vm3, %v943_v58, %v762_v22  ;;  %5658 = vmatpush1.msra.mxu0 %v4561_v47 }
 0x1e6   :  { %v10741_v43 = vpop.permute.xlu0 %625  ;;  %5570 = vmatprep.subr.mxu1 %v4496_v6  ;;  %5659 = vmatprep.subr.mxu0 %v4560_v16  ;;  %v1736_v55 = vrot.slane %v1726_v25, %v10313_v9  ;;  %v4549_v6 = vld [vmem:[#allocation7 + $0x1c0] sm:$0xff] }
 0x1e7   :  { %5571 = vmatpush1.msra.mxu1 %v4495_v52  ;;  %5660 = vmatpush1.msra.mxu0 %v4559_v2  ;;  %v4613_v16 = vld [vmem:[#allocation7 + $0x3c0] sm:$0xff] }
 0x1e8   :  { %v10747_v11 = vpop.permute.xlu1 %517  ;;  %5572 = vmatprep.subr.mxu1 %v4494_v8  ;;  %5661 = vmatprep.subr.mxu0 %v4558_v29  ;;  %v4547_v29 = vld [vmem:[#allocation7 + $0x1b0] sm:$0xff] }
 0x1e9   :  { %5573 = vmatpush1.msra.mxu1 %v4493_v45  ;;  %5662 = vmatpush1.msra.mxu0 %v4557_v33  ;;  %v4610_v45 = vld [vmem:[#allocation7 + $0x3a8] sm:$0xff] }
 0x1ea   :  { %v10751_v17 = vpop.permute.xlu0 %333  ;;  %5574 = vmatprep.subr.mxu1 %v4556_v10  ;;  %5663 = vmatprep.subr.mxu0 %v4620_v36  ;;  %v4545_v36 = vld [vmem:[#allocation7 + $0x1a0] sm:$0xff] }
 0x1eb   :  { %5575 = vmatpush2.msra.mxu1 %v4555_v34  ;;  %5664 = vmatpush2.msra.mxu0 %v4619_v63 }
 0x1ec   :  { %v798_v49 = vpop.permute.xlu1 %797  ;;  %5576 = vmatprep.subr.mxu1 %v4554_v42  ;;  %5665 = vmatprep.subr.mxu0 %v4618_v5  ;;  %v4607_v42 = vld [vmem:[#allocation7 + $0x390] sm:$0xff] }
 0x1ed   :  { %v965_v31 = vsel %vm12384_vm0, %v954_v53, %v798_v49  ;;  %5577 = vmatpush2.msra.mxu1 %v4553_v57  ;;  %5666 = vmatpush2.msra.mxu0 %v4617_v7  ;;  %v856_v53 = vsel %vm848_vm7, %v845_v3, %v10649_v0  ;;  %v4550_v49 = vld [vmem:[#allocation7 + $0x1c8] sm:$0xff]  ;;  %v4548_v0 = vld [vmem:[#allocation7 + $0x1b8] sm:$0xff]  ;;  %v4543_v3 = vld [vmem:[#allocation7 + $0x190] sm:$0xff]  ;;  %v846_v7 = vsel %vm837_vm6, %v10678_v61, %v10694_v39 }
 0x1ee   :  { %v1267_v48 = vcombine.high %v965_v31, %v965_v31  ;;  %v1274_v44 = vrot.slane %v965_v31, %v10313_v9  ;;  %v10761_v54 = vpop.permute.xlu0 %657  ;;  %5578 = vmatprep.subr.mxu1 %v4552_v46  ;;  %5667 = vmatprep.subr.mxu0 %v4616_v23  ;;  %v4540_v57 = vld [vmem:[#allocation7 + $0x178] sm:$0xff]  ;;  %v4539_v23 = vld [vmem:[#allocation7 + $0x170] sm:$0xff]  ;;  %v857_v61 = vsel %vm848_vm7, %v846_v7, %v10700_v41 }
 0x1ef   :  { %5579 = vmatpush2.msra.mxu1 %v4551_v62  ;;  %5668 = vmatpush2.msra.mxu0 %v4615_v37  ;;  %v4604_v46 = vld [vmem:[#allocation7 + $0x378] sm:$0xff]  ;;  %v4602_v37 = vld [vmem:[#allocation7 + $0x368] sm:$0xff] }
 0x1f0   :  { %v1281_v28 = vrot.slane %v1267_v48, %v10313_v9  ;;  %v1282_v12 = vcombine.high %v1274_v44, %v1274_v44  ;;  %v10764_v24 = vpop.permute.xlu1 %555  ;;  %v1290_v21 = vrot.slane %v1274_v44, %v10313_v9  ;;  %5580 = vmatprep.subr.mxu1 %v4550_v49  ;;  %v867_v48 = vsel %vm859_vm8, %v856_v53, %v10659_v35  ;;  %v4612_v44 = vld [vmem:[#allocation7 + $0x3b8] sm:$0xff]  ;;  %v4546_v35 = vld [vmem:[#allocation7 + $0x1a8] sm:$0xff]  ;;  %v4537_v53 = vld [vmem:[#allocation7 + $0x160] sm:$0xff] }
 0x1f1   :  { %5669 = vmatprep.subr.mxu0 %v4614_v1  ;;  %5581 = vmatpush2.msra.mxu1 %v4549_v6  ;;  %v878_v52 = vsel %vm870_vm9, %v867_v48, %v10672_v4  ;;  %v4601_v49 = vld [vmem:[#allocation7 + $0x360] sm:$0xff]  ;;  %v4536_v1 = vld [vmem:[#allocation7 + $0x158] sm:$0xff] }
 0x1f2   :  { %v1283_v38 = vcombine.high %v1281_v28, %v1281_v28  ;;  %v1304_v18 = vrot.slane %v1282_v12, %v10313_v9  ;;  %v10768_v22 = vpop.permute.xlu0 %394  ;;  %v10774_v14 = vrot.slane %v1281_v28, %v10313_v9  ;;  %5670 = vmatpush2.msra.mxu0 %v4613_v16  ;;  %5582 = vmatprep.subr.mxu1 %v4548_v0  ;;  %v4611_v28 = vld [vmem:[#allocation7 + $0x3b0] sm:$0xff] }
 0x1f3   :  { %v889_v12 = vsel %vm881_vm10, %v878_v52, %v10691_v50  ;;  %5671 = vmatprep.subr.mxu0 %v4612_v44  ;;  %5583 = vmatpush2.msra.mxu1 %v4547_v29  ;;  %v4599_v0 = vld [vmem:[#allocation7 + $0x350] sm:$0xff]  ;;  %v4534_v44 = vld [vmem:[#allocation7 + $0x148] sm:$0xff] }
 0x1f4   :  { %v1311_v15 = vrot.slane %v1283_v38, %v10313_v9  ;;  %v1727_v19 = vcombine.low %v1290_v21, %v1304_v18  ;;  %v8733_v40 = vcombine.high %v1290_v21, %v1304_v18  ;;  %v10777_v26 = vpop.permute.xlu1 %455  ;;  %v900_v33 = vsel %vm892_vm11, %v889_v12, %v10720_v27  ;;  %5672 = vmatpush2.msra.mxu0 %v4611_v28  ;;  %v4609_v38 = vld [vmem:[#allocation7 + $0x3a0] sm:$0xff]  ;;  %v4544_v21 = vld [vmem:[#allocation7 + $0x198] sm:$0xff]  ;;  %v4598_v52 = vld [vmem:[#allocation7 + $0x348] sm:$0xff] }
 0x1f5   :  { %5584 = vmatprep.subr.mxu1 %v4546_v35  ;;  %v911_v50 = vsel %vm12383_vm12, %v900_v33, %v10741_v43  ;;  %5673 = vmatprep.subr.mxu0 %v4610_v45  ;;  %v4608_v18 = vld [vmem:[#allocation7 + $0x398] sm:$0xff]  ;;  %v4606_v43 = vld [vmem:[#allocation7 + $0x388] sm:$0xff]  ;;  %v4533_v12 = vld [vmem:[#allocation7 + $0x140] sm:$0xff] }
 0x1f6   :  { %v1729_v20 = vcombine.low %v10774_v14, %v1311_v15  ;;  %v1743_v13 = vrot.slane %v1727_v19, %v10313_v9  ;;  %v690_v58 = vpop.permute.xlu0 %689  ;;  %v1750_v47 = vrot.slane %v8733_v40, %v10313_v9  ;;  %5585 = vmatpush2.msra.mxu1 %v4545_v36  ;;  %v922_v27 = vsel %vm914_vm13, %v911_v50, %v10761_v54  ;;  %v4542_v15 = vld [vmem:[#allocation7 + $0x188] sm:$0xff]  ;;  %v4541_v40 = vld [vmem:[#allocation7 + $0x180] sm:$0xff]  ;;  %v4532_v33 = vld [vmem:[#allocation7 + $0x138] sm:$0xff] }
 0x1f7   :  { %5674 = vmatpush2.msra.mxu0 %v4609_v38  ;;  %5586 = vmatprep.subr.mxu1 %v4544_v21  ;;  %v933_v5 = vsel %vm925_vm14, %v922_v27, %v690_v58  ;;  %v4605_v54 = vld [vmem:[#allocation7 + $0x380] sm:$0xff]  ;;  %v4538_v58 = vld [vmem:[#allocation7 + $0x168] sm:$0xff]  ;;  %v4596_v21 = vld [vmem:[#allocation7 + $0x338] sm:$0xff] }
 0x1f8   :  { %v1757_v30 = vrot.slane %v1729_v20, %v10313_v9  ;;  %v1758_v59 = vcombine.low %v1736_v55, %v1743_v13  ;;  %v728_v31 = vpop.permute.xlu1 %727  ;;  %5675 = vmatprep.subr.mxu0 %v4608_v18  ;;  %5587 = vmatpush2.msra.mxu1 %v4543_v3  ;;  %v4603_v13 = vld [vmem:[#allocation7 + $0x370] sm:$0xff]  ;;  %v4597_v35 = vld [vmem:[#allocation7 + $0x340] sm:$0xff]  ;;  %v4530_v3 = vld [vmem:[#allocation7 + $0x128] sm:$0xff] }
 0x1f9   :  { %5588 = vmatprep.subr.mxu1 %v4542_v15  ;;  %5676 = vmatpush2.msra.mxu0 %v4607_v42  ;;  %v944_v20 = vsel %vm936_vm15, %v933_v5, %v728_v31  ;;  %v4535_v31 = vld [vmem:[#allocation7 + $0x150] sm:$0xff] }
 0x1fa   :  { %v1759_v2 = vcombine.low %v1750_v47, %v1757_v30  ;;  %v10790_v8 = vpop.permute.xlu0 %591  ;;  %v1766_v4 = vrot.slane %v1758_v59, %v10313_v9  ;;  %5677 = vmatprep.subr.mxu0 %v4606_v43  ;;  %5589 = vmatpush2.msra.mxu1 %v4541_v40  ;;  %v868_v47 = vsel %vm859_vm8, %v857_v61, %v10724_v32  ;;  %v4600_v59 = vld [vmem:[#allocation7 + $0x358] sm:$0xff]  ;;  %v4531_v18 = vld [vmem:[#allocation7 + $0x130] sm:$0xff] }
 0x1fb   :  { %5678 = vmatpush2.msra.mxu0 %v4605_v54  ;;  %5590 = vmatprep.subr.mxu1 %v4540_v57  ;;  %v879_v6 = vsel %vm870_vm9, %v868_v47, %v10747_v11  ;;  %v4594_v54 = vld [vmem:[#allocation7 + $0x328] sm:$0xff]  ;;  %v4529_v57 = vld [vmem:[#allocation7 + $0x120] sm:$0xff]  ;;  %v4591_v61 = vld [vmem:[#allocation7 + $0x310] sm:$0xff] }
 0x1fc   :  { %v10796_v25 = vpop.permute.xlu1 %627  ;;  %v1773_v10 = vrot.slane %v1759_v2, %v10313_v9  ;;  %5679 = vmatprep.subr.mxu0 %v4604_v46  ;;  %5591 = vmatpush2.msra.mxu1 %v4539_v23  ;;  %v890_v32 = vsel %vm881_vm10, %v879_v6, %v10764_v24  ;;  %v1313_v24 = vcombine.high %v10774_v14, %v10774_v14  ;;  %v4593_v23 = vld [vmem:[#allocation7 + $0x320] sm:$0xff] }
 0x1fd   :  { %5680 = vmatpush2.msra.mxu0 %v4603_v13  ;;  %5592 = vmatprep.subr.mxu1 %v4538_v58  ;;  %v901_v45 = vsel %vm892_vm11, %v890_v32, %v10790_v8  ;;  %v9479_v8 = vld [vmem:[%s12352_s0 + $0xb0] sm:$0xff]  ;;  %v4589_v6 = vld [vmem:[#allocation7 + $0x300] sm:$0xff]  ;;  %s9788_s0 = smov [#allocation22]  }
 0x1fe   :  { %v10804_v34 = vpop.permute.xlu0 %487  ;;  %v1774_v63 = vcombine.low %v1766_v4, %v1773_v10  ;;  %5681 = vmatprep.subr.mxu0 %v4602_v37  ;;  %5593 = vmatpush2.msra.mxu1 %v4537_v53  ;;  %v825_v14 = vsel %vm815_vm4, %v9479_v8, %v10730_v60  ;;  %v912_v60 = vsel %vm12383_vm12, %v901_v45, %v10796_v25  ;;  %v4592_v37 = vld [vmem:[#allocation7 + $0x318] sm:$0xff]  ;;  %v4527_v53 = vld [vmem:[#allocation7 + $0x110] sm:$0xff]  ;;  %vm12385_vm4 = vmmov %vm12384_vm0  ;;  %s8714_s24 = sshll.u32 %s9788_s0, 4  ;;  %s8715_s24 = int_to_ptr.vmem [resolvable:$true] %s8714_s24 }
 0x1ff   :  { %5682 = vmatpush2.msra.mxu0 %v4601_v49  ;;  %5594 = vmatprep.subr.mxu1 %v4536_v1  ;;  %v836_v7 = vsel %vm826_vm5, %v825_v14, %v10751_v17  ;;  %vm12386_vm5 = vmmov %vm12383_vm12  ;;  %s9721_s9 = scalar_lea.vmem %s8715_s24, 32  ;;  %p9726_p5 = scmp.lt.s32.totalorder %s8715_s24, %s8715_s24 }
 0x200   :  { %v10807_v19 = vpop.permute.xlu1 %519  ;;  %9331 = vmatmul.mubr.msk.f32.gmra.mxu0 %vm1913_vm1, %v1774_v63  ;;  %5683 = vmatprep.subr.mxu0 %v4600_v59  ;;  %v4595_v63 = vld [vmem:[#allocation7 + $0x330] sm:$0xff]  ;;  %v847_v17 = vsel %vm837_vm6, %v836_v7, %v10768_v22  ;;  %v4590_v59 = vld [vmem:[#allocation7 + $0x308] sm:$0xff]  ;;  %vm12387_vm6 = vmmov %vm12384_vm0  ;;  %p9722_p4 = scmp.ne.s32.totalorder %s8715_s24, %s9721_s9  ;;  %p9727_p6 = scmp.lt.s32.totalorder %s9721_s9, %s9721_s9 }
 0x201   :  { %9333 = vmatprep.mubr.msk.f32.mxu0 %vm12376_vm2, %v12373_v51  ;;  %5595 = vmatpush2.msra.mxu1 %v4535_v31  ;;  %v4525_v31 = vld [vmem:[#allocation7 + $0x100] sm:$0xff]  ;;  %v858_v22 = vsel %vm848_vm7, %v847_v17, %v10777_v26  ;;  %vm8315_vm7 = vcmask 1041409  }
 0x202   :  { %v764_v55 = vpop.permute.xlu0 %763  ;;  %5684 = vmatpush2.msra.mxu0 %v4599_v0  ;;  %5596 = vmatprep.subr.mxu1 %v4534_v44  ;;  %v869_v0 = vsel %vm859_vm8, %v858_v22, %v10804_v34  ;;  %p9728_p7 = por %p9727_p6, %p9726_p5 }
 0x203   :  { %v955_v62 = vsel %vm947_vm3, %v944_v20, %v764_v55  ;;  %5685 = vmatprep.subr.mxu0 %v4598_v52  ;;  %5597 = vmatpush2.msra.mxu1 %v4533_v12  ;;  %v4528_v20 = vld [vmem:[#allocation7 + $0x118] sm:$0xff] }
 0x204   :  { %v800_v39 = vpop.permute.xlu1 %799  ;;  %5686 = vmatpush2.msra.mxu0 %v4597_v35  ;;  %5598 = vmatprep.subr.mxu1 %v4532_v33  ;;  %p9729_p8 = pnand %p9728_p7, %p9722_p4 }
 0x205   :  { %v966_v30 = vsel %vm12384_vm0, %v955_v62, %v800_v39  ;;  %5687 = vmatprep.subr.mxu0 %v4596_v21  ;;  %5599 = vmatpush2.msra.mxu1 %v4531_v18  ;;  %v4526_v39 = vld [vmem:[#allocation7 + $0x108] sm:$0xff] }
 0x206   :  { %v1315_v16 = vcombine.high %v966_v30, %v966_v30  ;;  %v1322_v41 = vrot.slane %v966_v30, %v10313_v9  ;;  %v660_v48 = vpop.permute.xlu0 %659  ;;  %5688 = vmatpush2.msra.mxu0 %v4595_v63  ;;  %5600 = vmatprep.subr.mxu1 %v4530_v3 }
 0x207   :  { %v923_v25 = vsel %vm914_vm13, %v912_v60, %v660_v48  ;;  %5689 = vmatprep.subr.mxu0 %v4594_v54  ;;  %5601 = vmatpush2.msra.mxu1 %v4529_v57 }
 0x208   :  { %v1329_v2 = vrot.slane %v1315_v16, %v10313_v9  ;;  %v1330_v29 = vcombine.high %v1322_v41, %v1322_v41  ;;  %v1338_v28 = vrot.slane %v1322_v41, %v10313_v9  ;;  %v10829_v11 = vpop.permute.xlu1 %691  ;;  %5690 = vmatpush2.msra.mxu0 %v4593_v23  ;;  %5602 = vmatprep.subr.mxu1 %v4528_v20 }
 0x209   :  { %5691 = vmatprep.subr.mxu0 %v4592_v37  ;;  %5603 = vmatpush2.msra.mxu1 %v4527_v53  ;;  %v934_v16 = vsel %vm925_vm14, %v923_v25, %v10829_v11 }
 0x20a   :  { %v1331_v4 = vcombine.high %v1329_v2, %v1329_v2  ;;  %v1345_v10 = vrot.slane %v1329_v2, %v10313_v9  ;;  %v1352_v36 = vrot.slane %v1330_v29, %v10313_v9  ;;  %v1360_v38 = vcombine.high %v1338_v28, %v1338_v28  ;;  %v10837_v50 = vpop.permute.xlu0 %557  ;;  %5692 = vmatpush2.msra.mxu0 %v4591_v61 }
 0x20b   :  { %v1775_v27 = vcombine.low %v1313_v24, %v1338_v28  ;;  %5604 = vmatprep.subr.mxu1 %v4526_v39  ;;  %5693 = vmatprep.subr.mxu0 %v4590_v59  ;;  %v880_v28 = vsel %vm870_vm9, %v869_v0, %v10807_v19 }
 0x20c   :  { %v1359_v42 = vrot.slane %v1331_v4, %v10313_v9  ;;  %v1361_v5 = vcombine.high %v1345_v10, %v1345_v10  ;;  %v1362_v15 = vcombine.high %v1352_v36, %v1352_v36  ;;  %v1776_v43 = vcombine.low %v1352_v36, %v1360_v38  ;;  %v730_v40 = vpop.permute.xlu1 %729  ;;  %5605 = vmatpush2.msra.mxu1 %v4525_v31 }
 0x20d   :  { %v1785_v46 = vrot.slane %v1775_v27, %v10313_v9  ;;  %v945_v44 = vsel %vm936_vm15, %v934_v16, %v730_v40  ;;  %5694 = vmatpush2.msra.mxu0 %v4589_v6  ;;  %v891_v45 = vsel %vm881_vm10, %v880_v28, %v10837_v50 }
 0x20e   :  { %v1777_v55 = vcombine.low %v1362_v15, %v1345_v10  ;;  %v1778_v13 = vcombine.low %v1359_v42, %v1361_v5  ;;  %v1792_v58 = vrot.slane %v1776_v43, %v10313_v9  ;;  %v594_v62 = vpop.permute.xlu0 %593 }
 0x20f   :  { %v902_v24 = vsel %vm892_vm11, %v891_v45, %v594_v62 }
 0x210   :  { %v1799_v49 = vrot.slane %v1777_v55, %v10313_v9  ;;  %v1806_v1 = vrot.slane %v1778_v13, %v10313_v9  ;;  %v1807_v47 = vcombine.low %v1785_v46, %v1792_v58  ;;  %v766_v30 = vpop.permute.xlu1 %765 }
 0x211   :  { %v956_v32 = vsel %vm947_vm3, %v945_v44, %v766_v30 }
 0x212   :  { %v630_v41 = vpop.permute.xlu0 %629  ;;  %v1808_v48 = vcombine.low %v1799_v49, %v1806_v1  ;;  %v1815_v2 = vrot.slane %v1807_v47, %v10313_v9 }
 0x213   :  { %v913_v36 = vsel %vm12386_vm5, %v902_v24, %v630_v41 }
 0x214   :  { %v802_v52 = vpop.permute.xlu1 %801  ;;  %v1822_v26 = vrot.slane %v1808_v48, %v10313_v9 }
 0x215   :  { %v967_v29 = vsel %vm12385_vm4, %v956_v32, %v802_v52 }
 0x216   :  { %v1363_v11 = vcombine.high %v967_v29, %v967_v29  ;;  %v1370_v34 = vrot.slane %v967_v29, %v10313_v9  ;;  %v662_v12 = vpop.permute.xlu0 %661  ;;  %v1823_v35 = vcombine.low %v1815_v2, %v1822_v26  ;;  %v10908_v29 = vld [vmem:[#allocation5] ss:$0 sm:$0xff] }
 0x217   :  { %v924_v19 = vsel %vm914_vm13, %v913_v36, %v662_v12 }
 0x218   :  { %v1377_v33 = vrot.slane %v1363_v11, %v10313_v9  ;;  %v1378_v4 = vcombine.high %v1370_v34, %v1370_v34  ;;  %9334 = vmatmul.mubr.msk.f32.gmra.mxu0 %vm1913_vm1, %v1823_v35  ;;  %v732_v10 = vpop.permute.xlu1 %731  ;;  %v1386_v14 = vrot.slane %v1370_v34, %v10313_v9 }
 0x219   :  { %9336 = vmatprep.mubr.msk.f32.mxu0 %vm12376_vm2, %v12373_v51 }
 0x21a   :  { %v694_v38 = vpop.permute.xlu0 %693  ;;  %v1379_v18 = vcombine.high %v1377_v33, %v1377_v33  ;;  %v1400_v50 = vrot.slane %v1378_v4, %v10313_v9  ;;  %v1393_v3 = vrot.slane %v1377_v33, %v10313_v9 }
 0x21b   :  { %v935_v21 = vsel %vm925_vm14, %v924_v19, %v694_v38 }
 0x21c   :  { %v804_v8 = vpop.permute.xlu1 %803  ;;  %v946_v27 = vsel %vm936_vm15, %v935_v21, %v732_v10  ;;  %v1407_v5 = vrot.slane %v1379_v18, %v10313_v9  ;;  %v1824_v15 = vcombine.low %v1386_v14, %v1400_v50  ;;  %v8734_v43 = vcombine.high %v1386_v14, %v1400_v50 }
 0x21d   :  { %v1409_v13 = vcombine.high %v1393_v3, %v1393_v3 }
 0x21e   :  { %v768_v63 = vpop.permute.xlu0 %767  ;;  %v1826_v23 = vcombine.low %v1393_v3, %v1407_v5  ;;  %v1834_v20 = vrot.slane %v1824_v15, %v10313_v9  ;;  %v1841_v55 = vrot.slane %v8734_v43, %v10313_v9 }
 0x21f   :  { %v957_v42 = vsel %vm947_vm3, %v946_v27, %v768_v63  ;;  %vm8312_vm3 = vcmask 1040384  }
 0x220   :  { %v968_v40 = vsel %vm12387_vm6, %v957_v42, %v804_v8  ;;  %v1848_v1 = vrot.slane %v1826_v23, %v10313_v9  ;;  %v1856_v47 = vcombine.low %v1834_v20, %v1841_v55 }
 0x221   :  { %v1411_v54 = vcombine.high %v968_v40, %v968_v40  ;;  %v1418_v57 = vrot.slane %v968_v40, %v10313_v9 }
 0x222   :  { %v1864_v48 = vrot.slane %v1856_v47, %v10313_v9 }
 0x223   :  { %v1425_v7 = vrot.slane %v1411_v54, %v10313_v9  ;;  %v1426_v60 = vcombine.high %v1418_v57, %v1418_v57  ;;  %v1434_v46 = vrot.slane %v1418_v57, %v10313_v9 }
 0x225   :  { %v1427_v58 = vcombine.high %v1425_v7, %v1425_v7  ;;  %v1441_v62 = vrot.slane %v1425_v7, %v10313_v9  ;;  %v1448_v37 = vrot.slane %v1426_v60, %v10313_v9  ;;  %v1456_v53 = vcombine.high %v1434_v46, %v1434_v46 }
 0x226   :  { %v1827_v17 = vcombine.low %v1409_v13, %v1434_v46 }
 0x227   :  { %v1455_v25 = vrot.slane %v1427_v58, %v10313_v9  ;;  %v1457_v61 = vcombine.high %v1441_v62, %v1441_v62  ;;  %v1458_v39 = vcombine.high %v1448_v37, %v1448_v37  ;;  %v1873_v49 = vcombine.low %v1448_v37, %v1456_v53 }
 0x228   :  { %v1855_v30 = vrot.slane %v1827_v17, %v10313_v9 }
 0x229   :  { %v1874_v59 = vcombine.low %v1458_v39, %v1441_v62  ;;  %v1875_v31 = vcombine.low %v1455_v25, %v1457_v61  ;;  %v1882_v22 = vrot.slane %v1873_v49, %v10313_v9 }
 0x22a   :  { %v1857_v6 = vcombine.low %v1848_v1, %v1855_v30 }
 0x22b   :  { %v1889_v16 = vrot.slane %v1874_v59, %v10313_v9  ;;  %v1896_v41 = vrot.slane %v1875_v31, %v10313_v9 }
 0x22c   :  { %v1871_v0 = vrot.slane %v1857_v6, %v10313_v9 }
 0x22d   :  { %v1897_v44 = vcombine.low %v1882_v22, %v1889_v16  ;;  %v1911_v2 = vrot.slane %v1896_v41, %v10313_v9 }
 0x22e   :  { %v1872_v32 = vcombine.low %v1864_v48, %v1871_v0 }
 0x22f   :  { %v1904_v52 = vrot.slane %v1897_v44, %v10313_v9 }
 0x230   :  { %9337 = vmatmul.mubr.msk.f32.gmra.mxu0 %vm1913_vm1, %v1872_v32 }
 0x231   :  { %9339 = vmatprep.mubr.msk.f32.mxu0 %vm12376_vm2, %v12373_v51  ;;  %v1912_v26 = vcombine.low %v1904_v52, %v1911_v2 }
 0x234   :  { %9340 = vmatmul.mubr.msk.f32.gmra.mxu0 %vm1913_vm1, %v1912_v26 }
 0x23c   :  { %v1998_v28 = vpop.f32.mrf.mxu0 }
 0x23d   :  { %v1999_v11 = vadd.f32 %v10908_v29, %v1998_v28 }
 0x23e   :  { %v9317_v34 = vpop.f32.mrf.mxu0 }
 0x23f   :  { %v2042_v12 = vmax.f32 %v1999_v11, 0.0 }
 0x241   :  { %v2067_v35 = vrot.slane %v2042_v12, %v10313_v9  ;;  %v2060_v45 = vcombine.high %v2042_v12, %v2042_v12 }
 0x243   :  { %v2075_v24 = vcombine.high %v2067_v35, %v2067_v35  ;;  %v2074_v33 = vrot.slane %v2060_v45, %v10313_v9  ;;  %v2083_v10 = vrot.slane %v2067_v35, %v10313_v9 }
 0x245   :  { %v2097_v4 = vrot.slane %v2075_v24, %v10313_v9  ;;  %v2076_v19 = vcombine.high %v2074_v33, %v2074_v33  ;;  %v10917_v50 = vrot.slane %v2074_v33, %v10313_v9  ;;  %v2105_v8 = vcombine.high %v2083_v10, %v2083_v10 }
 0x247   :  { %v2107_v38 = vcombine.high %v2097_v4, %v2097_v4  ;;  %v10920_v27 = vrot.slane %v2076_v19, %v10313_v9  ;;  %v2499_v5 = vcombine.low %v2083_v10, %v2097_v4  ;;  %v8744_v15 = vcombine.high %v2083_v10, %v2097_v4 }
 0x248   :  { %v2733_v43 = vcombine.low %v2097_v4, %v2105_v8  ;;  %v2106_v30 = vcombine.high %v10917_v50, %v10917_v50 }
 0x249   :  { %v2734_v63 = vcombine.low %v2107_v38, %v10917_v50  ;;  %v2108_v7 = vcombine.high %v10920_v27, %v10920_v27  ;;  %v2967_v46 = vcombine.low %v10917_v50, %v10920_v27  ;;  %v2507_v58 = vrot.slane %v2499_v5, %v10313_v9 }
 0x24a   :  { %v2003_v36 = vpop.f32.mrf.mxu0  ;;  %v2514_v62 = vrot.slane %v8744_v15, %v10313_v9  ;;  %v2741_v37 = vrot.slane %v2733_v43, %v10313_v9  ;;  %v2981_v38 = vrot.slane %v2106_v30, %v10313_v9 }
 0x24b   :  { %v2004_v21 = vadd.f32 %v10908_v29, %v2003_v36  ;;  %v2748_v60 = vrot.slane %v2734_v63, %v10313_v9  ;;  %v2974_v49 = vrot.slane %v2967_v46, %v10313_v9  ;;  %v2521_v36 = vrot.slane %v10917_v50, %v10313_v9 }
 0x24c   :  { %v9320_v18 = vpop.f32.mrf.mxu0  ;;  %v2522_v0 = vcombine.low %v2507_v58, %v2514_v62 }
 0x24d   :  { %v2043_v14 = vmax.f32 %v2004_v21, 0.0  ;;  %v2756_v59 = vcombine.low %v2741_v37, %v2748_v60  ;;  %v2982_v26 = vcombine.low %v2514_v62, %v2974_v49 }
 0x24e   :  { %v2529_v19 = vrot.slane %v2522_v0, %v10313_v9 }
 0x24f   :  { %v2109_v3 = vcombine.high %v2043_v14, %v2043_v14  ;;  %v2116_v42 = vrot.slane %v2043_v14, %v10313_v9  ;;  %v2763_v12 = vrot.slane %v2756_v59, %v10313_v9  ;;  %v2989_v50 = vrot.slane %v2982_v26, %v10313_v9 }
 0x251   :  { %v2123_v40 = vrot.slane %v2109_v3, %v10313_v9  ;;  %v2124_v54 = vcombine.high %v2116_v42, %v2116_v42  ;;  %v2132_v57 = vrot.slane %v2116_v42, %v10313_v9  ;;  %v2755_v3 = vrot.slane %v10920_v27, %v10313_v9 }
 0x252   :  { %v8756_v5 = vcombine.low %v2529_v19, %v2763_v12 }
 0x253   :  { %v2125_v23 = vcombine.high %v2123_v40, %v2123_v40  ;;  %v10932_v20 = vrot.slane %v2123_v40, %v10313_v9  ;;  %v2146_v55 = vrot.slane %v2124_v54, %v10313_v9  ;;  %v2154_v13 = vcombine.high %v2132_v57, %v2132_v57 }
 0x254   :  { %v2538_v53 = vcombine.low %v2108_v7, %v2132_v57  ;;  %v2996_v7 = vrot.slane %v2981_v38, %v10313_v9  ;;  %v3603_v62 = vrot.slane %v8756_v5, %v10313_v9 }
 0x255   :  { %v2153_v17 = vrot.slane %v2125_v23, %v10313_v9  ;;  %v2156_v25 = vcombine.high %v2146_v55, %v2146_v55  ;;  %v2539_v61 = vcombine.low %v2146_v55, %v2154_v13  ;;  %v2772_v39 = vcombine.low %v2132_v57, %v2146_v55 }
 0x256   :  { %v8747_v1 = vcombine.high %v2132_v57, %v2146_v55  ;;  %v2794_v47 = vrot.slane %v10932_v20, %v10313_v9  ;;  %v2546_v22 = vrot.slane %v2538_v53, %v10313_v9  ;;  %v2770_v13 = vrot.slane %v2755_v3, %v10313_v9 }
 0x257   :  { %v2553_v31 = vrot.slane %v2539_v61, %v10313_v9  ;;  %v2560_v6 = vrot.slane %v2156_v25, %v10313_v9  ;;  %v2780_v16 = vrot.slane %v2772_v39, %v10313_v9  ;;  %v2998_v48 = vcombine.low %v2156_v25, %v10932_v20 }
 0x258   :  { %v2787_v41 = vrot.slane %v8747_v1, %v10313_v9  ;;  %v10954_v32 = vrot.slane %v2794_v47, %v10313_v9  ;;  %v3012_v52 = vrot.slane %v2153_v17, %v10313_v9  ;;  %v8745_v15 = vcombine.high %v10932_v20, %v2153_v17 }
 0x259   :  { %v10951_v44 = vrot.slane %v2560_v6, %v10313_v9  ;;  %v2561_v28 = vcombine.low %v2546_v22, %v2553_v31  ;;  %v3005_v11 = vrot.slane %v2998_v48, %v10313_v9  ;;  %v2157_v57 = vcombine.high %v2153_v17, %v2153_v17 }
 0x25a   :  { %v2008_v2 = vpop.f32.mrf.mxu0  ;;  %v2795_v35 = vcombine.low %v2780_v16, %v2787_v41  ;;  %v10961_v45 = vrot.slane %v3012_v52, %v10313_v9  ;;  %v2536_v20 = vrot.slane %v2521_v36, %v10313_v9  ;;  %v2585_v37 = vrot.slane %v8745_v15, %v10313_v9 }
 0x25b   :  { %v2009_v34 = vadd.f32 %v10908_v29, %v2008_v2  ;;  %v8766_v24 = vcombine.low %v10951_v44, %v10954_v32  ;;  %v3013_v4 = vcombine.low %v2553_v31, %v3005_v11  ;;  %v10976_v63 = vrot.slane %v2561_v28, %v10313_v9 }
 0x25c   :  { %v9323_v33 = vpop.f32.mrf.mxu0  ;;  %v8761_v21 = vcombine.low %v10954_v32, %v10961_v45  ;;  %v10982_v42 = vrot.slane %v2795_v35, %v10313_v9  ;;  %v8759_v61 = vcombine.low %v2996_v7, %v10951_v44 }
 0x25d   :  { %v2044_v10 = vmax.f32 %v2009_v34, 0.0  ;;  %v10972_v18 = vrot.slane %v3013_v4, %v10313_v9  ;;  %v8758_v55 = vcombine.low %v2989_v50, %v10976_v63 }
 0x25e   :  { %v8765_v44 = vcombine.low %v10976_v63, %v10982_v42 }
 0x25f   :  { %v2158_v8 = vcombine.high %v2044_v10, %v2044_v10  ;;  %v2165_v14 = vrot.slane %v2044_v10, %v10313_v9  ;;  %v8760_v60 = vcombine.low %v10982_v42, %v10972_v18  ;;  %v3617_v22 = vrot.slane %v8758_v55, %v10313_v9 }
 0x261   :  { %v2172_v43 = vrot.slane %v2158_v8, %v10313_v9  ;;  %v2173_v40 = vcombine.high %v2165_v14, %v2165_v14  ;;  %v2181_v54 = vrot.slane %v2165_v14, %v10313_v9  ;;  %v8757_v8 = vcombine.low %v2536_v20, %v2770_v13  ;;  %v4652_v13 = vld [vmem:[#allocation7 + $0x4f8] sm:$0xff] }
 0x262   :  { %v3653_v50 = vcombine.low %v3603_v62, %v3617_v22  ;;  %v3654_v5 = vcombine.high %v3603_v62, %v3617_v22  ;;  %5720 = vmatprep.subr.mxu1 %v4652_v13  ;;  %v3638_v13 = vrot.slane %v8761_v21, %v10313_v9 }
 0x263   :  { %v10991_v27 = vrot.slane %v2172_v43, %v10313_v9  ;;  %v2195_v46 = vrot.slane %v2173_v40, %v10313_v9  ;;  %v2203_v23 = vcombine.high %v2181_v54, %v2181_v54  ;;  %v2811_v58 = vcombine.low %v2157_v57, %v2181_v54 }
 0x264   :  { %v2174_v39 = vcombine.high %v2172_v43, %v2172_v43  ;;  %v3624_v40 = vrot.slane %v8759_v61, %v10313_v9  ;;  %v3610_v20 = vrot.slane %v8757_v8, %v10313_v9 }
 0x265   :  { %v2205_v53 = vcombine.high %v2195_v46, %v2195_v46  ;;  %v2578_v17 = vcombine.low %v2181_v54, %v2195_v46  ;;  %v2013_v25 = vpop.f32.mrf.mxu0  ;;  %v2599_v49 = vrot.slane %v2203_v23, %v10313_v9  ;;  %v2812_v1 = vcombine.low %v2195_v46, %v2203_v23 }
 0x266   :  { %v8750_v47 = vcombine.high %v2181_v54, %v2195_v46  ;;  %v3043_v31 = vrot.slane %v10991_v27, %v10313_v9  ;;  %v2819_v41 = vrot.slane %v2811_v58, %v10313_v9  ;;  %v2014_v28 = vadd.f32 %v10908_v29, %v2013_v25 }
 0x267   :  { %v2592_v30 = vrot.slane %v2578_v17, %v10313_v9  ;;  %v2833_v59 = vrot.slane %v2205_v53, %v10313_v9  ;;  %v9326_v6 = vpop.f32.mrf.mxu0  ;;  %v11007_v16 = vrot.slane %v2599_v49, %v10313_v9  ;;  %v2826_v48 = vrot.slane %v2812_v1, %v10313_v9 }
 0x268   :  { %v3036_v0 = vrot.slane %v8750_v47, %v10313_v9  ;;  %v11016_v26 = vrot.slane %v3043_v31, %v10313_v9  ;;  %v2202_v11 = vrot.slane %v2174_v39, %v10313_v9  ;;  %v2204_v33 = vcombine.high %v10991_v27, %v10991_v27 }
 0x269   :  { %v2600_v52 = vcombine.low %v2585_v37, %v2592_v30  ;;  %v11013_v2 = vrot.slane %v2833_v59, %v10313_v9  ;;  %v2834_v34 = vcombine.low %v2819_v41, %v2826_v48  ;;  %v8768_v35 = vcombine.low %v10961_v45, %v11007_v16 }
 0x26a   :  { %v3044_v12 = vcombine.low %v2592_v30, %v3036_v0  ;;  %v11028_v36 = vmax.f32 %v2014_v28, 0.0  ;;  %v8753_v43 = vcombine.high %v10991_v27, %v2202_v11  ;;  %v3153_v54 = vcombine.low %v2202_v11, %v2204_v33  ;;  %v4716_v27 = vld [vmem:[#allocation7 + $0x6f8] sm:$0xff] }
 0x26b   :  { %v8763_v4 = vcombine.low %v11007_v16, %v11013_v2  ;;  %v8770_v10 = vcombine.low %v11013_v2, %v11016_v26  ;;  %v11031_v19 = vrot.slane %v2834_v34, %v10313_v9  ;;  %v11039_v3 = vrot.slane %v2600_v52, %v10313_v9  ;;  %5809 = vmatprep.subr.mxu0 %v4716_v27  ;;  %v4650_v2 = vld [vmem:[#allocation7 + $0x4e8] sm:$0xff] }
 0x26c   :  { %v11034_v38 = vrot.slane %v3044_v12, %v10313_v9  ;;  %v2214_v14 = vrot.slane %v11028_v36, %v10313_v9  ;;  %v11052_v23 = vrot.slane %v8766_v24, %v10313_v9  ;;  %v2206_v55 = vcombine.high %v2202_v11, %v2202_v11 }
 0x26d   :  { %v8762_v46 = vcombine.low %v11039_v3, %v11031_v19  ;;  %v3665_v37 = vrot.slane %v3653_v50, %v10313_v9  ;;  %v3679_v53 = vrot.slane %v3654_v5, %v10313_v9  ;;  %v3239_v17 = vrot.slane %v8753_v43, %v10313_v9 }
 0x26e   :  { %v3059_v15 = vcombine.low %v11034_v38, %v11016_v26  ;;  %v2222_v57 = vcombine.high %v2214_v14, %v2214_v14  ;;  %v2230_v7 = vrot.slane %v2214_v14, %v10313_v9  ;;  %v3655_v61 = vcombine.low %v3610_v20, %v3624_v40 }
 0x26f   :  { %v3161_v39 = vrot.slane %v3153_v54, %v10313_v9  ;;  %v8767_v1 = vcombine.low %v10972_v18, %v11039_v3  ;;  %v8806_v63 = vcombine.low %v3665_v37, %v3679_v53  ;;  %v8808_v41 = vcombine.high %v3665_v37, %v3679_v53 }
 0x270   :  { %v2244_v58 = vrot.slane %v2222_v57, %v10313_v9  ;;  %v2252_v62 = vcombine.high %v2230_v7, %v2230_v7  ;;  %v3154_v25 = vcombine.low %v2206_v55, %v2230_v7  ;;  %v8764_v11 = vcombine.low %v11016_v26, %v11016_v26 }
 0x271   :  { %v3759_v12 = vrot.slane %v8765_v44, %v10313_v9  ;;  %v3773_v33 = vrot.slane %v8767_v1, %v10313_v9  ;;  %v8769_v40 = vcombine.low %v11031_v19, %v11034_v38  ;;  %v11089_v54 = vrot.slane %v8806_v63, %v10313_v9 }
 0x272   :  { %v2254_v24 = vcombine.high %v2244_v58, %v2244_v58  ;;  %v3175_v49 = vrot.slane %v2244_v58, %v10313_v9  ;;  %v3168_v47 = vrot.slane %v3154_v25, %v10313_v9  ;;  %v3232_v30 = vcombine.low %v2230_v7, %v2244_v58 }
 0x273   :  { %v3253_v59 = vrot.slane %v2252_v62, %v10313_v9  ;;  %v3309_v31 = vcombine.low %v2244_v58, %v2252_v62  ;;  %v11099_v20 = vrot.slane %v8808_v41, %v10313_v9  ;;  %v3672_v19 = vrot.slane %v3655_v61, %v10313_v9 }
 0x274   :  { %v3190_v6 = vrot.slane %v3175_v49, %v10313_v9  ;;  %v3323_v22 = vrot.slane %v2254_v24, %v10313_v9  ;;  %v3176_v48 = vcombine.low %v3161_v39, %v3168_v47  ;;  %v3246_v0 = vrot.slane %v3232_v30, %v10313_v9 }
 0x275   :  { %v11071_v52 = vrot.slane %v3253_v59, %v10313_v9  ;;  %v3316_v28 = vrot.slane %v3309_v31, %v10313_v9  ;;  %v3809_v27 = vcombine.low %v3759_v12, %v3773_v33  ;;  %v3810_v58 = vcombine.high %v3759_v12, %v3773_v33 }
 0x276   :  { %v11077_v34 = vrot.slane %v3323_v22, %v10313_v9  ;;  %v3183_v8 = vrot.slane %v3176_v48, %v10313_v9  ;;  %v3254_v14 = vcombine.low %v3239_v17, %v3246_v0  ;;  %v8775_v5 = vcombine.low %v11016_v26, %v3190_v6  ;;  %v4714_v26 = vld [vmem:[#allocation7 + $0x6e8] sm:$0xff] }
 0x277   :  { %v3324_v3 = vcombine.low %v3168_v47, %v3316_v28  ;;  %v8772_v50 = vcombine.low %v3190_v6, %v11071_v52  ;;  %v3631_v53 = vrot.slane %v8760_v60, %v10313_v9  ;;  %v11116_v32 = vrot.slane %v3059_v15, %v10313_v9 }
 0x278   :  { %v8777_v43 = vcombine.low %v11071_v52, %v11077_v34  ;;  %v11092_v57 = vrot.slane %v3254_v14, %v10313_v9  ;;  %v8774_v55 = vcombine.low %v11034_v38, %v3183_v8  ;;  %v11119_v21 = vrot.slane %v8764_v11, %v10313_v9  ;;  %v4678_v52 = vld [vmem:[#allocation7 + $0x5c8] sm:$0xff] }
 0x279   :  { %v11095_v7 = vrot.slane %v3324_v3, %v10313_v9  ;;  %v3787_v17 = vrot.slane %v8769_v40, %v10313_v9  ;;  %v3821_v25 = vrot.slane %v3809_v27, %v10313_v9  ;;  %v11124_v61 = vrot.slane %v8772_v50, %v10313_v9 }
 0x27a   :  { %v8771_v37 = vcombine.low %v3183_v8, %v11092_v57  ;;  %v3645_v44 = vrot.slane %v8762_v46, %v10313_v9  ;;  %v4858_v18 = vcombine.high %v11089_v54, %v11099_v20  ;;  %v3835_v42 = vrot.slane %v3810_v58, %v10313_v9 }
 0x27b   :  { %v3339_v62 = vcombine.low %v11095_v7, %v11077_v34  ;;  %v8776_v38 = vcombine.low %v11092_v57, %v11095_v7  ;;  %v4857_v60 = vcombine.low %v11089_v54, %v11099_v20  ;;  %v3780_v15 = vrot.slane %v8768_v35, %v10313_v9  ;;  %v4673_v7 = vld [vmem:[#allocation7 + $0x5a0] sm:$0xff] }
 0x27c   :  { %v3801_v24 = vrot.slane %v8771_v37, %v10313_v9  ;;  %v3913_v39 = vrot.slane %v8774_v55, %v10313_v9  ;;  %v11145_v1 = vrot.slane %v8763_v4, %v10313_v9  ;;  %v8810_v30 = vcombine.low %v3672_v19, %v3821_v25 }
 0x27d   :  { %v11139_v49 = vrot.slane %v3339_v62, %v10313_v9  ;;  %v3811_v59 = vcombine.low %v11052_v23, %v3780_v15  ;;  %v11149_v31 = vrot.slane %v8775_v5, %v10313_v9  ;;  %v3656_v63 = vcombine.low %v3631_v53, %v3645_v44 }
 0x27e   :  { %v3812_v46 = vcombine.low %v3787_v17, %v3801_v24  ;;  %v3813_v47 = vcombine.high %v3787_v17, %v3801_v24  ;;  %v3949_v45 = vcombine.low %v3645_v44, %v3913_v39  ;;  %v3950_v22 = vcombine.high %v3645_v44, %v3913_v39 }
 0x27f   :  { %v11156_v41 = vrot.slane %v3811_v59, %v10313_v9  ;;  %v3951_v16 = vcombine.low %v11145_v1, %v11149_v31  ;;  %v3657_v23 = vcombine.high %v3631_v53, %v3645_v44  ;;  %v3658_v11 = vcombine.low %v3638_v13, %v11145_v1 }
 0x280   :  { %v3842_v35 = vrot.slane %v3812_v46, %v10313_v9  ;;  %v11153_v6 = vrot.slane %v3813_v47, %v10313_v9  ;;  %v11161_v4 = vrot.slane %v3949_v45, %v10313_v9  ;;  %v11165_v28 = vrot.slane %v3950_v22, %v10313_v9 }
 0x281   :  { %v4885_v12 = vrot.slane %v4858_v18, %v10313_v9  ;;  %v3686_v33 = vrot.slane %v3656_v63, %v10313_v9  ;;  %v3700_v8 = vrot.slane %v3657_v23, %v10313_v9  ;;  %v3693_v54 = vrot.slane %v3658_v11, %v10313_v9 }
 0x282   :  { %v3858_v48 = vcombine.high %v3821_v25, %v3842_v35  ;;  %v3861_v0 = vcombine.high %v3835_v42, %v11153_v6  ;;  %v3860_v14 = vcombine.low %v3835_v42, %v11153_v6  ;;  %v8817_v5 = vcombine.low %v11161_v4, %v11165_v28 }
 0x283   :  { %v8819_v40 = vcombine.high %v11161_v4, %v11165_v28  ;;  %v8807_v55 = vcombine.low %v3686_v33, %v3700_v8  ;;  %v8809_v20 = vcombine.high %v3686_v33, %v3700_v8  ;;  %v4835_v19 = vrot.slane %v8810_v30, %v10313_v9  ;;  %v4651_v8 = vld [vmem:[#allocation7 + $0x4f0] sm:$0xff] }
 0x284   :  { %v8812_v3 = vcombine.low %v3835_v42, %v3858_v48  ;;  %v8815_v50 = vcombine.low %v3861_v0, %v11156_v41  ;;  %v8813_v13 = vcombine.high %v3860_v14, %v3842_v35  ;;  %v11184_v62 = vrot.slane %v8817_v5, %v10313_v9 }
 0x285   :  { %v8811_v37 = vcombine.low %v3693_v54, %v3842_v35  ;;  %v4814_v53 = vrot.slane %v8807_v55, %v10313_v9  ;;  %v4828_v17 = vrot.slane %v8809_v20, %v10313_v9  ;;  %v4871_v15 = vrot.slane %v4857_v60, %v10313_v9  ;;  %v4649_v55 = vld [vmem:[#allocation7 + $0x4e0] sm:$0xff] }
 0x286   :  { %v4849_v27 = vrot.slane %v8812_v3, %v10313_v9  ;;  %v11181_v58 = vrot.slane %v8815_v50, %v10313_v9  ;;  %v4856_v25 = vrot.slane %v8813_v13, %v10313_v9  ;;  %v3877_v30 = vcombine.high %v11139_v49, %v11139_v49  ;;  %v4713_v20 = vld [vmem:[#allocation7 + $0x6e0] sm:$0xff] }
 0x287   :  { %v4842_v39 = vrot.slane %v8811_v37, %v10313_v9  ;;  %v4859_v46 = vcombine.low %v4814_v53, %v4828_v17  ;;  %v4860_v47 = vcombine.high %v4814_v53, %v4828_v17  ;;  %v3884_v59 = vrot.slane %v11139_v49, %v10313_v9  ;;  %v4715_v49 = vld [vmem:[#allocation7 + $0x6f0] sm:$0xff] }
 0x288   :  { %v4862_v44 = vcombine.high %v4835_v19, %v4849_v27  ;;  %v4861_v24 = vcombine.low %v4835_v19, %v4849_v27  ;;  %v5043_v18 = vcombine.high %v11181_v58, %v11184_v62  ;;  %v5042_v42 = vcombine.low %v11181_v58, %v11184_v62  ;;  %v4648_v27 = vld [vmem:[#allocation7 + $0x4d8] sm:$0xff]  ;;  %v4647_v17 = vld [vmem:[#allocation7 + $0x4d0] sm:$0xff] }
 0x289   :  { %v4863_v22 = vcombine.low %v4842_v39, %v4856_v25  ;;  %v4864_v63 = vcombine.high %v4842_v39, %v4856_v25  ;;  %v11202_v23 = vrot.slane %v4860_v47, %v10313_v9  ;;  %v3794_v60 = vrot.slane %v8770_v10, %v10313_v9  ;;  %v4711_v25 = vld [vmem:[#allocation7 + $0x6d0] sm:$0xff]  ;;  %v4646_v39 = vld [vmem:[#allocation7 + $0x4c8] sm:$0xff] }
 0x28a   :  { %v4913_v45 = vrot.slane %v4862_v44, %v10313_v9  ;;  %v4899_v35 = vrot.slane %v4861_v24, %v10313_v9  ;;  %v11212_v3 = vrot.slane %v4859_v46, %v10313_v9  ;;  %v3721_v10 = vcombine.high %v11116_v32, %v11116_v32  ;;  %v4710_v46 = vld [vmem:[#allocation7 + $0x6c8] sm:$0xff] }
 0x28b   :  { %v11209_v14 = vrot.slane %v4864_v63, %v10313_v9  ;;  %v11215_v50 = vrot.slane %v4863_v22, %v10313_v9  ;;  %v3814_v5 = vcombine.low %v3794_v60, %v11124_v61  ;;  %v3735_v54 = vrot.slane %v11119_v21, %v10313_v9  ;;  %v4645_v22 = vld [vmem:[#allocation7 + $0x4c0] sm:$0xff] }
 0x28c   :  { %v4925_v48 = vcombine.low %v4885_v12, %v4913_v45  ;;  %v4926_v0 = vcombine.high %v4885_v12, %v4913_v45  ;;  %v4921_v11 = vcombine.low %v4871_v15, %v4899_v35  ;;  %v4922_v33 = vcombine.high %v4871_v15, %v4899_v35  ;;  %v4709_v63 = vld [vmem:[#allocation7 + $0x6c0] sm:$0xff] }
 0x28d   :  { %v3728_v12 = vrot.slane %v11116_v32, %v10313_v9  ;;  %v4927_v61 = vcombine.low %v11202_v23, %v11209_v14  ;;  %v4712_v32 = vld [vmem:[#allocation7 + $0x6d8] sm:$0xff]  ;;  %v3849_v37 = vrot.slane %v3814_v5, %v10313_v9  ;;  %v3742_v53 = vrot.slane %v3721_v10, %v10313_v9  ;;  %v4642_v10 = vld [vmem:[#allocation7 + $0x4a8] sm:$0xff] }
 0x28e   :  { %5606 = vmatprep.mubr.f32.mxu1 %v4925_v48  ;;  %5695 = vmatprep.mubr.f32.mxu0 %v4926_v0  ;;  %v3898_v44 = vrot.slane %v3877_v30, %v10313_v9  ;;  %v3899_v24 = vcombine.high %v3884_v59, %v3884_v59  ;;  %v4931_v15 = vcombine.low %v3735_v54, %v3884_v59  ;;  %v4644_v59 = vld [vmem:[#allocation7 + $0x4b8] sm:$0xff] }
 0x28f   :  { %5607 = vmatmul.mubr.f32.vlgmr.msra.gmra.mxu1 %v4921_v11  ;;  %5696 = vmatmul.mubr.f32.vlgmr.msra.gmra.mxu0 %v4922_v33  ;;  %v3859_v47 = vcombine.low %v11156_v41, %v3849_v37  ;;  %v4929_v45 = vcombine.low %v3728_v12, %v3742_v53  ;;  %v8814_v35 = vcombine.high %v3728_v12, %v3742_v53  ;;  %v4708_v0 = vld [vmem:[#allocation7 + $0x6b8] sm:$0xff]  ;;  %v4706_v12 = vld [vmem:[#allocation7 + $0x6a8] sm:$0xff] }
 0x290   :  { %5721 = vmatpush1.msra.mxu1 %v4651_v8  ;;  %5810 = vmatpush1.msra.mxu0 %v4715_v49  ;;  %v4932_v60 = vcombine.low %v3898_v44, %v3899_v24  ;;  %v4953_v48 = vrot.slane %v4931_v15, %v10313_v9  ;;  %v8773_v30 = vcombine.low %v11077_v34, %v11077_v34  ;;  %v4643_v8 = vld [vmem:[#allocation7 + $0x4b0] sm:$0xff]  ;;  %v4640_v37 = vld [vmem:[#allocation7 + $0x498] sm:$0xff]  ;;  %v4638_v15 = vld [vmem:[#allocation7 + $0x488] sm:$0xff] }
 0x291   :  { %5722 = vmatprep.subr.mxu1 %v4650_v2  ;;  %5811 = vmatprep.subr.mxu0 %v4714_v26  ;;  %v11240_v11 = vcombine.high %v11153_v6, %v3859_v47  ;;  %v4939_v41 = vrot.slane %v4929_v45, %v10313_v9  ;;  %v4946_v33 = vrot.slane %v8814_v35, %v10313_v9  ;;  %v4707_v49 = vld [vmem:[#allocation7 + $0x6b0] sm:$0xff]  ;;  %v4704_v53 = vld [vmem:[#allocation7 + $0x698] sm:$0xff]  ;;  %v4637_v47 = vld [vmem:[#allocation7 + $0x480] sm:$0xff] }
 0x292   :  { %5723 = vmatpush1.msra.mxu1 %v4649_v55  ;;  %5812 = vmatpush1.msra.mxu0 %v4713_v20  ;;  %v4960_v5 = vrot.slane %v4932_v60, %v10313_v9  ;;  %v3876_v2 = vrot.slane %v8773_v30, %v10313_v9  ;;  %v3900_v26 = vcombine.high %v3898_v44, %v3898_v44  ;;  %v4641_v55 = vld [vmem:[#allocation7 + $0x4a0] sm:$0xff]  ;;  %v4635_v60 = vld [vmem:[#allocation7 + $0x470] sm:$0xff]  ;;  %v4634_v30 = vld [vmem:[#allocation7 + $0x468] sm:$0xff] }
 0x293   :  { %5724 = vmatprep.subr.mxu1 %v4648_v27  ;;  %5813 = vmatprep.subr.mxu0 %v4712_v32  ;;  %v4961_v54 = vcombine.low %v4939_v41, %v4946_v33  ;;  %v2207_v6 = vcombine.high %v11028_v36, %v11028_v36  ;;  %v4705_v20 = vld [vmem:[#allocation7 + $0x6a0] sm:$0xff]  ;;  %v4743_v34 = vld [vmem:[#allocation7 + $0x7d0] sm:$0xff] }
 0x294   :  { %5725 = vmatpush1.msra.mxu1 %v4647_v17  ;;  %5814 = vmatpush1.msra.mxu0 %v4711_v25  ;;  %v4962_v27 = vcombine.low %v4953_v48, %v4960_v5  ;;  %v3891_v32 = vrot.slane %v3876_v2, %v10313_v9  ;;  %v4639_v17 = vld [vmem:[#allocation7 + $0x490] sm:$0xff]  ;;  %v4701_v45 = vld [vmem:[#allocation7 + $0x680] sm:$0xff] }
 0x295   :  { %5726 = vmatprep.subr.mxu1 %v4646_v39  ;;  %5815 = vmatprep.subr.mxu0 %v4710_v46  ;;  %v4703_v25 = vld [vmem:[#allocation7 + $0x690] sm:$0xff]  ;;  %v4969_v44 = vrot.slane %v4961_v54, %v10313_v9  ;;  %v4702_v39 = vld [vmem:[#allocation7 + $0x688] sm:$0xff]  ;;  %v2221_v46 = vrot.slane %v2207_v6, %v10313_v9  ;;  %v4633_v41 = vld [vmem:[#allocation7 + $0x460] sm:$0xff] }
 0x296   :  { %5727 = vmatpush1.msra.mxu1 %v4645_v22  ;;  %5816 = vmatpush1.msra.mxu0 %v4709_v63  ;;  %v4976_v24 = vrot.slane %v4962_v27, %v10313_v9  ;;  %v11251_v36 = vcombine.low %v3900_v26, %v3891_v32  ;;  %v4636_v22 = vld [vmem:[#allocation7 + $0x478] sm:$0xff]  ;;  %v4699_v48 = vld [vmem:[#allocation7 + $0x670] sm:$0xff]  ;;  %v4697_v33 = vld [vmem:[#allocation7 + $0x660] sm:$0xff] }
 0x297   :  { %5728 = vmatprep.subr.mxu1 %v4644_v59  ;;  %5817 = vmatprep.subr.mxu0 %v4708_v0  ;;  %v4700_v63 = vld [vmem:[#allocation7 + $0x678] sm:$0xff]  ;;  %v4698_v59 = vld [vmem:[#allocation7 + $0x668] sm:$0xff]  ;;  %v2223_v0 = vcombine.high %v2221_v46, %v2221_v46  ;;  %v4631_v5 = vld [vmem:[#allocation7 + $0x450] sm:$0xff]  ;;  %v2237_v26 = vrot.slane %v2221_v46, %v10313_v9 }
 0x298   :  { %5729 = vmatpush1.msra.mxu1 %v4643_v8  ;;  %5818 = vmatpush1.msra.mxu0 %v4707_v49  ;;  %v11254_v35 = vcombine.low %v4969_v44, %v4976_v24  ;;  %v4632_v8 = vld [vmem:[#allocation7 + $0x458] sm:$0xff]  ;;  %v4695_v2 = vld [vmem:[#allocation7 + $0x650] sm:$0xff]  ;;  %v4694_v54 = vld [vmem:[#allocation7 + $0x648] sm:$0xff] }
 0x299   :  { %5730 = vmatprep.subr.mxu1 %v4642_v10  ;;  %5819 = vmatprep.subr.mxu0 %v4706_v12  ;;  %v4696_v49 = vld [vmem:[#allocation7 + $0x658] sm:$0xff]  ;;  %v4630_v12 = vld [vmem:[#allocation7 + $0x448] sm:$0xff]  ;;  %v2251_v6 = vrot.slane %v2223_v0, %v10313_v9  ;;  %v4693_v27 = vld [vmem:[#allocation7 + $0x640] sm:$0xff]  ;;  %v2253_v24 = vcombine.high %v2237_v26, %v2237_v26 }
 0x29a   :  { %5731 = vmatpush1.msra.mxu1 %v4641_v55  ;;  %5820 = vmatpush1.msra.mxu0 %v4705_v20  ;;  %v4629_v20 = vld [vmem:[#allocation7 + $0x440] sm:$0xff]  ;;  %v4691_v44 = vld [vmem:[#allocation7 + $0x630] sm:$0xff] }
 0x29b   :  { %5732 = vmatprep.subr.mxu1 %v4640_v37  ;;  %5821 = vmatprep.subr.mxu0 %v4704_v53  ;;  %v4628_v37 = vld [vmem:[#allocation7 + $0x438] sm:$0xff]  ;;  %v8754_v46 = vcombine.high %v2237_v26, %v2251_v6  ;;  %v3449_v0 = vcombine.low %v2251_v6, %v2253_v24  ;;  %v4685_v24 = vld [vmem:[#allocation7 + $0x600] sm:$0xff] }
 0x29c   :  { %5733 = vmatpush1.msra.mxu1 %v4639_v17  ;;  %5822 = vmatpush1.msra.mxu0 %v4703_v25  ;;  %v4692_v53 = vld [vmem:[#allocation7 + $0x638] sm:$0xff]  ;;  %v4627_v25 = vld [vmem:[#allocation7 + $0x430] sm:$0xff] }
 0x29d   :  { %5734 = vmatprep.subr.mxu1 %v4638_v15  ;;  %5823 = vmatprep.subr.mxu0 %v4702_v39  ;;  %v4626_v15 = vld [vmem:[#allocation7 + $0x428] sm:$0xff]  ;;  %v3371_v39 = vcombine.low %v2237_v26, %v2251_v6 }
 0x29e   :  { %5735 = vmatpush1.msra.mxu1 %v4637_v47  ;;  %5824 = vmatpush1.msra.mxu0 %v4701_v45  ;;  %v4625_v45 = vld [vmem:[#allocation7 + $0x420] sm:$0xff] }
 0x29f   :  { %5736 = vmatprep.subr.mxu1 %v4636_v22  ;;  %5825 = vmatprep.subr.mxu0 %v4700_v63  ;;  %v4689_v22 = vld [vmem:[#allocation7 + $0x620] sm:$0xff]  ;;  %v4624_v63 = vld [vmem:[#allocation7 + $0x418] sm:$0xff] }
 0x2a0   :  { %5737 = vmatpush1.msra.mxu1 %v4635_v60  ;;  %5826 = vmatpush1.msra.mxu0 %v4699_v48 }
 0x2a1   :  { %5738 = vmatprep.subr.mxu1 %v4634_v30  ;;  %5827 = vmatprep.subr.mxu0 %v4698_v59  ;;  %v4623_v30 = vld [vmem:[#allocation7 + $0x410] sm:$0xff]  ;;  %v4688_v59 = vld [vmem:[#allocation7 + $0x618] sm:$0xff] }
 0x2a2   :  { %5739 = vmatpush1.msra.mxu1 %v4633_v41  ;;  %5828 = vmatpush1.msra.mxu0 %v4697_v33  ;;  %v2255_v41 = vcombine.high %v2251_v6, %v2251_v6  ;;  %v4622_v33 = vld [vmem:[#allocation7 + $0x408] sm:$0xff] }
 0x2a3   :  { %5740 = vmatprep.subr.mxu1 %v4632_v8  ;;  %5829 = vmatprep.subr.mxu0 %v4696_v49  ;;  %v3379_v8 = vrot.slane %v3371_v39, %v10313_v9  ;;  %v3386_v49 = vrot.slane %v8754_v46, %v10313_v9 }
 0x2a4   :  { %v2018_v10 = vpop.f32.mrf.mxu0  ;;  %5741 = vmatpush1.msra.mxu1 %v4631_v5  ;;  %5830 = vmatpush1.msra.mxu0 %v4695_v2  ;;  %v4687_v2 = vld [vmem:[#allocation7 + $0x610] sm:$0xff] }
 0x2a5   :  { %v2019_v55 = vadd.f32 %v10908_v29, %v2018_v10  ;;  %5742 = vmatprep.subr.mxu1 %v4630_v12  ;;  %5831 = vmatprep.subr.mxu0 %v4694_v54  ;;  %v4690_v29 = vld [vmem:[#allocation7 + $0x628] sm:$0xff]  ;;  %v4621_v54 = vld [vmem:[#allocation7 + $0x400] sm:$0xff] }
 0x2a6   :  { %v9329_v32 = vpop.f32.mrf.mxu0  ;;  %5743 = vmatpush1.msra.mxu1 %v4629_v20  ;;  %5832 = vmatpush1.msra.mxu0 %v4693_v27  ;;  %v3457_v20 = vrot.slane %v3449_v0, %v10313_v9  ;;  %v4746_v0 = vld [vmem:[#allocation7 + $0x7e8] sm:$0xff] }
 0x2a7   :  { %v11259_v17 = vmax.f32 %v2019_v55, 0.0  ;;  %5744 = vmatprep.subr.mxu1 %v4628_v37  ;;  %5833 = vmatprep.subr.mxu0 %v4692_v53  ;;  %v4686_v55 = vld [vmem:[#allocation7 + $0x608] sm:$0xff]  ;;  %v4684_v53 = vld [vmem:[#allocation7 + $0x5f8] sm:$0xff] }
 0x2a8   :  { %5745 = vmatpush1.msra.mxu1 %v4627_v25  ;;  %5834 = vmatpush1.msra.mxu0 %v4691_v44  ;;  %v3394_v25 = vcombine.low %v3379_v8, %v3386_v49  ;;  %v4680_v8 = vld [vmem:[#allocation7 + $0x5d8] sm:$0xff] }
 0x2a9   :  { %v2263_v47 = vrot.slane %v11259_v17, %v10313_v9  ;;  %5746 = vmatprep.subr.mxu1 %v4626_v15  ;;  %5835 = vmatprep.subr.mxu0 %v4690_v29  ;;  %v2256_v27 = vcombine.high %v11259_v17, %v11259_v17  ;;  %v4683_v17 = vld [vmem:[#allocation7 + $0x5f0] sm:$0xff] }
 0x2aa   :  { %5747 = vmatpush1.msra.mxu1 %v4625_v45  ;;  %5836 = vmatpush1.msra.mxu0 %v4689_v22  ;;  %v4682_v45 = vld [vmem:[#allocation7 + $0x5e8] sm:$0xff]  ;;  %v4747_v22 = vld [vmem:[#allocation7 + $0x7f0] sm:$0xff] }
 0x2ab   :  { %v2271_v60 = vcombine.high %v2263_v47, %v2263_v47  ;;  %v2279_v48 = vrot.slane %v2263_v47, %v10313_v9  ;;  %5748 = vmatprep.subr.mxu1 %v4624_v63  ;;  %5837 = vmatprep.subr.mxu0 %v4688_v59  ;;  %v4748_v47 = vld [vmem:[#allocation7 + $0x7f8] sm:$0xff]  ;;  %v2270_v63 = vrot.slane %v2256_v27, %v10313_v9  ;;  %v4681_v59 = vld [vmem:[#allocation7 + $0x5e0] sm:$0xff] }
 0x2ac   :  { %5749 = vmatpush1.msra.mxu1 %v4623_v30  ;;  %5838 = vmatpush1.msra.mxu0 %v4687_v2  ;;  %v4745_v2 = vld [vmem:[#allocation7 + $0x7e0] sm:$0xff] }
 0x2ad   :  { %v11267_v5 = vrot.slane %v2271_v60, %v10313_v9  ;;  %v2301_v26 = vcombine.high %v2279_v48, %v2279_v48  ;;  %v3393_v10 = vrot.slane %v2279_v48, %v10313_v9  ;;  %v3450_v12 = vcombine.low %v2255_v41, %v2279_v48  ;;  %5750 = vmatprep.subr.mxu1 %v4622_v33 }
 0x2ae   :  { %5751 = vmatpush1.msra.mxu1 %v4621_v54  ;;  %5839 = vmatprep.subr.mxu0 %v4686_v55  ;;  %v3401_v41 = vrot.slane %v3394_v25, %v10313_v9  ;;  %v11288_v33 = vrot.slane %v8777_v43, %v10313_v9  ;;  %v4744_v54 = vld [vmem:[#allocation7 + $0x7d8] sm:$0xff]  ;;  %v4677_v55 = vld [vmem:[#allocation7 + $0x5c0] sm:$0xff] }
 0x2af   :  { %v3471_v6 = vrot.slane %v11267_v5, %v10313_v9  ;;  %v3464_v32 = vrot.slane %v3450_v12, %v10313_v9  ;;  %v3527_v37 = vcombine.low %v2279_v48, %v11267_v5  ;;  %v3408_v44 = vrot.slane %v3393_v10, %v10313_v9  ;;  %5752 = vmatprep.subr.mxu1 %v4684_v53  ;;  %v4679_v12 = vld [vmem:[#allocation7 + $0x5d0] sm:$0xff]  ;;  %v4676_v53 = vld [vmem:[#allocation7 + $0x5b8] sm:$0xff]  ;;  %v4741_v25 = vld [vmem:[#allocation7 + $0x7c0] sm:$0xff] }
 0x2b0   :  { %v3541_v46 = vrot.slane %v2301_v26, %v10313_v9  ;;  %5840 = vmatpush1.msra.mxu0 %v4685_v24  ;;  %5753 = vmatpush2.msra.mxu1 %v4683_v17  ;;  %v4739_v17 = vld [vmem:[#allocation7 + $0x7b0] sm:$0xff]  ;;  %v2303_v57 = vcombine.high %v11267_v5, %v11267_v5 }
 0x2b1   :  { %v3472_v15 = vcombine.low %v3457_v20, %v3464_v32  ;;  %v3486_v29 = vrot.slane %v3471_v6, %v10313_v9  ;;  %v3534_v39 = vrot.slane %v3527_v37, %v10313_v9  ;;  %5841 = vmatprep.subr.mxu0 %v4748_v47  ;;  %5754 = vmatprep.subr.mxu1 %v4682_v45  ;;  %v4742_v20 = vld [vmem:[#allocation7 + $0x7c8] sm:$0xff]  ;;  %v4671_v5 = vld [vmem:[#allocation7 + $0x590] sm:$0xff] }
 0x2b2   :  { %5842 = vmatpush2.msra.mxu0 %v4747_v22  ;;  %5755 = vmatpush2.msra.mxu1 %v4681_v59  ;;  %v2272_v6 = vcombine.high %v2270_v63, %v2270_v63  ;;  %v11301_v37 = vrot.slane %v2270_v63, %v10313_v9 }
 0x2b3   :  { %v3479_v60 = vrot.slane %v3472_v15, %v10313_v9  ;;  %v3542_v48 = vcombine.low %v3386_v49, %v3534_v39  ;;  %v8779_v30 = vcombine.low %v3408_v44, %v3486_v29  ;;  %v11292_v49 = vrot.slane %v3541_v46, %v10313_v9  ;;  %5843 = vmatprep.subr.mxu0 %v4746_v0  ;;  %v4675_v15 = vld [vmem:[#allocation7 + $0x5b0] sm:$0xff]  ;;  %v4740_v29 = vld [vmem:[#allocation7 + $0x7b8] sm:$0xff]  ;;  %v4674_v46 = vld [vmem:[#allocation7 + $0x5a8] sm:$0xff] }
 0x2b4   :  { %5756 = vmatprep.subr.mxu1 %v4680_v8  ;;  %5844 = vmatpush2.msra.mxu0 %v4745_v2  ;;  %v3927_v44 = vrot.slane %v8776_v38, %v10313_v9  ;;  %v11310_v22 = vrot.slane %v2272_v6, %v10313_v9  ;;  %v4738_v38 = vld [vmem:[#allocation7 + $0x7a8] sm:$0xff] }
 0x2b5   :  { %v3549_v26 = vrot.slane %v3542_v48, %v10313_v9  ;;  %v11295_v10 = vrot.slane %v8779_v30, %v10313_v9  ;;  %v8778_v43 = vcombine.low %v3401_v41, %v3479_v60  ;;  %5757 = vmatpush2.msra.mxu1 %v4679_v12  ;;  %5845 = vmatprep.subr.mxu0 %v4744_v54  ;;  %v4672_v48 = vld [vmem:[#allocation7 + $0x598] sm:$0xff]  ;;  %v4737_v30 = vld [vmem:[#allocation7 + $0x7a0] sm:$0xff]  ;;  %v4735_v12 = vld [vmem:[#allocation7 + $0x790] sm:$0xff] }
 0x2b6   :  { %5758 = vmatprep.subr.mxu1 %v4678_v52  ;;  %5846 = vmatpush2.msra.mxu0 %v4743_v34  ;;  %v2302_v60 = vcombine.high %v11301_v37, %v11301_v37  ;;  %v4736_v41 = vld [vmem:[#allocation7 + $0x798] sm:$0xff]  ;;  %v11334_v34 = vrot.slane %v11240_v11, %v10313_v9 }
 0x2b7   :  { %v3954_v27 = vcombine.low %v11288_v33, %v11295_v10  ;;  %v3557_v32 = vcombine.low %v3549_v26, %v11292_v49  ;;  %v3941_v24 = vrot.slane %v8778_v43, %v10313_v9  ;;  %5759 = vmatpush2.msra.mxu1 %v4677_v55  ;;  %5847 = vmatprep.subr.mxu0 %v4742_v20  ;;  %v4670_v26 = vld [vmem:[#allocation7 + $0x588] sm:$0xff]  ;;  %v4669_v55 = vld [vmem:[#allocation7 + $0x580] sm:$0xff] }
 0x2b8   :  { %5760 = vmatprep.subr.mxu1 %v4676_v53  ;;  %5848 = vmatpush2.msra.mxu0 %v4741_v25  ;;  %v11337_v43 = vcombine.low %v2303_v57, %v11301_v37  ;;  %v4734_v20 = vld [vmem:[#allocation7 + $0x788] sm:$0xff]  ;;  %v5124_v53 = vrot.slane %v11251_v36, %v10313_v9  ;;  %v2617_v25 = vcombine.low %v11310_v22, %v2302_v60 }
 0x2b9   :  { %v4009_v39 = vrot.slane %v3557_v32, %v10313_v9  ;;  %v3952_v47 = vcombine.low %v3927_v44, %v3941_v24  ;;  %v3953_v45 = vcombine.high %v3927_v44, %v3941_v24  ;;  %5761 = vmatpush2.msra.mxu1 %v4675_v15  ;;  %5849 = vmatprep.subr.mxu0 %v4740_v29  ;;  %v11344_v44 = vld [vmem:[#allocation5] ss:$0 sm:$0xff]  ;;  %v4733_v15 = vld [vmem:[#allocation7 + $0x780] sm:$0xff] }
 0x2ba   :  { %5762 = vmatprep.subr.mxu1 %v4674_v46  ;;  %5850 = vmatpush2.msra.mxu0 %v4739_v17  ;;  %v4668_v24 = vld [vmem:[#allocation7 + $0x578] sm:$0xff]  ;;  %v8748_v46 = vcombine.high %v11301_v37, %v11310_v22  ;;  %v4667_v17 = vld [vmem:[#allocation7 + $0x570] sm:$0xff]  ;;  %v11465_v58 = vrot.slane %v3954_v27, %v10313_v9 }
 0x2bb   :  { %v4017_v63 = vcombine.high %v4009_v39, %v4009_v39  ;;  %v11317_v59 = vrot.slane %v3952_v47, %v10313_v9  ;;  %v11320_v0 = vrot.slane %v3953_v45, %v10313_v9  ;;  %v11323_v8 = vrot.slane %v4009_v39, %v10313_v9  ;;  %5763 = vmatpush2.msra.mxu1 %v4673_v7  ;;  %v4732_v47 = vld [vmem:[#allocation7 + $0x778] sm:$0xff]  ;;  %v4666_v7 = vld [vmem:[#allocation7 + $0x568] sm:$0xff] }
 0x2bc   :  { %5851 = vmatprep.subr.mxu0 %v4738_v38  ;;  %5764 = vmatprep.subr.mxu1 %v4672_v48  ;;  %v2850_v39 = vcombine.low %v11301_v37, %v11310_v22  ;;  %v4731_v38 = vld [vmem:[#allocation7 + $0x770] sm:$0xff]  ;;  %v4665_v37 = vld [vmem:[#allocation7 + $0x560] sm:$0xff]  ;;  %v4730_v48 = vld [vmem:[#allocation7 + $0x768] sm:$0xff] }
 0x2bd   :  { %v11326_v2 = vrot.slane %v4017_v63, %v10313_v9  ;;  %v8818_v54 = vcombine.low %v11317_v59, %v11320_v0  ;;  %v8820_v52 = vcombine.high %v11317_v59, %v11320_v0  ;;  %5852 = vmatpush2.msra.mxu0 %v4737_v30  ;;  %5765 = vmatpush2.msra.mxu1 %v4671_v5 }
 0x2be   :  { %5853 = vmatprep.subr.mxu0 %v4736_v41  ;;  %5766 = vmatprep.subr.mxu1 %v4670_v26  ;;  %v2624_v5 = vrot.slane %v11337_v43, %v10313_v9 }
 0x2bf   :  { %v5115_v32 = vcombine.low %v11323_v8, %v11326_v2  ;;  %v11348_v29 = vrot.slane %v8818_v54, %v10313_v9  ;;  %5854 = vmatpush2.msra.mxu0 %v4735_v12  ;;  %5767 = vmatpush2.msra.mxu1 %v4669_v55  ;;  %v4664_v12 = vld [vmem:[#allocation7 + $0x558] sm:$0xff]  ;;  %v4729_v54 = vld [vmem:[#allocation7 + $0x760] sm:$0xff]  ;;  %v2865_v55 = vrot.slane %v8748_v46, %v10313_v9 }
 0x2c0   :  { %v2023_v6 = vpop.f32.mrf.mxu0  ;;  %5855 = vmatprep.subr.mxu0 %v4734_v20  ;;  %5768 = vmatprep.subr.mxu1 %v4668_v24  ;;  %v2631_v20 = vrot.slane %v2617_v25, %v10313_v9  ;;  %v4728_v24 = vld [vmem:[#allocation7 + $0x758] sm:$0xff]  ;;  %v4727_v25 = vld [vmem:[#allocation7 + $0x750] sm:$0xff] }
 0x2c1   :  { %v2024_v11 = vadd.f32 %v11344_v44, %v2023_v6  ;;  %v5131_v45 = vrot.slane %v5115_v32, %v10313_v9  ;;  %v5045_v63 = vcombine.high %v11334_v34, %v11348_v29  ;;  %v5044_v60 = vcombine.low %v11334_v34, %v11348_v29  ;;  %5856 = vmatpush2.msra.mxu0 %v4733_v15  ;;  %v4663_v32 = vld [vmem:[#allocation7 + $0x550] sm:$0xff]  ;;  %v4662_v15 = vld [vmem:[#allocation7 + $0x548] sm:$0xff] }
 0x2c2   :  { %v9332_v36 = vpop.f32.mrf.mxu0  ;;  %5769 = vmatpush2.msra.mxu1 %v4667_v17  ;;  %5857 = vmatprep.subr.mxu0 %v4732_v47  ;;  %v2858_v6 = vrot.slane %v2850_v39, %v10313_v9  ;;  %v11373_v39 = vcombine.high %v11310_v22, %v11310_v22  ;;  %v4661_v17 = vld [vmem:[#allocation7 + $0x540] sm:$0xff]  ;;  %v4726_v47 = vld [vmem:[#allocation7 + $0x748] sm:$0xff] }
 0x2c3   :  { %v2047_v57 = vmax.f32 %v2024_v11, 0.0  ;;  %v11359_v30 = vcombine.low %v5124_v53, %v5131_v45  ;;  %5770 = vmatprep.subr.mxu1 %v4666_v7  ;;  %5858 = vmatpush2.msra.mxu0 %v4731_v38  ;;  %v4660_v7 = vld [vmem:[#allocation7 + $0x538] sm:$0xff] }
 0x2c4   :  { %5771 = vmatpush2.msra.mxu1 %v4665_v37  ;;  %5859 = vmatprep.subr.mxu0 %v4730_v48  ;;  %v2873_v45 = vcombine.low %v2858_v6, %v2865_v55  ;;  %v2639_v37 = vcombine.low %v2624_v5, %v2631_v20  ;;  %v4724_v6 = vld [vmem:[#allocation7 + $0x738] sm:$0xff] }
 0x2c5   :  { %v2305_v41 = vcombine.high %v2047_v57, %v2047_v57  ;;  %v2312_v26 = vrot.slane %v2047_v57, %v10313_v9  ;;  %5772 = vmatprep.subr.mxu1 %v4664_v12  ;;  %5860 = vmatpush2.msra.mxu0 %v4729_v54  ;;  %v4659_v12 = vld [vmem:[#allocation7 + $0x530] sm:$0xff] }
 0x2c6   :  { %5773 = vmatpush2.msra.mxu1 %v4663_v32  ;;  %5861 = vmatprep.subr.mxu0 %v4728_v24  ;;  %v2880_v55 = vrot.slane %v2873_v45, %v10313_v9  ;;  %v4658_v32 = vld [vmem:[#allocation7 + $0x528] sm:$0xff]  ;;  %v2646_v5 = vrot.slane %v2639_v37, %v10313_v9  ;;  %v4721_v45 = vld [vmem:[#allocation7 + $0x720] sm:$0xff] }
 0x2c7   :  { %v2319_v53 = vrot.slane %v2305_v41, %v10313_v9  ;;  %v2320_v11 = vcombine.high %v2312_v26, %v2312_v26  ;;  %v11369_v43 = vrot.slane %v2312_v26, %v10313_v9  ;;  %5774 = vmatprep.subr.mxu1 %v4662_v15  ;;  %5862 = vmatpush2.msra.mxu0 %v4727_v25  ;;  %v4725_v41 = vld [vmem:[#allocation7 + $0x740] sm:$0xff]  ;;  %v4723_v15 = vld [vmem:[#allocation7 + $0x730] sm:$0xff]  ;;  %v4654_v37 = vld [vmem:[#allocation7 + $0x508] sm:$0xff] }
 0x2c8   :  { %5775 = vmatpush2.msra.mxu1 %v4661_v17  ;;  %5863 = vmatprep.subr.mxu0 %v4726_v47  ;;  %v4657_v25 = vld [vmem:[#allocation7 + $0x520] sm:$0xff]  ;;  %v4656_v17 = vld [vmem:[#allocation7 + $0x518] sm:$0xff] }
 0x2c9   :  { %v2321_v46 = vcombine.high %v2319_v53, %v2319_v53  ;;  %v11376_v36 = vrot.slane %v2320_v11, %v10313_v9  ;;  %v3060_v57 = vcombine.low %v11373_v39, %v11369_v43  ;;  %v11381_v22 = vrot.slane %v2319_v53, %v10313_v9  ;;  %5776 = vmatprep.subr.mxu1 %v4660_v7  ;;  %v4720_v7 = vld [vmem:[#allocation7 + $0x718] sm:$0xff] }
 0x2ca   :  { %5864 = vmatpush2.msra.mxu0 %v4725_v41  ;;  %5777 = vmatpush2.msra.mxu1 %v4659_v12  ;;  %v8781_v41 = vcombine.low %v2646_v5, %v2880_v55  ;;  %v4653_v12 = vld [vmem:[#allocation7 + $0x500] sm:$0xff] }
 0x2cb   :  { %v11384_v38 = vrot.slane %v2321_v46, %v10313_v9  ;;  %v8746_v48 = vcombine.high %v11369_v43, %v11376_v36  ;;  %v3067_v26 = vrot.slane %v3060_v57, %v10313_v9  ;;  %5865 = vmatprep.subr.mxu0 %v4724_v6  ;;  %v4722_v46 = vld [vmem:[#allocation7 + $0x728] sm:$0xff]  ;;  %5778 = vmatprep.subr.mxu1 %v4658_v32  ;;  %v4655_v57 = vld [vmem:[#allocation7 + $0x510] sm:$0xff]  ;;  %v4780_v6 = vld [vmem:[#allocation7 + $0x8f8] sm:$0xff] }
 0x2cc   :  { %5866 = vmatpush2.msra.mxu0 %v4723_v15  ;;  %5779 = vmatpush2.msra.mxu1 %v4657_v25  ;;  %v2351_v15 = vcombine.high %v11381_v22, %v11381_v22  ;;  %v11408_v55 = vrot.slane %v8781_v41, %v10313_v9  ;;  %v2638_v25 = vrot.slane %v11373_v39, %v10313_v9 }
 0x2cd   :  { %v2656_v54 = vcombine.low %v11381_v22, %v11384_v38  ;;  %v2663_v53 = vrot.slane %v8746_v48, %v10313_v9  ;;  %v3075_v24 = vcombine.low %v2631_v20, %v3067_v26  ;;  %5867 = vmatprep.subr.mxu0 %v4722_v46  ;;  %5780 = vmatprep.subr.mxu1 %v4656_v17  ;;  %v4719_v26 = vld [vmem:[#allocation7 + $0x710] sm:$0xff] }
 0x2ce   :  { %5868 = vmatpush2.msra.mxu0 %v4721_v45  ;;  %5781 = vmatpush2.msra.mxu1 %v4655_v57  ;;  %v8780_v45 = vcombine.low %v11292_v49, %v11292_v49  ;;  %v3968_v39 = vrot.slane %v3951_v16, %v10313_v9  ;;  %v5020_v49 = vrot.slane %v8819_v40, %v10313_v9 }
 0x2cf   :  { %v11395_v11 = vrot.slane %v2656_v54, %v10313_v9  ;;  %v3082_v20 = vrot.slane %v3075_v24, %v10313_v9  ;;  %v4718_v54 = vld [vmem:[#allocation7 + $0x708] sm:$0xff]  ;;  %5869 = vmatprep.subr.mxu0 %v4720_v7  ;;  %5782 = vmatprep.subr.mxu1 %v4654_v37  ;;  %v2352_v24 = vcombine.high %v11376_v36, %v11376_v36 }
 0x2d0   :  { %5870 = vmatpush2.msra.mxu0 %v4719_v26  ;;  %5783 = vmatpush2.msra.mxu1 %v4653_v12  ;;  %v2890_v7 = vcombine.low %v11384_v38, %v2351_v15  ;;  %v8751_v37 = vcombine.high %v11381_v22, %v11384_v38  ;;  %v11442_v12 = vrot.slane %v2638_v25, %v10313_v9 }
 0x2d1   :  { %v2678_v47 = vcombine.low %v2663_v53, %v11395_v11  ;;  %v4717_v53 = vld [vmem:[#allocation7 + $0x700] sm:$0xff]  ;;  %5871 = vmatprep.subr.mxu0 %v4718_v54  ;;  %5898 = vmatprep.subr.mxu1 %v4780_v6  ;;  %v2889_v57 = vcombine.low %v2352_v24, %v11381_v22  ;;  %v11439_v22 = vrot.slane %v5043_v18, %v10313_v9 }
 0x2d2   :  { %5872 = vmatpush2.msra.mxu0 %v4717_v53  ;;  %v2677_v1 = vrot.slane %v2351_v15, %v10313_v9  ;;  %v3074_v31 = vrot.slane %v11376_v36, %v10313_v9  ;;  %v11451_v16 = vrot.slane %v5042_v42, %v10313_v9  ;;  %v11456_v18 = vrot.slane %v8780_v45, %v10313_v9 }
 0x2d3   :  { %v11399_v48 = vrot.slane %v2678_v47, %v10313_v9  ;;  %v2897_v54 = vrot.slane %v2889_v57, %v10313_v9  ;;  %v2904_v6 = vrot.slane %v2890_v7, %v10313_v9  ;;  %v3098_v36 = vrot.slane %v8751_v37, %v10313_v9 }
 0x2d4   :  { %v2353_v15 = vcombine.high %v11384_v38, %v11384_v38  ;;  %v11473_v24 = vrot.slane %v2677_v1, %v10313_v9  ;;  %v2872_v25 = vrot.slane %v11369_v43, %v10313_v9  ;;  %v3089_v33 = vrot.slane %v3074_v31, %v10313_v9 }
 0x2d5   :  { %v8783_v32 = vcombine.low %v3082_v20, %v11399_v48  ;;  %v3106_v45 = vcombine.low %v11395_v11, %v3098_v36 }
 0x2d6   :  { %v2887_v43 = vrot.slane %v2872_v25, %v10313_v9 }
 0x2d7   :  { %v11411_v5 = vrot.slane %v8783_v32, %v10313_v9 }
 0x2d8   :  { %v2028_v46 = vpop.f32.mrf.mxu0 }
 0x2d9   :  { %v2029_v17 = vadd.f32 %v11344_v44, %v2028_v46  ;;  %v4105_v47 = vcombine.low %v11408_v55, %v11411_v5 }
 0x2da   :  { %v9335_v20 = vpop.f32.mrf.mxu0 }
 0x2db   :  { %v2048_v41 = vmax.f32 %v2029_v17, 0.0  ;;  %v11429_v26 = vrot.slane %v4105_v47, %v10313_v9  ;;  %v2912_v47 = vcombine.low %v2897_v54, %v2904_v6  ;;  %v3113_v54 = vrot.slane %v3106_v45, %v10313_v9 }
 0x2dd   :  { %v2354_v4 = vcombine.high %v2048_v41, %v2048_v41  ;;  %v2361_v28 = vrot.slane %v2048_v41, %v10313_v9  ;;  %v8821_v40 = vcombine.low %v3968_v39, %v11429_v26  ;;  %v2911_v41 = vrot.slane %v2353_v15, %v10313_v9 }
 0x2df   :  { %v2368_v62 = vrot.slane %v2354_v4, %v10313_v9  ;;  %v2369_v42 = vcombine.high %v2361_v28, %v2361_v28  ;;  %v2377_v32 = vrot.slane %v2361_v28, %v10313_v9  ;;  %v5034_v53 = vrot.slane %v8821_v40, %v10313_v9 }
 0x2e0   :  { %v8784_v4 = vcombine.low %v3089_v33, %v11473_v24 }
 0x2e1   :  { %v2370_v10 = vcombine.high %v2368_v62, %v2368_v62  ;;  %v2384_v27 = vrot.slane %v2368_v62, %v10313_v9  ;;  %v2391_v46 = vrot.slane %v2369_v42, %v10313_v9  ;;  %v2399_v17 = vcombine.high %v2377_v32, %v2377_v32 }
 0x2e2   :  { %v5047_v57 = vcombine.high %v5020_v49, %v5034_v53  ;;  %v5046_v7 = vcombine.low %v5020_v49, %v5034_v53  ;;  %v3105_v11 = vrot.slane %v2377_v32, %v10313_v9  ;;  %v2919_v49 = vrot.slane %v2912_v47, %v10313_v9 }
 0x2e3   :  { %v2398_v38 = vrot.slane %v2370_v10, %v10313_v9  ;;  %v2400_v37 = vcombine.high %v2384_v27, %v2384_v27  ;;  %v2401_v20 = vcombine.high %v2391_v46, %v2391_v46  ;;  %v2694_v39 = vcombine.low %v2391_v46, %v2399_v17 }
 0x2e4   :  { %v8749_v1 = vcombine.high %v2377_v32, %v2391_v46  ;;  %v5098_v31 = vrot.slane %v5047_v57, %v10313_v9  ;;  %v5084_v15 = vrot.slane %v5046_v7, %v10313_v9  ;;  %v8782_v46 = vcombine.low %v11442_v12, %v2887_v43 }
 0x2e5   :  { %v2695_v28 = vcombine.low %v2401_v20, %v2384_v27  ;;  %v2716_v40 = vrot.slane %v2398_v38, %v10313_v9  ;;  %v2929_v6 = vcombine.low %v2384_v27, %v2398_v38  ;;  %v2950_v36 = vrot.slane %v2400_v37, %v10313_v9 }
 0x2e6   :  { %v2702_v62 = vrot.slane %v2694_v39, %v10313_v9  ;;  %v2936_v53 = vrot.slane %v8749_v1, %v10313_v9  ;;  %v3122_v32 = vcombine.low %v2398_v38, %v2400_v37  ;;  %v5110_v10 = vcombine.low %v11439_v22, %v5098_v31 }
 0x2e7   :  { %v2709_v42 = vrot.slane %v2695_v28, %v10313_v9  ;;  %v2731_v25 = vrot.slane %v2716_v40, %v10313_v9  ;;  %v2943_v33 = vrot.slane %v2929_v6, %v10313_v9  ;;  %v2926_v17 = vrot.slane %v2911_v41, %v10313_v9 }
 0x2e8   :  { %v3120_v47 = vrot.slane %v3105_v11, %v10313_v9  ;;  %v2402_v45 = vcombine.high %v2398_v38, %v2398_v38  ;;  %v11502_v20 = vrot.slane %v2950_v36, %v10313_v9  ;;  %5612 = vmatprep.mubr.f32.mxu1 %v5110_v10  ;;  %v5111_v7 = vcombine.high %v11439_v22, %v5098_v31 }
 0x2e9   :  { %v2717_v27 = vcombine.low %v2702_v62, %v2709_v42  ;;  %v2951_v57 = vcombine.low %v2936_v53, %v2943_v33  ;;  %v8785_v39 = vcombine.low %v2919_v49, %v3113_v54  ;;  %v4076_v37 = vrot.slane %v8784_v4, %v10313_v9 }
 0x2ea   :  { %v5106_v12 = vcombine.low %v11451_v16, %v5084_v15  ;;  %v3129_v41 = vrot.slane %v3122_v32, %v10313_v9  ;;  %v8793_v38 = vcombine.low %v3120_v47, %v2731_v25  ;;  %5701 = vmatprep.mubr.f32.mxu0 %v5111_v7  ;;  %v5107_v28 = vcombine.high %v11451_v16, %v5084_v15 }
 0x2eb   :  { %v2724_v1 = vrot.slane %v2717_v27, %v10313_v9  ;;  %v11509_v43 = vrot.slane %v2951_v57, %v10313_v9  ;;  %v4062_v40 = vrot.slane %v8782_v46, %v10313_v9  ;;  %v8790_v22 = vcombine.low %v11399_v48, %v2919_v49 }
 0x2ec   :  { %v8791_v31 = vcombine.low %v11473_v24, %v2926_v17  ;;  %5613 = vmatmul.mubr.f32.gmra.mxu1 %v5106_v12  ;;  %v3136_v11 = vrot.slane %v2402_v45, %v10313_v9  ;;  %v8788_v36 = vcombine.low %v2731_v25, %v11502_v20  ;;  %5702 = vmatmul.mubr.f32.gmra.mxu0 %v5107_v28 }
 0x2ed   :  { %v8792_v4 = vcombine.low %v3113_v54, %v2724_v1  ;;  %v8787_v6 = vcombine.low %v2724_v1, %v11509_v43  ;;  %v11523_v16 = vrot.slane %v8820_v52, %v10313_v9  ;;  %v8786_v62 = vcombine.low %v2926_v17, %v3120_v47 }
 0x2ee   :  { %v4083_v48 = vrot.slane %v8785_v39, %v10313_v9  ;;  %v4106_v24 = vcombine.high %v11408_v55, %v11411_v5  ;;  %v4107_v49 = vcombine.low %v4062_v40, %v4076_v37  ;;  %v3137_v54 = vcombine.low %v2709_v42, %v3129_v41 }
 0x2ef   :  { %v11529_v53 = vrot.slane %v8787_v6, %v10313_v9  ;;  %v4232_v15 = vrot.slane %v8793_v38, %v10313_v9  ;;  %v4225_v33 = vrot.slane %v8792_v4, %v10313_v9  ;;  %v4211_v0 = vrot.slane %v8790_v22, %v10313_v9 }
 0x2f0   :  { %v2033_v25 = vpop.f32.mrf.mxu0  ;;  %v4218_v52 = vrot.slane %v8791_v31, %v10313_v9  ;;  %v11540_v55 = vrot.slane %v5045_v63, %v10313_v9  ;;  %v11543_v5 = vrot.slane %v3136_v11, %v10313_v9  ;;  %v11546_v42 = vrot.slane %v8788_v36, %v10313_v9 }
 0x2f1   :  { %v2034_v59 = vadd.f32 %v11344_v44, %v2033_v25  ;;  %v4108_v10 = vcombine.low %v4083_v48, %v11529_v53  ;;  %v4109_v46 = vcombine.high %v4083_v48, %v11529_v53  ;;  %v11551_v17 = vrot.slane %v4107_v49, %v10313_v9 }
 0x2f2   :  { %v9338_v32 = vpop.f32.mrf.mxu0  ;;  %v11554_v47 = vrot.slane %v4106_v24, %v10313_v9  ;;  %v11560_v63 = vrot.slane %v5044_v60, %v10313_v9  ;;  %v11563_v45 = vrot.slane %v3137_v54, %v10313_v9  ;;  %v4090_v57 = vrot.slane %v8786_v62, %v10313_v9 }
 0x2f3   :  { %v2049_v27 = vmax.f32 %v2034_v59, 0.0  ;;  %v4261_v39 = vcombine.low %v4211_v0, %v4225_v33  ;;  %v4263_v37 = vcombine.low %v4218_v52, %v4232_v15  ;;  %v4262_v38 = vcombine.high %v4211_v0, %v4225_v33 }
 0x2f4   :  { %v2038_v7 = vpop.f32.mrf.mxu0  ;;  %v4110_v28 = vcombine.low %v4090_v57, %v11546_v42  ;;  %v8795_v34 = vcombine.low %v11502_v20, %v11543_v5  ;;  %v11572_v60 = vrot.slane %v4108_v10, %v10313_v9  ;;  %v11575_v40 = vrot.slane %v4109_v46, %v10313_v9 }
 0x2f5   :  { %v2403_v1 = vcombine.high %v2049_v27, %v2049_v27  ;;  %v2410_v12 = vrot.slane %v2049_v27, %v10313_v9  ;;  %v2039_v41 = vadd.f32 %v11344_v44, %v2038_v7  ;;  %v8794_v44 = vcombine.low %v11509_v43, %v11563_v45 }
 0x2f6   :  { %v9341_v29 = vpop.f32.mrf.mxu0  ;;  %v4273_v6 = vrot.slane %v4261_v39, %v10313_v9  ;;  %v11583_v36 = vrot.slane %v4263_v37, %v10313_v9  ;;  %v3152_v62 = vcombine.low %v11563_v45, %v11543_v5  ;;  %v4287_v54 = vrot.slane %v4262_v38, %v10313_v9 }
 0x2f7   :  { %v2417_v22 = vrot.slane %v2403_v1, %v10313_v9  ;;  %v2418_v31 = vcombine.high %v2410_v12, %v2410_v12  ;;  %v2426_v4 = vrot.slane %v2410_v12, %v10313_v9  ;;  %v2050_v11 = vmax.f32 %v2039_v41, 0.0 }
 0x2f8   :  { %v4154_v33 = vcombine.high %v11429_v26, %v11572_v60  ;;  %v4157_v59 = vcombine.high %v11554_v47, %v11575_v40  ;;  %v11597_v57 = vrot.slane %v4110_v28, %v10313_v9  ;;  %v11600_v7 = vrot.slane %v3152_v62, %v10313_v9 }
 0x2f9   :  { %v2419_v48 = vcombine.high %v2417_v22, %v2417_v22  ;;  %v2440_v24 = vrot.slane %v2418_v31, %v10313_v9  ;;  %v2448_v49 = vcombine.high %v2426_v4, %v2426_v4  ;;  %v2433_v15 = vrot.slane %v2417_v22, %v10313_v9 }
 0x2fa   :  { %v2452_v25 = vcombine.high %v2050_v11, %v2050_v11  ;;  %v2459_v10 = vrot.slane %v2050_v11, %v10313_v9  ;;  %v8828_v37 = vcombine.low %v4273_v6, %v4287_v54  ;;  %v8830_v1 = vcombine.high %v4273_v6, %v4287_v54 }
 0x2fb   :  { %v2447_v0 = vrot.slane %v2419_v48, %v10313_v9  ;;  %v2450_v52 = vcombine.high %v2440_v24, %v2440_v24  ;;  %v3192_v32 = vcombine.low %v2426_v4, %v2440_v24  ;;  %v8752_v46 = vcombine.high %v2426_v4, %v2440_v24 }
 0x2fc   :  { %v3270_v27 = vcombine.low %v2440_v24, %v2448_v49  ;;  %v8824_v38 = vcombine.low %v11554_v47, %v4154_v33  ;;  %v8826_v29 = vcombine.low %v4157_v59, %v11551_v17  ;;  %v2449_v22 = vcombine.high %v2433_v15, %v2433_v15 }
 0x2fd   :  { %v3200_v39 = vrot.slane %v3192_v32, %v10313_v9  ;;  %v3271_v26 = vcombine.low %v2450_v52, %v2433_v15  ;;  %v3207_v12 = vrot.slane %v8752_v46, %v10313_v9  ;;  %v3340_v41 = vcombine.low %v2433_v15, %v2447_v0 }
 0x2fe   :  { %v11608_v28 = vrot.slane %v2452_v25, %v10313_v9  ;;  %v2467_v4 = vcombine.high %v2459_v10, %v2459_v10  ;;  %v2451_v11 = vcombine.high %v2447_v0, %v2447_v0  ;;  %v3214_v62 = vrot.slane %v2433_v15, %v10313_v9 }
 0x2ff   :  { %v3285_v31 = vrot.slane %v3271_v26, %v10313_v9  ;;  %v3278_v48 = vrot.slane %v3270_v27, %v10313_v9  ;;  %v3347_v6 = vrot.slane %v3340_v41, %v10313_v9  ;;  %v3215_v24 = vcombine.low %v3200_v39, %v3207_v12 }
 0x300   :  { %v2475_v49 = vrot.slane %v2459_v10, %v10313_v9  ;;  %v5205_v54 = vrot.slane %v8828_v37, %v10313_v9  ;;  %v5219_v33 = vrot.slane %v8830_v1, %v10313_v9  ;;  %v2489_v25 = vrot.slane %v2467_v4, %v10313_v9 }
 0x301   :  { %v3293_v59 = vcombine.low %v3278_v48, %v3285_v31  ;;  %v3355_v52 = vcombine.low %v3207_v12, %v3347_v6  ;;  %v5177_v32 = vrot.slane %v8824_v38, %v10313_v9  ;;  %v3292_v46 = vrot.slane %v2447_v0, %v10313_v9 }
 0x302   :  { %v11621_v15 = vrot.slane %v11608_v28, %v10313_v9  ;;  %v2497_v27 = vcombine.high %v2475_v49, %v2475_v49  ;;  %v5191_v39 = vrot.slane %v8826_v29, %v10313_v9  ;;  %v11625_v10 = vrot.slane %v3214_v62, %v10313_v9 }
 0x303   :  { %v3354_v26 = vrot.slane %v2449_v22, %v10313_v9  ;;  %v11628_v37 = vcombine.high %v2489_v25, %v2489_v25  ;;  %v3410_v1 = vcombine.low %v2451_v11, %v2475_v49  ;;  %v11631_v12 = vrot.slane %v3215_v24, %v10313_v9 }
 0x304   :  { %v3411_v41 = vcombine.low %v2489_v25, %v2497_v27  ;;  %v3488_v0 = vcombine.low %v2475_v49, %v2489_v25  ;;  %v8755_v38 = vcombine.high %v2475_v49, %v2489_v25  ;;  %v11634_v31 = vrot.slane %v3293_v59, %v10313_v9 }
 0x305   :  { %v11637_v4 = vrot.slane %v3355_v52, %v10313_v9  ;;  %v3418_v29 = vrot.slane %v3410_v1, %v10313_v9  ;;  %v3432_v22 = vrot.slane %v11628_v37, %v10313_v9  ;;  %v3510_v6 = vrot.slane %v11621_v15, %v10313_v9 }
 0x306   :  { %v11643_v62 = vrot.slane %v3411_v41, %v10313_v9  ;;  %v3496_v11 = vrot.slane %v3488_v0, %v10313_v9  ;;  %v3503_v48 = vrot.slane %v8755_v38, %v10313_v9  ;;  %v11650_v24 = vrot.slane %v3292_v46, %v10313_v9 }
 0x307   :  { %v3447_v49 = vrot.slane %v3432_v22, %v10313_v9  ;;  %v11657_v59 = vrot.slane %v8794_v44, %v10313_v9  ;;  %v11661_v52 = vrot.slane %v11600_v7, %v10313_v9  ;;  %v11664_v25 = vrot.slane %v3354_v26, %v10313_v9 }
 0x308   :  { %v8800_v27 = vcombine.low %v11543_v5, %v11625_v10  ;;  %v3433_v46 = vcombine.low %v3418_v29, %v11643_v62  ;;  %v3511_v1 = vcombine.low %v3496_v11, %v3503_v48  ;;  %v8799_v41 = vcombine.low %v11563_v45, %v11631_v12 }
 0x309   :  { %v3525_v43 = vrot.slane %v3510_v6, %v10313_v9  ;;  %v5228_v44 = vcombine.high %v5177_v32, %v5191_v39  ;;  %v5232_v0 = vcombine.high %v5205_v54, %v5219_v33  ;;  %v8801_v38 = vcombine.low %v11634_v31, %v11637_v4 }
 0x30a   :  { %v3440_v22 = vrot.slane %v3433_v46, %v10313_v9  ;;  %v3518_v26 = vrot.slane %v3511_v1, %v10313_v9  ;;  %v5227_v51 = vcombine.low %v5177_v32, %v5191_v39  ;;  %v8822_v45 = vcombine.low %v11465_v58, %v11572_v60 }
 0x30b   :  { %v8804_v21 = vcombine.low %v3447_v49, %v3525_v43  ;;  %v5255_v19 = vrot.slane %v5228_v44, %v10313_v9  ;;  %v5283_v29 = vrot.slane %v5232_v0, %v10313_v9  ;;  %v8802_v11 = vcombine.low %v11650_v24, %v11664_v25 }
 0x30c   :  { %v8803_v48 = vcombine.low %v3440_v22, %v3518_v26  ;;  %v5231_v6 = vcombine.low %v5205_v54, %v5219_v33  ;;  %v5241_v13 = vrot.slane %v5227_v51, %v10313_v9  ;;  %v8796_v46 = vcombine.low %v11631_v12, %v11634_v31 }
 0x30d   :  { %v5295_v1 = vcombine.low %v5255_v19, %v5283_v29  ;;  %v5296_v32 = vcombine.high %v5255_v19, %v5283_v29  ;;  %v4365_v39 = vrot.slane %v8799_v41, %v10313_v9  ;;  %v4379_v49 = vrot.slane %v8801_v38, %v10313_v9 }
 0x30e   :  { %v5269_v43 = vrot.slane %v5231_v6, %v10313_v9  ;;  %v4372_v58 = vrot.slane %v8800_v27, %v10313_v9  ;;  %v4393_v44 = vrot.slane %v8803_v48, %v10313_v9  ;;  %v4400_v0 = vrot.slane %v8804_v21, %v10313_v9 }
 0x30f   :  { %5618 = vmatprep.mubr.f32.mxu1 %v5295_v1  ;;  %5707 = vmatprep.mubr.f32.mxu0 %v5296_v32  ;;  %v4401_v51 = vcombine.low %v11529_v53, %v4365_v39  ;;  %v4402_v54 = vcombine.high %v11529_v53, %v4365_v39  ;;  %v8797_v41 = vcombine.low %v11625_v10, %v11650_v24 }
 0x310   :  { %v5291_v33 = vcombine.low %v5241_v13, %v5269_v43  ;;  %v5292_v19 = vcombine.high %v5241_v13, %v5269_v43  ;;  %v4403_v12 = vcombine.low %v11546_v42, %v4372_v58  ;;  %v4404_v31 = vcombine.low %v4379_v49, %v4393_v44 }
 0x311   :  { %v4405_v38 = vcombine.high %v4379_v49, %v4393_v44  ;;  %v4413_v27 = vrot.slane %v4401_v51, %v10313_v9  ;;  %v5041_v22 = vrot.slane %v8822_v45, %v10313_v9  ;;  %v4386_v21 = vrot.slane %v8802_v11, %v10313_v9 }
 0x312   :  { %5619 = vmatmul.mubr.f32.gmra.mxu1 %v5291_v33  ;;  %5708 = vmatmul.mubr.f32.gmra.mxu0 %v5292_v19  ;;  %v11700_v26 = vrot.slane %v4402_v54, %v10313_v9  ;;  %v11703_v13 = vrot.slane %v4404_v31, %v10313_v9  ;;  %v4420_v45 = vrot.slane %v4403_v12, %v10313_v9 }
 0x313   :  { %v11706_v53 = vrot.slane %v4405_v38, %v10313_v9  ;;  %v8833_v42 = vcombine.low %v11583_v36, %v4413_v27  ;;  %v5049_v10 = vcombine.high %v11523_v16, %v5041_v22  ;;  %v5048_v24 = vcombine.low %v11523_v16, %v5041_v22 }
 0x314   :  { %v4406_v29 = vcombine.low %v4386_v21, %v4400_v0  ;;  %v4450_v11 = vcombine.high %v4413_v27, %v11703_v13  ;;  %v4253_v48 = vrot.slane %v8796_v46, %v10313_v9  ;;  %v4156_v36 = vcombine.low %v11554_v47, %v11575_v40 }
 0x315   :  { %v4453_v6 = vcombine.high %v11700_v26, %v11706_v53  ;;  %v11717_v1 = vrot.slane %v5049_v10, %v10313_v9  ;;  %v11720_v32 = vrot.slane %v5048_v24, %v10313_v9  ;;  %v5360_v39 = vrot.slane %v8833_v42, %v10313_v9 }
 0x316   :  { %v8835_v16 = vcombine.low %v11700_v26, %v4450_v11  ;;  %v4264_v49 = vcombine.low %v11657_v59, %v4253_v48  ;;  %v4265_v46 = vcombine.high %v11657_v59, %v4253_v48  ;;  %v4246_v19 = vrot.slane %v8795_v34, %v10313_v9 }
 0x317   :  { %v8837_v43 = vcombine.low %v4453_v6, %v4420_v45  ;;  %v5112_v58 = vcombine.low %v11540_v55, %v11717_v1  ;;  %v5113_v44 = vcombine.high %v11540_v55, %v11717_v1  ;;  %v5108_v0 = vcombine.low %v11560_v63, %v11720_v32  ;;  %v4774_v1 = vld [vmem:[#allocation7 + $0x8c8] sm:$0xff] }
 0x318   :  { %v5374_v47 = vrot.slane %v8835_v16, %v10313_v9  ;;  %v5109_v51 = vcombine.high %v11560_v63, %v11720_v32  ;;  %v4294_v54 = vrot.slane %v4264_v49, %v10313_v9  ;;  %v4308_v33 = vrot.slane %v4265_v46, %v10313_v9 }
 0x319   :  { %v5388_v59 = vrot.slane %v8837_v43, %v10313_v9  ;;  %v4260_v12 = vrot.slane %v8797_v41, %v10313_v9  ;;  %v4031_v31 = vrot.slane %v11456_v18, %v10313_v9  ;;  %v4155_v10 = vcombine.low %v11551_v17, %v11597_v57 }
 0x31a   :  { %v5397_v38 = vcombine.high %v5360_v39, %v5374_v47  ;;  %v5396_v27 = vcombine.low %v5360_v39, %v5374_v47  ;;  %v8829_v22 = vcombine.low %v4294_v54, %v4308_v33  ;;  %v8831_v21 = vcombine.high %v4294_v54, %v4308_v33 }
 0x31b   :  { %v5400_v42 = vcombine.high %v5388_v59, %v5388_v59  ;;  %v4441_v24 = vrot.slane %v4406_v29, %v10313_v9  ;;  %v5117_v11 = vcombine.low %v4031_v31, %v11661_v52  ;;  %v5436_v41 = vrot.slane %v5388_v59, %v10313_v9 }
 0x31c   :  { %v5422_v20 = vrot.slane %v5397_v38, %v10313_v9  ;;  %v5408_v34 = vrot.slane %v5396_v27, %v10313_v9  ;;  %v8825_v18 = vcombine.high %v4156_v36, %v11572_v60  ;;  %v8827_v6 = vcombine.high %v11575_v40, %v4155_v10  ;;  %v4778_v27 = vld [vmem:[#allocation7 + $0x8e8] sm:$0xff] }
 0x31d   :  { %v5450_v48 = vrot.slane %v5400_v42, %v10313_v9  ;;  %v4266_v16 = vcombine.low %v4246_v19, %v4260_v12  ;;  %v8823_v17 = vcombine.high %v11323_v8, %v11326_v2  ;;  %v5212_v39 = vrot.slane %v8829_v22, %v10313_v9  ;;  %v4779_v12 = vld [vmem:[#allocation7 + $0x8f0] sm:$0xff] }
 0x31e   :  { %v5458_v57 = vcombine.low %v5408_v34, %v5436_v41  ;;  %v5459_v29 = vcombine.high %v5408_v34, %v5436_v41  ;;  %v5226_v49 = vrot.slane %v8831_v21, %v10313_v9  ;;  %v4451_v54 = vcombine.low %v4420_v45, %v4441_v24 }
 0x31f   :  { %v5462_v46 = vcombine.low %v5422_v20, %v5450_v48  ;;  %v5463_v43 = vcombine.high %v5422_v20, %v5450_v48  ;;  %v4301_v47 = vrot.slane %v4266_v16, %v10313_v9  ;;  %v3558_v60 = vcombine.low %v11628_v37, %v11621_v15  ;;  %v4773_v16 = vld [vmem:[#allocation7 + $0x8c0] sm:$0xff] }
 0x320   :  { %v5184_v40 = vrot.slane %v8825_v18, %v10313_v9  ;;  %v4452_v36 = vcombine.low %v11700_v26, %v11706_v53  ;;  %v5145_v8 = vrot.slane %v5117_v11, %v10313_v9  ;;  %v8838_v33 = vcombine.high %v11706_v53, %v4451_v54  ;;  %v4776_v11 = vld [vmem:[#allocation7 + $0x8d8] sm:$0xff]  ;;  %v4770_v54 = vld [vmem:[#allocation7 + $0x8a8] sm:$0xff] }
 0x321   :  { %5624 = vmatprep.mubr.f32.mxu1 %v5462_v46  ;;  %5713 = vmatprep.mubr.f32.mxu0 %v5463_v43  ;;  %v8834_v2 = vcombine.low %v4301_v47, %v11703_v13  ;;  %v5198_v45 = vrot.slane %v8827_v6, %v10313_v9  ;;  %v5234_v59 = vcombine.high %v5212_v39, %v5226_v49 }
 0x322   :  { %5625 = vmatmul.mubr.f32.gmra.mxu1 %v5458_v57  ;;  %5714 = vmatmul.mubr.f32.gmra.mxu0 %v5459_v29  ;;  %v5138_v15 = vrot.slane %v8823_v17, %v10313_v9  ;;  %v12388_v37 = vcombine.high %v11202_v23, %v11209_v14  ;;  %v8836_v26 = vcombine.high %v4452_v36, %v11703_v13  ;;  %v4772_v29 = vld [vmem:[#allocation7 + $0x8b8] sm:$0xff] }
 0x323   :  { %5784 = vmatprep.mubr.f32.mxu1 %v4927_v61  ;;  %v2468_v53 = vcombine.high %v11608_v28, %v11608_v28  ;;  %v3565_v19 = vrot.slane %v3558_v60, %v10313_v9  ;;  %v5230_v31 = vcombine.high %v5184_v40, %v5198_v45  ;;  %v5233_v22 = vcombine.low %v5212_v39, %v5226_v49  ;;  %v4777_v28 = vld [vmem:[#allocation7 + $0x8e0] sm:$0xff]  ;;  %v4771_v39 = vld [vmem:[#allocation7 + $0x8b0] sm:$0xff] }
 0x324   :  { %5873 = vmatprep.mubr.f32.mxu0 %v12388_v37  ;;  %v5147_v38 = vcombine.low %v5138_v15, %v5145_v8  ;;  %v5367_v21 = vrot.slane %v8834_v2, %v10313_v9  ;;  %v5381_v61 = vrot.slane %v8836_v26, %v10313_v9  ;;  %v5395_v42 = vrot.slane %v8838_v33, %v10313_v9  ;;  %v4767_v33 = vld [vmem:[#allocation7 + $0x890] sm:$0xff]  ;;  %v4766_v15 = vld [vmem:[#allocation7 + $0x888] sm:$0xff]  ;;  %v4765_v37 = vld [vmem:[#allocation7 + $0x880] sm:$0xff] }
 0x325   :  { %v12389_v23 = vcombine.low %v11212_v3, %v11215_v50  ;;  %v12390_v14 = vcombine.high %v11212_v3, %v11215_v50  ;;  %v5290_v13 = vrot.slane %v5234_v59, %v10313_v9  ;;  %v5154_v10 = vrot.slane %v11359_v30, %v10313_v9  ;;  %v4775_v3 = vld [vmem:[#allocation7 + $0x8d0] sm:$0xff] }
 0x326   :  { %v5161_v24 = vrot.slane %v5147_v38, %v10313_v9  ;;  %v5229_v20 = vcombine.low %v5184_v40, %v5198_v45  ;;  %v5399_v34 = vcombine.high %v5367_v21, %v5381_v61  ;;  %v2496_v41 = vrot.slane %v2468_v53, %v10313_v9  ;;  %v4769_v40 = vld [vmem:[#allocation7 + $0x8a0] sm:$0xff]  ;;  %v4764_v53 = vld [vmem:[#allocation7 + $0x878] sm:$0xff] }
 0x327   :  { %5785 = vmatmul.mubr.f32.vlgmr.msra.gmra.mxu1 %v12389_v23  ;;  %5874 = vmatmul.mubr.f32.vlgmr.msra.gmra.mxu0 %v12390_v14  ;;  %v5262_v50 = vrot.slane %v5230_v31, %v10313_v9  ;;  %v3573_v18 = vcombine.low %v11643_v62, %v3565_v19  ;;  %v5401_v48 = vcombine.high %v5395_v42, %v5395_v42  ;;  %v12391_v31 = vmov 0.0   ;;  %v4759_v23 = vld [vmem:[#allocation7 + $0x850] sm:$0xff] }
 0x328   :  { %5899 = vmatpush1.msra.mxu1 %v4779_v12  ;;  %5790 = vmatprep.mubr.f32.mxu1 %v5112_v58  ;;  %v11803_v30 = vcombine.low %v5154_v10, %v5161_v24  ;;  %v5276_v58 = vrot.slane %v5233_v22, %v10313_v9  ;;  %v5248_v62 = vrot.slane %v5229_v20, %v10313_v9  ;;  %v4763_v12 = vld [vmem:[#allocation7 + $0x870] sm:$0xff]  ;;  %v4762_v22 = vld [vmem:[#allocation7 + $0x868] sm:$0xff] }
 0x329   :  { %5879 = vmatprep.mubr.f32.mxu0 %v5113_v44  ;;  %5900 = vmatprep.subr.mxu1 %v4778_v27  ;;  %v5297_v6 = vcombine.low %v5262_v50, %v5290_v13  ;;  %v5298_v55 = vcombine.high %v5262_v50, %v5290_v13  ;;  %v5398_v44 = vcombine.low %v5367_v21, %v5381_v61  ;;  %v4761_v21 = vld [vmem:[#allocation7 + $0x860] sm:$0xff]  ;;  %v4758_v10 = vld [vmem:[#allocation7 + $0x848] sm:$0xff] }
 0x32a   :  { %5901 = vmatpush1.msra.mxu1 %v4777_v28  ;;  %v5429_v17 = vrot.slane %v5399_v34, %v10313_v9  ;;  %v3572_v57 = vrot.slane %v2496_v41, %v10313_v9  ;;  %v5457_v49 = vrot.slane %v5401_v48, %v10313_v9  ;;  %v3370_v63 = vcombine.low %v11637_v4, %v11664_v25  ;;  %v4768_v4 = vld [vmem:[#allocation7 + $0x898] sm:$0xff] }
 0x32b   :  { %5902 = vmatprep.subr.mxu1 %v4776_v11  ;;  %5791 = vmatmul.mubr.f32.gmra.mxu1 %v5108_v0  ;;  %v5293_v0 = vcombine.low %v5248_v62, %v5276_v58  ;;  %v3580_v32 = vrot.slane %v3573_v18, %v10313_v9  ;;  %v5415_v46 = vrot.slane %v5398_v44, %v10313_v9  ;;  %v4757_v11 = vld [vmem:[#allocation7 + $0x840] sm:$0xff]  ;;  %v4756_v41 = vld [vmem:[#allocation7 + $0x838] sm:$0xff]  ;;  %v4755_v18 = vld [vmem:[#allocation7 + $0x830] sm:$0xff] }
 0x32c   :  { %5880 = vmatmul.mubr.f32.gmra.mxu0 %v5109_v51  ;;  %5903 = vmatpush1.msra.mxu1 %v4775_v3  ;;  %v5294_v51 = vcombine.high %v5248_v62, %v5276_v58  ;;  %v5464_v43 = vcombine.low %v5429_v17, %v5457_v49  ;;  %v5465_v47 = vcombine.high %v5429_v17, %v5457_v49  ;;  %v4753_v44 = vld [vmem:[#allocation7 + $0x820] sm:$0xff]  ;;  %v4752_v17 = vld [vmem:[#allocation7 + $0x818] sm:$0xff] }
 0x32d   :  { %5796 = vmatprep.mubr.f32.mxu1 %v5297_v6  ;;  %5885 = vmatprep.mubr.f32.mxu0 %v5298_v55  ;;  %v11822_v60 = vrot.slane %v3572_v57, %v10313_v9  ;;  %v5443_v36 = vrot.slane %v5395_v42, %v10313_v9  ;;  %v4321_v45 = vrot.slane %v3370_v63, %v10313_v9 }
 0x32e   :  { %5904 = vmatprep.subr.mxu1 %v4774_v1  ;;  %v4173_v26 = vcombine.high %v11600_v7, %v11600_v7  ;;  %v8789_v19 = vcombine.low %v11543_v5, %v11543_v5  ;;  %v4760_v7 = vld [vmem:[#allocation7 + $0x858] sm:$0xff]  ;;  %v8798_v5 = vcombine.low %v11664_v25, %v11664_v25  ;;  %v4195_v3 = vcombine.high %v11661_v52, %v11661_v52  ;;  %v4754_v1 = vld [vmem:[#allocation7 + $0x828] sm:$0xff] }
 0x32f   :  { %5905 = vmatpush1.msra.mxu1 %v4773_v16  ;;  %v3588_v8 = vcombine.low %v3580_v32, %v11822_v60  ;;  %v5460_v2 = vcombine.low %v5415_v46, %v5443_v36  ;;  %v5461_v59 = vcombine.high %v5415_v46, %v5443_v36  ;;  %v4329_v38 = vcombine.high %v4321_v45, %v4321_v45  ;;  %v4750_v32 = vld [vmem:[#allocation7 + $0x808] sm:$0xff] }
 0x330   :  { %5906 = vmatprep.subr.mxu1 %v4772_v29  ;;  %5797 = vmatmul.mubr.f32.gmra.mxu1 %v5293_v0  ;;  %v4194_v61 = vrot.slane %v4173_v26, %v10313_v9  ;;  %v4172_v42 = vrot.slane %v8789_v19, %v10313_v9  ;;  %v8805_v24 = vcombine.low %v11822_v60, %v11822_v60  ;;  %v4751_v29 = vld [vmem:[#allocation7 + $0x810] sm:$0xff]  ;;  %v7138_v19 = vld [vmem:[#allocation10 + $0x1f8] sm:$0xff] }
 0x331   :  { %5886 = vmatmul.mubr.f32.gmra.mxu0 %v5294_v51  ;;  %5907 = vmatpush1.msra.mxu1 %v4771_v39  ;;  %v4461_v27 = vrot.slane %v3588_v8, %v10313_v9  ;;  %v4350_v14 = vrot.slane %v4329_v38, %v10313_v9  ;;  %v4336_v34 = vrot.slane %v4321_v45, %v10313_v9  ;;  %v4749_v51 = vld [vmem:[#allocation7 + $0x800] sm:$0xff]  ;;  %v7105_v38 = vld [vmem:[#allocation10 + $0xf0] sm:$0xff] }
 0x332   :  { %5802 = vmatprep.mubr.f32.mxu1 %v5464_v43  ;;  %5891 = vmatprep.mubr.f32.mxu0 %v5465_v47  ;;  %v4196_v20 = vcombine.high %v4194_v61, %v4194_v61  ;;  %v4187_v25 = vrot.slane %v4172_v42, %v10313_v9  ;;  %v4328_v50 = vrot.slane %v8798_v5, %v10313_v9  ;;  %v7088_v42 = vld [vmem:[#allocation10 + $0x68] sm:$0xff] }
 0x333   :  { %5908 = vmatprep.subr.mxu1 %v4770_v54  ;;  %v4469_v28 = vcombine.high %v4461_v27, %v4461_v27  ;;  %v4476_v13 = vrot.slane %v4461_v27, %v10313_v9  ;;  %v5301_v58 = vcombine.low %v4336_v34, %v4350_v14  ;;  %v8832_v48 = vcombine.high %v4336_v34, %v4350_v14  ;;  %v7137_v27 = vld [vmem:[#allocation10 + $0x1f0] sm:$0xff]  ;;  %v7120_v5 = vld [vmem:[#allocation10 + $0x168] sm:$0xff]  ;;  %v7135_v14 = vld [vmem:[#allocation10 + $0x1e0] sm:$0xff] }
 0x334   :  { %5909 = vmatpush1.msra.mxu1 %v4769_v40  ;;  %v5300_v16 = vcombine.low %v4196_v20, %v4187_v25  ;;  %v4468_v62 = vrot.slane %v8805_v24, %v10313_v9  ;;  %v5299_v57 = vcombine.low %v4194_v61, %v4195_v3  ;;  %v4343_v52 = vrot.slane %v4328_v50, %v10313_v9  ;;  %v7104_v61 = vld [vmem:[#allocation10 + $0xe8] sm:$0xff]  ;;  %v7134_v24 = vld [vmem:[#allocation10 + $0x1d8] sm:$0xff]  ;;  %v7101_v34 = vld [vmem:[#allocation10 + $0xd0] sm:$0xff] }
 0x335   :  { %5910 = vmatprep.subr.mxu1 %v4768_v4  ;;  %5803 = vmatmul.mubr.f32.gmra.mxu1 %v5460_v2  ;;  %v4490_v6 = vrot.slane %v4469_v28, %v10313_v9  ;;  %v4491_v55 = vcombine.high %v4476_v13, %v4476_v13  ;;  %v5323_v0 = vrot.slane %v5301_v58, %v10313_v9  ;;  %v7087_v28 = vld [vmem:[#allocation10 + $0x60] sm:$0xff]  ;;  %v7118_v20 = vld [vmem:[#allocation10 + $0x158] sm:$0xff]  ;;  %v7085_v25 = vld [vmem:[#allocation10 + $0x50] sm:$0xff] }
 0x336   :  { %5892 = vmatmul.mubr.f32.gmra.mxu0 %v5461_v59  ;;  %5911 = vmatpush1.msra.mxu1 %v4767_v33  ;;  %v5330_v39 = vrot.slane %v8832_v48, %v10313_v9  ;;  %v5316_v46 = vrot.slane %v5300_v16, %v10313_v9  ;;  %v4483_v43 = vrot.slane %v4468_v62, %v10313_v9  ;;  %v7117_v3 = vld [vmem:[#allocation10 + $0x150] sm:$0xff]  ;;  %v7100_v50 = vld [vmem:[#allocation10 + $0xc8] sm:$0xff]  ;;  %v7115_v16 = vld [vmem:[#allocation10 + $0x140] sm:$0xff] }
 0x337   :  { %5912 = vmatprep.subr.mxu1 %v4766_v15  ;;  %5962 = vmatprep.mubr.f32.mxu1 %v12391_v31  ;;  %v4492_v49 = vcombine.high %v4490_v6, %v4490_v6  ;;  %v5467_v63 = vcombine.low %v4490_v6, %v4491_v55  ;;  %v5466_v47 = vcombine.low %v4343_v52, %v4476_v13  ;;  %v7119_v13 = vld [vmem:[#allocation10 + $0x160] sm:$0xff]  ;;  %v7132_v58 = vld [vmem:[#allocation10 + $0x1c8] sm:$0xff]  ;;  %v7098_v62 = vld [vmem:[#allocation10 + $0xb8] sm:$0xff] }
 0x338   :  { %5913 = vmatpush1.msra.mxu1 %v4765_v37  ;;  %v5309_v54 = vrot.slane %v5299_v57, %v10313_v9  ;;  %v5332_v60 = vcombine.low %v5323_v0, %v5330_v39  ;;  %v7084_v48 = vld [vmem:[#allocation10 + $0x48] sm:$0xff]  ;;  %v7099_v55 = vld [vmem:[#allocation10 + $0xc0] sm:$0xff]  ;;  %v7082_v57 = vld [vmem:[#allocation10 + $0x38] sm:$0xff] }
 0x339   :  { %5914 = vmatprep.subr.mxu1 %v4764_v53  ;;  %v5468_v40 = vcombine.low %v4492_v49, %v4483_v43  ;;  %v5482_v36 = vrot.slane %v5467_v63, %v10313_v9  ;;  %v5475_v8 = vrot.slane %v5466_v47, %v10313_v9  ;;  %v7106_v53 = vld [vmem:[#allocation10 + $0xf8] sm:$0xff]  ;;  %v7116_v6 = vld [vmem:[#allocation10 + $0x148] sm:$0xff]  ;;  %v7097_v0 = vld [vmem:[#allocation10 + $0xb0] sm:$0xff] }
 0x33a   :  { %5915 = vmatpush1.msra.mxu1 %v4763_v12  ;;  %v5331_v4 = vcombine.low %v5309_v54, %v5316_v46  ;;  %v5346_v2 = vrot.slane %v5332_v60, %v10313_v9  ;;  %8884 = vmatprep.subr.mxu0 %v7106_v53  ;;  %v7090_v12 = vld [vmem:[#allocation10 + $0x78] sm:$0xff]  ;;  %v7129_v39 = vld [vmem:[#allocation10 + $0x1b0] sm:$0xff]  ;;  %v7128_v46 = vld [vmem:[#allocation10 + $0x1a8] sm:$0xff] }
 0x33b   :  { %5916 = vmatprep.subr.mxu1 %v4762_v22  ;;  %v5489_v33 = vrot.slane %v5468_v40, %v10313_v9  ;;  %v5490_v45 = vcombine.low %v5475_v8, %v5482_v36  ;;  %8885 = vmatpush3.msra.mxu0 %v7090_v12  ;;  %v7089_v22 = vld [vmem:[#allocation10 + $0x70] sm:$0xff]  ;;  %v7114_v52 = vld [vmem:[#allocation10 + $0x138] sm:$0xff]  ;;  %v7080_v43 = vld [vmem:[#allocation10 + $0x28] sm:$0xff] }
 0x33c   :  { %5917 = vmatpush1.msra.mxu1 %v4761_v21  ;;  %v5339_v59 = vrot.slane %v5331_v4, %v10313_v9  ;;  %8886 = vmatprep.subr.mxu0 %v7105_v38  ;;  %v7121_v21 = vld [vmem:[#allocation10 + $0x170] sm:$0xff]  ;;  %v7112_v47 = vld [vmem:[#allocation10 + $0x128] sm:$0xff]  ;;  %v7095_v54 = vld [vmem:[#allocation10 + $0xa0] sm:$0xff] }
 0x33d   :  { %5918 = vmatprep.subr.mxu1 %v4760_v7  ;;  %v5497_v37 = vrot.slane %v5490_v45, %v10313_v9  ;;  %8887 = vmatpush3.msra.mxu0 %v7089_v22  ;;  %v7136_v7 = vld [vmem:[#allocation10 + $0x1e8] sm:$0xff]  ;;  %v7081_v49 = vld [vmem:[#allocation10 + $0x30] sm:$0xff]  ;;  %v7127_v60 = vld [vmem:[#allocation10 + $0x1a0] sm:$0xff] }
 0x33e   :  { %5919 = vmatpush1.msra.mxu1 %v4759_v23  ;;  %v5347_v15 = vcombine.low %v5339_v59, %v5346_v2  ;;  %8888 = vmatprep.subr.mxu0 %v7104_v61  ;;  %v7103_v23 = vld [vmem:[#allocation10 + $0xe0] sm:$0xff]  ;;  %v7113_v63 = vld [vmem:[#allocation10 + $0x130] sm:$0xff]  ;;  %v7094_v8 = vld [vmem:[#allocation10 + $0x98] sm:$0xff] }
 0x33f   :  { %5920 = vmatprep.subr.mxu1 %v4758_v10  ;;  %8889 = vmatpush3.msra.mxu0 %v7088_v42  ;;  %v7102_v10 = vld [vmem:[#allocation10 + $0xd8] sm:$0xff]  ;;  %v7079_v40 = vld [vmem:[#allocation10 + $0x20] sm:$0xff]  ;;  %v7092_v53 = vld [vmem:[#allocation10 + $0x88] sm:$0xff] }
 0x340   :  { %5921 = vmatpush1.msra.mxu1 %v4757_v11  ;;  %8890 = vmatprep.subr.mxu0 %v7103_v23  ;;  %v7086_v11 = vld [vmem:[#allocation10 + $0x58] sm:$0xff]  ;;  %v7111_v36 = vld [vmem:[#allocation10 + $0x120] sm:$0xff]  ;;  %v7076_v12 = vld [vmem:[#allocation10 + $0x8] sm:$0xff] }
 0x341   :  { %5922 = vmatprep.subr.mxu1 %v4756_v41  ;;  %8891 = vmatpush3.msra.mxu0 %v7087_v28  ;;  %v7133_v41 = vld [vmem:[#allocation10 + $0x1d0] sm:$0xff]  ;;  %v7126_v2 = vld [vmem:[#allocation10 + $0x198] sm:$0xff]  ;;  %v7123_v22 = vld [vmem:[#allocation10 + $0x180] sm:$0xff] }
 0x342   :  { %5923 = vmatpush1.msra.mxu1 %v4755_v18  ;;  %8892 = vmatprep.subr.mxu0 %v7102_v10  ;;  %v7110_v45 = vld [vmem:[#allocation10 + $0x118] sm:$0xff]  ;;  %v7107_v61 = vld [vmem:[#allocation10 + $0x100] sm:$0xff] }
 0x343   :  { %5924 = vmatprep.subr.mxu1 %v4754_v1  ;;  %8893 = vmatpush3.msra.mxu0 %v7086_v11  ;;  %v7131_v1 = vld [vmem:[#allocation10 + $0x1c0] sm:$0xff]  ;;  %v7170_v42 = vld [vmem:[#allocation10 + $0x2f8] sm:$0xff] }
 0x344   :  { %5925 = vmatpush1.msra.mxu1 %v4753_v44  ;;  %8894 = vmatprep.subr.mxu0 %v7101_v34  ;;  %v7083_v44 = vld [vmem:[#allocation10 + $0x40] sm:$0xff] }
 0x345   :  { %5926 = vmatprep.subr.mxu1 %v4752_v17  ;;  %8895 = vmatpush3.msra.mxu0 %v7085_v25  ;;  %v7130_v17 = vld [vmem:[#allocation10 + $0x1b8] sm:$0xff] }
 0x346   :  { %5927 = vmatpush1.msra.mxu1 %v4751_v29  ;;  %8896 = vmatprep.subr.mxu0 %v7100_v50  ;;  %v4781_v25 = vld [vmem:[#allocation8] sm:$0x3] }
 0x347   :  { %5928 = vmatprep.subr.mxu1 %v4750_v32  ;;  %8897 = vmatpush3.msra.mxu0 %v7084_v48 }
 0x348   :  { %5929 = vmatpush1.msra.mxu1 %v4749_v51  ;;  %8898 = vmatprep.subr.mxu0 %v7099_v55  ;;  %v7096_v51 = vld [vmem:[#allocation10 + $0xa8] sm:$0xff] }
 0x349   :  { %5963 = vmatmul.mubr.f32.vlgmr.msra.gmra.mxu1 %v11254_v35  ;;  %v5504_v35 = vrot.slane %v5489_v33, %v10313_v9  ;;  %8919 = vmatprep.subr.mxu1 %v7138_v19  ;;  %v7078_v33 = vld [vmem:[#allocation10 + $0x18] sm:$0xff]  ;;  %v7124_v19 = vld [vmem:[#allocation10 + $0x188] sm:$0xff] }
 0x34a   :  { %5968 = vmatprep.mubr.f32.mxu1 %v12391_v31  ;;  %8899 = vmatpush3.msra.mxu0 %v7083_v44 }
 0x34b   :  { %v5505_v26 = vcombine.low %v5497_v37, %v5504_v35  ;;  %8900 = vmatprep.subr.mxu0 %v7098_v62  ;;  %v7125_v37 = vld [vmem:[#allocation10 + $0x190] sm:$0xff] }
 0x34c   :  { %8901 = vmatpush3.msra.mxu0 %v7082_v57  ;;  %v7077_v35 = vld [vmem:[#allocation10 + $0x10] sm:$0xff] }
 0x34d   :  { %5969 = vmatmul.mubr.f32.gmra.mxu1 %v11803_v30  ;;  %v7122_v30 = vld [vmem:[#allocation10 + $0x178] sm:$0xff]  ;;  %8902 = vmatprep.subr.mxu0 %v7097_v0 }
 0x34e   :  { %5974 = vmatprep.mubr.f32.mxu1 %v12391_v31  ;;  %8920 = vmatpush3.msra.mxu1 %v7122_v30  ;;  %v7108_v30 = vld [vmem:[#allocation10 + $0x108] sm:$0xff] }
 0x34f   :  { %8921 = vmatprep.subr.mxu1 %v7137_v27  ;;  %v11866_v18 = vpop.f32.mrf.mxu1  ;;  %8903 = vmatpush3.msra.mxu0 %v7081_v49  ;;  %v7091_v27 = vld [vmem:[#allocation10 + $0x80] sm:$0xff]  ;;  %v5697_v23 = vpop.f32.mrf.mxu0 }
 0x350   :  { %8922 = vmatpush3.msra.mxu1 %v7121_v21  ;;  %8904 = vmatprep.subr.mxu0 %v7096_v51  ;;  %v7075_v21 = vld [vmem:[#allocation10] sm:$0xff] }
 0x351   :  { %5975 = vmatmul.mubr.f32.gmra.mxu1 %v5347_v15  ;;  %8923 = vmatprep.subr.mxu1 %v7136_v7  ;;  %v11868_v29 = vpop.f32.mrf.mxu1  ;;  %v7093_v15 = vld [vmem:[#allocation10 + $0x90] sm:$0xff]  ;;  %v5699_v28 = vpop.f32.mrf.mxu0 }
 0x352   :  { %5980 = vmatprep.mubr.f32.mxu1 %v12391_v31  ;;  %8924 = vmatpush3.msra.mxu1 %v7120_v5  ;;  %v7202_v5 = vld [vmem:[#allocation10 + $0x3f8] sm:$0xff] }
 0x353   :  { %8925 = vmatprep.subr.mxu1 %v7135_v14  ;;  %8905 = vmatpush3.msra.mxu0 %v7080_v43 }
 0x354   :  { %8926 = vmatpush3.msra.mxu1 %v7119_v13  ;;  %8906 = vmatprep.subr.mxu0 %v7095_v54 }
 0x355   :  { %5981 = vmatmul.mubr.f32.gmra.mxu1 %v5505_v26  ;;  %8927 = vmatprep.subr.mxu1 %v7134_v24  ;;  %v7109_v26 = vld [vmem:[#allocation10 + $0x110] sm:$0xff] }
 0x356   :  { %8928 = vmatpush3.msra.mxu1 %v7118_v20  ;;  %8907 = vmatpush3.msra.mxu0 %v7079_v40 }
 0x357   :  { %8929 = vmatprep.subr.mxu1 %v7133_v41  ;;  %8908 = vmatprep.subr.mxu0 %v7094_v8  ;;  %v4785_v41 = vsub.s32 0, %v10294_v56 }
 0x358   :  { %8930 = vmatpush3.msra.mxu1 %v7117_v3  ;;  %8909 = vmatpush3.msra.mxu0 %v7078_v33 }
 0x359   :  { %8931 = vmatprep.subr.mxu1 %v7132_v58  ;;  %8910 = vmatprep.subr.mxu0 %v7093_v15  ;;  %v4789_v58 = vsub.s32 1, %v10294_v56 }
 0x35a   :  { %8932 = vmatpush3.msra.mxu1 %v7116_v6  ;;  %8911 = vmatpush3.msra.mxu0 %v7077_v35  ;;  %v4786_v6 = vrot.slane %v4781_v25, %v4785_v41 }
 0x35b   :  { %8933 = vmatprep.subr.mxu1 %v7131_v1  ;;  %8912 = vmatprep.subr.mxu0 %v7092_v53  ;;  %v4790_v1 = vrot.slane %v4781_v25, %v4789_v58 }
 0x35c   :  { %8934 = vmatpush3.msra.mxu1 %v7115_v16  ;;  %8913 = vmatpush3.msra.mxu0 %v7076_v12  ;;  %v5609_v16 = vadd.f32 %v11866_v18, %v4786_v6 }
 0x35d   :  { %8935 = vmatprep.subr.mxu1 %v7130_v17  ;;  %8914 = vmatprep.subr.mxu0 %v7091_v27  ;;  %v5611_v17 = vadd.f32 %v11868_v29, %v4790_v1 }
 0x35e   :  { %8936 = vmatpush3.msra.mxu1 %v7114_v52  ;;  %8915 = vmatpush3.msra.mxu0 %v7075_v21  ;;  %v5698_v52 = vadd.f32 %v5697_v23, %v5609_v16 }
 0x35f   :  { %8937 = vmatprep.subr.mxu1 %v7129_v39  ;;  %8954 = vmatprep.subr.mxu0 %v7170_v42  ;;  %v5700_v49 = vadd.f32 %v5699_v28, %v5611_v17 }
 0x360   :  { %8938 = vmatpush3.msra.mxu1 %v7113_v63 }
 0x361   :  { %8939 = vmatprep.subr.mxu1 %v7128_v46 }
 0x362   :  { %8940 = vmatpush3.msra.mxu1 %v7112_v47 }
 0x363   :  { %8941 = vmatprep.subr.mxu1 %v7127_v60 }
 0x364   :  { %8942 = vmatpush3.msra.mxu1 %v7111_v36 }
 0x365   :  { %8943 = vmatprep.subr.mxu1 %v7126_v2 }
 0x366   :  { %8944 = vmatpush3.msra.mxu1 %v7110_v45 }
 0x367   :  { %8945 = vmatprep.subr.mxu1 %v7125_v37 }
 0x368   :  { %8946 = vmatpush3.msra.mxu1 %v7109_v26 }
 0x369   :  { %8947 = vmatprep.subr.mxu1 %v7124_v19 }
 0x36a   :  { %8948 = vmatpush3.msra.mxu1 %v7108_v30 }
 0x36b   :  { %8949 = vmatprep.subr.mxu1 %v7123_v22 }
 0x36c   :  { %8950 = vmatpush3.msra.mxu1 %v7107_v61 }
 0x36d   :  { %8989 = vmatprep.subr.mxu1 %v7202_v5 }
 0x3ac   :  { %v11870_v32 = vpop.f32.mrf.mxu1  ;;  %v5703_v10 = vpop.f32.mrf.mxu0 }
 0x3ad   :  { %v5615_v0 = vadd.f32 %v11870_v32, %v4786_v6 }
 0x3ae   :  { %v11872_v4 = vpop.f32.mrf.mxu1  ;;  %v5705_v11 = vpop.f32.mrf.mxu0 }
 0x3af   :  { %v5617_v63 = vadd.f32 %v11872_v4, %v4790_v1  ;;  %v5704_v43 = vadd.f32 %v5703_v10, %v5615_v0 }
 0x3b1   :  { %v5706_v54 = vadd.f32 %v5705_v11, %v5617_v63 }
 0x3d2   :  { %v11874_v59 = vpop.f32.mrf.mxu1  ;;  %v5709_v20 = vpop.f32.mrf.mxu0 }
 0x3d3   :  { %v5621_v53 = vadd.f32 %v11874_v59, %v4786_v6 }
 0x3d4   :  { %v11876_v38 = vpop.f32.mrf.mxu1  ;;  %v5711_v3 = vpop.f32.mrf.mxu0 }
 0x3d5   :  { %v5623_v21 = vadd.f32 %v11876_v38, %v4790_v1 }
 0x3d7   :  { %v5712_v25 = vadd.f32 %v5711_v3, %v5623_v21 }
 0x3e2   :  { %v11878_v7 = vpop.f32.mrf.mxu1  ;;  %v5715_v48 = vpop.f32.mrf.mxu0 }
 0x3e3   :  { %v5627_v61 = vadd.f32 %v11878_v7, %v4786_v6 }
 0x3e4   :  { %v5628_v14 = vpop.f32.mrf.mxu1  ;;  %v5717_v44 = vpop.f32.mrf.mxu0 }
 0x3e5   :  { %v5629_v10 = vadd.f32 %v5628_v14, %v4790_v1  ;;  %v5716_v58 = vadd.f32 %v5715_v48, %v5627_v61 }
 0x3e7   :  { %v5786_v13 = vpop.f32.mrf.mxu1  ;;  %v5875_v57 = vpop.f32.mrf.mxu0 }
 0x3e8   :  { %v5787_v51 = vadd.f32 %v5786_v13, %v5698_v52  ;;  %v5710_v13 = vadd.f32 %v5709_v20, %v5621_v53 }
 0x3e9   :  { %v5788_v24 = vpop.f32.mrf.mxu1  ;;  %v5877_v56 = vpop.f32.mrf.mxu0 }
 0x3ea   :  { %v5789_v46 = vadd.f32 %v5788_v24, %v5700_v49  ;;  %v5876_v60 = vadd.f32 %v5875_v57, %v5787_v51  ;;  %v5718_v57 = vadd.f32 %v5717_v44, %v5629_v10 }
 0x3eb   :  { %v5792_v34 = vpop.f32.mrf.mxu1 }
 0x3ec   :  { %v5793_v40 = vadd.f32 %v5792_v34, %v5704_v43  ;;  %v5881_v18 = vpop.f32.mrf.mxu0  ;;  %v5878_v8 = vadd.f32 %v5877_v56, %v5789_v46 }
 0x3ed   :  { %v5794_v50 = vpop.f32.mrf.mxu1 }
 0x3ee   :  { %v5795_v29 = vadd.f32 %v5794_v50, %v5706_v54  ;;  %v5882_v32 = vadd.f32 %v5881_v18, %v5793_v40  ;;  %v5883_v15 = vpop.f32.mrf.mxu0 }
 0x3f0   :  { %v5798_v55 = vpop.f32.mrf.mxu1  ;;  %v5884_v35 = vadd.f32 %v5883_v15, %v5795_v29 }
 0x3f1   :  { %v5887_v42 = vpop.f32.mrf.mxu0  ;;  %v5799_v50 = vadd.f32 %v5798_v55, %v5710_v13 }
 0x3f2   :  { %v5800_v62 = vpop.f32.mrf.mxu1 }
 0x3f3   :  { %v5889_v7 = vpop.f32.mrf.mxu0  ;;  %v5801_v1 = vadd.f32 %v5800_v62, %v5712_v25  ;;  %v5888_v63 = vadd.f32 %v5887_v42, %v5799_v50 }
 0x3f5   :  { %v5804_v39 = vpop.f32.mrf.mxu1 }
 0x3f6   :  { %v5805_v52 = vadd.f32 %v5804_v39, %v5716_v58  ;;  %v5893_v3 = vpop.f32.mrf.mxu0  ;;  %v5890_v39 = vadd.f32 %v5889_v7, %v5801_v1 }
 0x3f7   :  { %v5806_v47 = vpop.f32.mrf.mxu1 }
 0x3f8   :  { %v5807_v55 = vadd.f32 %v5806_v47, %v5718_v57  ;;  %v11900_v40 = vadd.f32 %v5893_v3, %v5805_v52 }
 0x409   :  { %v5964_v36 = vpop.f32.mrf.mxu1 }
 0x40a   :  { %v5965_v2 = vadd.f32 %v5964_v36, %v5876_v60 }
 0x40b   :  { %v5966_v33 = vpop.f32.mrf.mxu1 }
 0x40c   :  { %v5967_v45 = vadd.f32 %v5966_v33, %v5878_v8  ;;  %v5987_v4 = vmax.f32 %v5965_v2, 0.0  ;;  %v5895_v33 = vpop.f32.mrf.mxu0 }
 0x40d   :  { %v5970_v37 = vpop.f32.mrf.mxu1 }
 0x40e   :  { %v5988_v26 = vmax.f32 %v5967_v45, 0.0  ;;  %v5971_v19 = vadd.f32 %v5970_v37, %v5882_v32 }
 0x40f   :  { %v5972_v12 = vpop.f32.mrf.mxu1 }
 0x410   :  { %v6003_v30 = vcombine.low %v5987_v4, %v5988_v26  ;;  %v6004_v27 = vcombine.high %v5987_v4, %v5988_v26  ;;  %v5973_v22 = vadd.f32 %v5972_v12, %v5884_v35  ;;  %v5989_v24 = vmax.f32 %v5971_v19, 0.0 }
 0x411   :  { %v5976_v43 = vpop.f32.mrf.mxu1  ;;  %v11906_v4 = vadd.f32 %v5895_v33, %v5807_v55 }
 0x412   :  { %v6011_v5 = vrot.slane %v6003_v30, %v10313_v9  ;;  %v6018_v23 = vrot.slane %v6004_v27, %v10313_v9  ;;  %v5990_v28 = vmax.f32 %v5973_v22, 0.0  ;;  %v5977_v22 = vadd.f32 %v5976_v43, %v5888_v63 }
 0x413   :  { %v5978_v35 = vpop.f32.mrf.mxu1 }
 0x414   :  { %v6019_v11 = vcombine.high %v6011_v5, %v6011_v5  ;;  %v6020_v59 = vcombine.high %v6018_v23, %v6018_v23  ;;  %v6027_v34 = vrot.slane %v6011_v5, %v10313_v9  ;;  %v6034_v41 = vrot.slane %v6018_v23, %v10313_v9 }
 0x415   :  { %v6053_v38 = vcombine.low %v5989_v24, %v5990_v28  ;;  %v6054_v17 = vcombine.high %v5989_v24, %v5990_v28  ;;  %v5979_v5 = vadd.f32 %v5978_v35, %v5890_v39 }
 0x416   :  { %v6041_v6 = vrot.slane %v6019_v11, %v10313_v9  ;;  %v6049_v16 = vcombine.high %v6027_v34, %v6027_v34  ;;  %v6048_v20 = vrot.slane %v6020_v59, %v10313_v9  ;;  %v6050_v14 = vcombine.high %v6034_v41, %v6034_v41 }
 0x417   :  { %v6061_v49 = vrot.slane %v6053_v38, %v10313_v9  ;;  %v6068_v46 = vrot.slane %v6054_v17, %v10313_v9  ;;  %v6339_v60 = vrot.slane %v6034_v41, %v10313_v9  ;;  %v5991_v38 = vmax.f32 %v5977_v22, 0.0 }
 0x418   :  { %v6201_v0 = vcombine.low %v6027_v34, %v6041_v6  ;;  %v8839_v51 = vcombine.high %v6027_v34, %v6041_v6  ;;  %v6051_v56 = vcombine.high %v6041_v6, %v6041_v6  ;;  %v6263_v48 = vcombine.low %v6041_v6, %v6049_v16 }
 0x419   :  { %v6387_v62 = vcombine.low %v6048_v20, %v6050_v14  ;;  %v6052_v18 = vcombine.high %v6048_v20, %v6048_v20  ;;  %v6069_v36 = vcombine.high %v6061_v49, %v6061_v49  ;;  %v6215_v8 = vrot.slane %v6049_v16, %v10313_v9 }
 0x41a   :  { %v6208_v54 = vrot.slane %v6201_v0, %v10313_v9  ;;  %v6332_v44 = vrot.slane %v8839_v51, %v10313_v9  ;;  %v6077_v2 = vrot.slane %v6061_v49, %v10313_v9  ;;  %v6270_v45 = vrot.slane %v6263_v48, %v10313_v9 }
 0x41b   :  { %v6277_v32 = vrot.slane %v6051_v56, %v10313_v9  ;;  %v8840_v15 = vcombine.high %v6034_v41, %v6048_v20  ;;  %v6070_v37 = vcombine.high %v6068_v46, %v6068_v46  ;;  %v6394_v19 = vrot.slane %v6387_v62, %v10313_v9 }
 0x41c   :  { %v6340_v47 = vcombine.low %v6332_v44, %v6339_v60  ;;  %v6341_v29 = vcombine.high %v6332_v44, %v6339_v60  ;;  %v6216_v26 = vcombine.low %v6208_v54, %v6215_v8  ;;  %v6217_v53 = vcombine.high %v6208_v54, %v6215_v8  ;;  %v5982_v54 = vpop.f32.mrf.mxu1 }
 0x41d   :  { %v6084_v12 = vrot.slane %v6068_v46, %v10313_v9  ;;  %v6091_v30 = vrot.slane %v6069_v36, %v10313_v9  ;;  %v6401_v27 = vrot.slane %v6052_v18, %v10313_v9  ;;  %v6511_v42 = vcombine.low %v6052_v18, %v6077_v2 }
 0x41e   :  { %v6348_v21 = vrot.slane %v6340_v47, %v10313_v9  ;;  %v6355_v61 = vrot.slane %v6341_v29, %v10313_v9  ;;  %v6278_v23 = vcombine.low %v6270_v45, %v6277_v32  ;;  %v6279_v28 = vcombine.high %v6270_v45, %v6277_v32 }
 0x41f   :  { %v6456_v13 = vrot.slane %v8840_v15, %v10313_v9  ;;  %v6098_v10 = vrot.slane %v6070_v37, %v10313_v9  ;;  %v11917_v24 = vrot.slane %v6216_v26, %v10313_v9  ;;  %v11920_v11 = vrot.slane %v6217_v53, %v10313_v9  ;;  %v5984_v26 = vpop.f32.mrf.mxu1 }
 0x420   :  { %v6402_v59 = vcombine.low %v6394_v19, %v6401_v27  ;;  %v6463_v34 = vrot.slane %v6077_v2, %v10313_v9  ;;  %v6100_v41 = vcombine.high %v6084_v12, %v6084_v12  ;;  %v6403_v25 = vcombine.high %v6394_v19, %v6401_v27 }
 0x421   :  { %v8842_v50 = vcombine.high %v6077_v2, %v6091_v30  ;;  %v6761_v58 = vcombine.low %v6348_v21, %v6355_v61  ;;  %v6518_v7 = vrot.slane %v6511_v42, %v10313_v9  ;;  %v6525_v6 = vrot.slane %v6091_v30, %v10313_v9 }
 0x422   :  { %v5992_v16 = vmax.f32 %v5979_v5, 0.0  ;;  %v11926_v17 = vrot.slane %v6278_v23, %v10313_v9  ;;  %v11929_v57 = vrot.slane %v6279_v28, %v10313_v9  ;;  %v6101_v20 = vcombine.high %v6091_v30, %v6091_v30 }
 0x423   :  { %v6697_v14 = vcombine.low %v6084_v12, %v6098_v10  ;;  %v6759_v1 = vcombine.low %v11917_v24, %v11920_v11  ;;  %v11934_v52 = vrot.slane %v6402_v59, %v10313_v9  ;;  %v6464_v0 = vcombine.low %v6456_v13, %v6463_v34 }
 0x424   :  { %v6465_v49 = vcombine.high %v6456_v13, %v6463_v34  ;;  %v11937_v63 = vrot.slane %v6403_v25, %v10313_v9  ;;  %v6580_v51 = vrot.slane %v8842_v50, %v10313_v9  ;;  %v11944_v55 = vrot.slane %v6100_v41, %v10313_v9 }
 0x425   :  { %v11941_v3 = vrot.slane %v6697_v14, %v10313_v9  ;;  %v11947_v56 = vrot.slane %v6761_v58, %v10313_v9  ;;  %v6526_v48 = vcombine.low %v6518_v7, %v6525_v6  ;;  %v6587_v46 = vrot.slane %v6084_v12, %v10313_v9 }
 0x426   :  { %v6103_v43 = vcombine.low %v5991_v38, %v5992_v16  ;;  %v6527_v44 = vcombine.high %v6518_v7, %v6525_v6  ;;  %v6635_v60 = vcombine.low %v6101_v20, %v6084_v12  ;;  %v11955_v18 = vrot.slane %v6464_v0, %v10313_v9 }
 0x427   :  { %v6712_v62 = vcombine.low %v11941_v3, %v11944_v55  ;;  %v6713_v39 = vcombine.high %v11941_v3, %v11944_v55  ;;  %v11958_v36 = vrot.slane %v6465_v49, %v10313_v9  ;;  %v6104_v8 = vcombine.high %v5991_v38, %v5992_v16 }
 0x428   :  { %v6111_v47 = vrot.slane %v6103_v43, %v10313_v9  ;;  %v6588_v29 = vcombine.low %v6580_v51, %v6587_v46  ;;  %v11962_v2 = vrot.slane %v6098_v10, %v10313_v9  ;;  %v6762_v33 = vcombine.low %v11934_v52, %v11937_v63 }
 0x429   :  { %v6102_v45 = vcombine.high %v6098_v10, %v6098_v10  ;;  %v11967_v32 = vrot.slane %v6526_v48, %v10313_v9  ;;  %v6118_v15 = vrot.slane %v6104_v8, %v10313_v9  ;;  %v11972_v53 = vrot.slane %v6527_v44, %v10313_v9 }
 0x42a   :  { %v6119_v37 = vcombine.high %v6111_v47, %v6111_v47  ;;  %v6127_v35 = vrot.slane %v6111_v47, %v10313_v9  ;;  %v6589_v19 = vcombine.high %v6580_v51, %v6587_v46  ;;  %v11975_v12 = vrot.slane %v6635_v60, %v10313_v9 }
 0x42b   :  { %v5983_v30 = vadd.f32 %v5982_v54, %v11900_v40  ;;  %v6120_v27 = vcombine.high %v6118_v15, %v6118_v15  ;;  %v11979_v22 = vrot.slane %v6118_v15, %v10313_v9  ;;  %v11983_v42 = vrot.slane %v6588_v29, %v10313_v9 }
 0x42c   :  { %v6141_v21 = vrot.slane %v6119_v37, %v10313_v9  ;;  %v6149_v61 = vcombine.high %v6127_v35, %v6127_v35  ;;  %v6826_v5 = vcombine.low %v11955_v18, %v11958_v36  ;;  %v6232_v23 = vcombine.low %v6102_v45, %v6127_v35  ;;  %v7149_v18 = vld [vmem:[#allocation10 + $0x250] sm:$0xff] }
 0x42d   :  { %v5985_v28 = vadd.f32 %v5984_v26, %v11906_v4  ;;  %v11989_v13 = vrot.slane %v6120_v27, %v10313_v9  ;;  %v6150_v40 = vcombine.high %v11979_v22, %v11979_v22  ;;  %v11995_v34 = vrot.slane %v6589_v19, %v10313_v9  ;;  %v7181_v36 = vld [vmem:[#allocation10 + $0x350] sm:$0xff] }
 0x42e   :  { %v6151_v10 = vcombine.high %v6141_v21, %v6141_v21  ;;  %v6246_v59 = vrot.slane %v6141_v21, %v10313_v9  ;;  %v6239_v41 = vrot.slane %v6232_v23, %v10313_v9  ;;  %v6294_v25 = vcombine.low %v6127_v35, %v6141_v21 }
 0x42f   :  { %v6356_v50 = vcombine.low %v6141_v21, %v6149_v61  ;;  %v6308_v38 = vrot.slane %v6149_v61, %v10313_v9  ;;  %v6418_v58 = vcombine.low %v11979_v22, %v11989_v13  ;;  %v5993_v7 = vmax.f32 %v5983_v30, 0.0 }
 0x430   :  { %v6370_v4 = vrot.slane %v6151_v10, %v10313_v9  ;;  %v6247_v6 = vcombine.low %v6239_v41, %v6246_v59  ;;  %v6248_v16 = vcombine.high %v6239_v41, %v6246_v59  ;;  %v6301_v20 = vrot.slane %v6294_v25, %v10313_v9 }
 0x431   :  { %v6363_v14 = vrot.slane %v6356_v50, %v10313_v9  ;;  %v6152_v0 = vcombine.high %v11989_v13, %v11989_v13  ;;  %v6425_v49 = vrot.slane %v6418_v58, %v10313_v9  ;;  %v6432_v51 = vrot.slane %v6150_v40, %v10313_v9 }
 0x432   :  { %v5994_v48 = vmax.f32 %v5985_v28, 0.0  ;;  %v6255_v46 = vrot.slane %v6247_v6, %v10313_v9  ;;  %v6262_v43 = vrot.slane %v6248_v16, %v10313_v9  ;;  %v6309_v54 = vcombine.low %v6301_v20, %v6308_v38 }
 0x433   :  { %v6310_v44 = vcombine.high %v6301_v20, %v6308_v38  ;;  %v6371_v60 = vcombine.low %v6363_v14, %v6370_v4  ;;  %v6372_v8 = vcombine.high %v6363_v14, %v6370_v4  ;;  %v6433_v47 = vcombine.low %v6425_v49, %v6432_v51 }
 0x434   :  { %v6434_v29 = vcombine.high %v6425_v49, %v6432_v51  ;;  %v6317_v45 = vrot.slane %v6309_v54, %v10313_v9  ;;  %v6480_v37 = vcombine.low %v11989_v13, %v6150_v40  ;;  %v6760_v35 = vcombine.low %v11926_v17, %v11929_v57 }
 0x435   :  { %v6324_v15 = vrot.slane %v6310_v44, %v10313_v9  ;;  %v6379_v26 = vrot.slane %v6371_v60, %v10313_v9  ;;  %v6386_v19 = vrot.slane %v6372_v8, %v10313_v9  ;;  %v6441_v30 = vrot.slane %v6433_v47, %v10313_v9 }
 0x436   :  { %v6448_v27 = vrot.slane %v6434_v29, %v10313_v9  ;;  %v6650_v21 = vcombine.low %v11975_v12, %v11962_v2  ;;  %v6651_v61 = vcombine.high %v11975_v12, %v11962_v2  ;;  %v6769_v17 = vrot.slane %v6759_v1, %v10313_v9 }
 0x437   :  { %v6918_v23 = vcombine.low %v6317_v45, %v6324_v15  ;;  %v12028_v57 = vrot.slane %v6152_v0, %v10313_v9  ;;  %v6917_v28 = vcombine.low %v6255_v46, %v6262_v43  ;;  %v6153_v40 = vcombine.low %v5993_v7, %v5994_v48 }
 0x438   :  { %v6154_v10 = vcombine.high %v5993_v7, %v5994_v48  ;;  %v6919_v59 = vcombine.low %v6379_v26, %v6386_v19  ;;  %v6920_v41 = vcombine.low %v6441_v30, %v6448_v27  ;;  %v6776_v25 = vrot.slane %v6760_v35, %v10313_v9 }
 0x439   :  { %v12035_v2 = vrot.slane %v6762_v33, %v10313_v9  ;;  %v12038_v12 = vrot.slane %v6480_v37, %v10313_v9  ;;  %v8841_v24 = vcombine.high %v11979_v22, %v11989_v13  ;;  %v6161_v11 = vrot.slane %v6153_v40, %v10313_v9 }
 0x43a   :  { %v6168_v1 = vrot.slane %v6154_v10, %v10313_v9  ;;  %v12045_v50 = vrot.slane %v6650_v21, %v10313_v9  ;;  %v6791_v38 = vcombine.low %v6769_v17, %v6776_v25  ;;  %v6792_v4 = vcombine.high %v6769_v17, %v6776_v25 }
 0x43b   :  { %v6934_v58 = vrot.slane %v6918_v23, %v10313_v9  ;;  %v12049_v52 = vrot.slane %v6651_v61, %v10313_v9  ;;  %v6169_v63 = vcombine.high %v6161_v11, %v6161_v11  ;;  %v6177_v33 = vrot.slane %v6161_v11, %v10313_v9 }
 0x43c   :  { %v6793_v22 = vcombine.low %v11947_v56, %v12035_v2  ;;  %v6948_v13 = vrot.slane %v6920_v41, %v10313_v9  ;;  %v6170_v7 = vcombine.high %v6168_v1, %v6168_v1  ;;  %v6927_v6 = vrot.slane %v6917_v28, %v10313_v9 }
 0x43d   :  { %v6941_v16 = vrot.slane %v6919_v59, %v10313_v9  ;;  %v6495_v20 = vcombine.low %v12038_v12, %v12028_v57  ;;  %v12060_v14 = vrot.slane %v8841_v24, %v10313_v9  ;;  %v6191_v0 = vrot.slane %v6169_v63, %v10313_v9 }
 0x43e   :  { %v6199_v49 = vcombine.high %v6177_v33, %v6177_v33  ;;  %v6184_v51 = vrot.slane %v6168_v1, %v10313_v9  ;;  %v6801_v48 = vrot.slane %v6791_v38, %v10313_v9  ;;  %v6808_v46 = vrot.slane %v6792_v4, %v10313_v9 }
 0x43f   :  { %v6949_v43 = vcombine.low %v6927_v6, %v6934_v58  ;;  %v6200_v54 = vcombine.high %v6191_v0, %v6191_v0  ;;  %v6556_v44 = vrot.slane %v6177_v33, %v10313_v9  ;;  %v12068_v8 = vrot.slane %v6793_v22, %v10313_v9 }
 0x440   :  { %v6604_v60 = vcombine.low %v6191_v0, %v6199_v49  ;;  %v6198_v47 = vrot.slane %v6170_v7, %v10313_v9  ;;  %v8843_v29 = vcombine.high %v6177_v33, %v6191_v0  ;;  %v6951_v45 = vcombine.low %v6941_v16, %v6948_v13 }
 0x441   :  { %v6959_v15 = vrot.slane %v6949_v43, %v10313_v9  ;;  %v6496_v37 = vcombine.high %v12038_v12, %v12028_v57  ;;  %v6618_v26 = vrot.slane %v6200_v54, %v10313_v9  ;;  %v6950_v19 = vcombine.high %v6927_v6, %v6934_v58 }
 0x442   :  { %v6611_v35 = vrot.slane %v6604_v60, %v10313_v9  ;;  %v12077_v30 = vrot.slane %v6495_v20, %v10313_v9  ;;  %v6673_v27 = vrot.slane %v8843_v29, %v10313_v9  ;;  %v6728_v21 = vcombine.low %v6200_v54, %v6184_v51 }
 0x443   :  { %v6973_v61 = vrot.slane %v6951_v45, %v10313_v9  ;;  %v6557_v23 = vcombine.low %v12060_v14, %v6556_v44  ;;  %v6680_v17 = vrot.slane %v6184_v51, %v10313_v9  ;;  %v6824_v28 = vcombine.high %v6801_v48, %v12068_v8 }
 0x444   :  { %v8845_v57 = vcombine.low %v6801_v48, %v6808_v46  ;;  %v6619_v40 = vcombine.low %v6611_v35, %v6618_v26  ;;  %v6735_v10 = vrot.slane %v6728_v21, %v10313_v9  ;;  %v6742_v59 = vrot.slane %v6198_v47, %v10313_v9 }
 0x445   :  { %v6982_v41 = vcombine.high %v6959_v15, %v6973_v61  ;;  %v6558_v25 = vcombine.high %v12060_v14, %v6556_v44  ;;  %v6620_v12 = vcombine.high %v6611_v35, %v6618_v26  ;;  %v6966_v24 = vrot.slane %v6950_v19, %v10313_v9 }
 0x446   :  { %v8847_v11 = vcombine.low %v6824_v28, %v6959_v15  ;;  %v6681_v1 = vcombine.low %v6673_v27, %v6680_v17  ;;  %v6682_v38 = vcombine.high %v6673_v27, %v6680_v17  ;;  %v6743_v4 = vcombine.low %v6735_v10, %v6742_v59 }
 0x447   :  { %v6744_v58 = vcombine.high %v6735_v10, %v6742_v59  ;;  %v8849_v63 = vcombine.low %v6966_v24, %v6982_v41  ;;  %v7382_v33 = vrot.slane %v8845_v57, %v10313_v9  ;;  %v6794_v7 = vcombine.high %v11947_v56, %v12035_v2 }
 0x448   :  { %v7396_v22 = vrot.slane %v8847_v11, %v10313_v9  ;;  %v6627_v6 = vrot.slane %v6619_v40, %v10313_v9  ;;  %v12094_v20 = vrot.slane %v6743_v4, %v10313_v9  ;;  %v6952_v0 = vcombine.high %v6941_v16, %v6948_v13 }
 0x449   :  { %v12097_v14 = vrot.slane %v6744_v58, %v10313_v9  ;;  %v6634_v49 = vrot.slane %v6620_v12, %v10313_v9  ;;  %v7410_v51 = vrot.slane %v8849_v63, %v10313_v9  ;;  %v6689_v43 = vrot.slane %v6681_v1, %v10313_v9  ;;  %v7154_v12 = vld [vmem:[#allocation10 + $0x278] sm:$0xff]  ;;  %v7153_v63 = vld [vmem:[#allocation10 + $0x270] sm:$0xff] }
 0x44a   :  { %v7418_v48 = vcombine.low %v7382_v33, %v7396_v22  ;;  %v7419_v46 = vcombine.high %v7382_v33, %v7396_v22  ;;  %v6822_v2 = vrot.slane %v6794_v7, %v10313_v9  ;;  %v6980_v54 = vrot.slane %v6952_v0, %v10313_v9  ;;  %v7200_v33 = vld [vmem:[#allocation10 + $0x3e8] sm:$0xff] }
 0x44b   :  { %v7051_v56 = vcombine.low %v12094_v20, %v12097_v14  ;;  %v6696_v44 = vrot.slane %v6682_v38, %v10313_v9  ;;  %v7422_v60 = vcombine.high %v7410_v51, %v7410_v51  ;;  %v7458_v13 = vrot.slane %v7410_v51, %v10313_v9  ;;  %v7184_v0 = vld [vmem:[#allocation10 + $0x368] sm:$0xff]  ;;  %v7142_v14 = vld [vmem:[#allocation10 + $0x218] sm:$0xff] }
 0x44c   :  { %v7430_v16 = vrot.slane %v7418_v48, %v10313_v9  ;;  %v6510_v47 = vrot.slane %v6496_v37, %v10313_v9  ;;  %v6981_v29 = vcombine.low %v6959_v15, %v6973_v61  ;;  %v6983_v45 = vcombine.low %v6966_v24, %v6980_v54  ;;  %v7167_v48 = vld [vmem:[#allocation10 + $0x2e0] sm:$0xff] }
 0x44d   :  { %v8846_v35 = vcombine.low %v12068_v8, %v6822_v2  ;;  %v6565_v26 = vrot.slane %v6557_v23, %v10313_v9  ;;  %v6572_v19 = vrot.slane %v6558_v25, %v10313_v9  ;;  %v7444_v27 = vrot.slane %v7419_v46, %v10313_v9  ;;  %v7186_v23 = vld [vmem:[#allocation10 + $0x378] sm:$0xff]  ;;  %v7199_v46 = vld [vmem:[#allocation10 + $0x3e0] sm:$0xff] }
 0x44e   :  { %v7472_v21 = vrot.slane %v7422_v60, %v10313_v9  ;;  %v6827_v17 = vcombine.low %v11967_v32, %v11972_v53  ;;  %v6986_v28 = vcombine.low %v6627_v6, %v6634_v49  ;;  %v8848_v57 = vcombine.high %v12068_v8, %v6981_v29  ;;  %v7169_v8 = vld [vmem:[#allocation10 + $0x2f0] sm:$0xff]  ;;  %v7152_v6 = vld [vmem:[#allocation10 + $0x268] sm:$0xff]  ;;  %v7151_v54 = vld [vmem:[#allocation10 + $0x260] sm:$0xff] }
 0x44f   :  { %v8850_v40 = vcombine.high %v6983_v45, %v6973_v61  ;;  %v6987_v37 = vcombine.low %v6689_v43, %v6696_v44  ;;  %v7480_v59 = vcombine.low %v7430_v16, %v7458_v13  ;;  %v7481_v41 = vcombine.high %v7430_v16, %v7458_v13  ;;  %v7201_v61 = vld [vmem:[#allocation10 + $0x3f0] sm:$0xff]  ;;  %v7183_v44 = vld [vmem:[#allocation10 + $0x360] sm:$0xff]  ;;  %v7166_v13 = vld [vmem:[#allocation10 + $0x2d8] sm:$0xff] }
 0x450   :  { %v7484_v15 = vcombine.low %v7444_v27, %v7472_v21  ;;  %v7485_v10 = vcombine.high %v7444_v27, %v7472_v21  ;;  %v12119_v25 = vrot.slane %v8846_v35, %v10313_v9  ;;  %v12122_v24 = vrot.slane %v8848_v57, %v10313_v9  ;;  %v7198_v16 = vld [vmem:[#allocation10 + $0x3d8] sm:$0xff]  ;;  %v7165_v27 = vld [vmem:[#allocation10 + $0x2d0] sm:$0xff]  ;;  %v7196_v57 = vld [vmem:[#allocation10 + $0x3c8] sm:$0xff] }
 0x451   :  { %v12125_v11 = vrot.slane %v8850_v40, %v10313_v9  ;;  %v6829_v32 = vcombine.low %v12045_v50, %v12049_v52  ;;  %v6985_v53 = vcombine.low %v6565_v26, %v6572_v19  ;;  %v6984_v1 = vcombine.low %v12077_v30, %v6510_v47  ;;  %v7185_v50 = vld [vmem:[#allocation10 + $0x370] sm:$0xff]  ;;  %v7150_v29 = vld [vmem:[#allocation10 + $0x258] sm:$0xff]  ;;  %v7148_v40 = vld [vmem:[#allocation10 + $0x248] sm:$0xff] }
 0x452   :  { %7745 = vmatprep.mubr.f32.mxu0 %v7484_v15  ;;  %7815 = vmatprep.mubr.f32.mxu1 %v7485_v10  ;;  %v6828_v38 = vcombine.low %v11983_v42, %v11995_v34  ;;  %v7421_v4 = vcombine.high %v12119_v25, %v12122_v24  ;;  %v12140_v52 = vrot.slane %v6712_v62, %v10313_v9  ;;  %v7168_v34 = vld [vmem:[#allocation10 + $0x2e8] sm:$0xff]  ;;  %v7182_v45 = vld [vmem:[#allocation10 + $0x358] sm:$0xff]  ;;  %v7197_v21 = vld [vmem:[#allocation10 + $0x3d0] sm:$0xff] }
 0x453   :  { %7746 = vmatmul.mubr.f32.vlgmr.msra.gmra.mxu0 %v7480_v59  ;;  %7816 = vmatmul.mubr.f32.vlgmr.msra.gmra.mxu1 %v7481_v41  ;;  %v7423_v58 = vcombine.high %v12125_v11, %v12125_v11  ;;  %v12143_v30 = vrot.slane %v6986_v28, %v10313_v9  ;;  %v12146_v42 = vrot.slane %v6987_v37, %v10313_v9  ;;  %v7164_v28 = vld [vmem:[#allocation10 + $0x2c8] sm:$0xff]  ;;  %v7163_v41 = vld [vmem:[#allocation10 + $0x2c0] sm:$0xff] }
 0x454   :  { %8955 = vmatpush3.msra.mxu0 %v7154_v12  ;;  %8990 = vmatpush3.msra.mxu1 %v7186_v23  ;;  %v12152_v22 = vrot.slane %v6713_v39, %v10313_v9  ;;  %v7451_v62 = vrot.slane %v7421_v4, %v10313_v9  ;;  %v12157_v49 = vrot.slane %v6829_v32, %v10313_v9  ;;  %v7180_v37 = vld [vmem:[#allocation10 + $0x348] sm:$0xff]  ;;  %v7195_v12 = vld [vmem:[#allocation10 + $0x3c0] sm:$0xff]  ;;  %v7194_v4 = vld [vmem:[#allocation10 + $0x3b8] sm:$0xff] }
 0x455   :  { %8956 = vmatprep.subr.mxu0 %v7169_v8  ;;  %v7479_v7 = vrot.slane %v7423_v58, %v10313_v9  ;;  %8991 = vmatprep.subr.mxu1 %v7201_v61  ;;  %v12160_v51 = vrot.slane %v6984_v1, %v10313_v9  ;;  %v12163_v3 = vrot.slane %v6985_v53, %v10313_v9  ;;  %v7147_v32 = vld [vmem:[#allocation10 + $0x240] sm:$0xff]  ;;  %v7146_v58 = vld [vmem:[#allocation10 + $0x238] sm:$0xff] }
 0x456   :  { %8957 = vmatpush3.msra.mxu0 %v7153_v63  ;;  %8992 = vmatpush3.msra.mxu1 %v7185_v50  ;;  %v12166_v43 = vrot.slane %v6828_v38, %v10313_v9  ;;  %v7018_v2 = vcombine.low %v12143_v30, %v12146_v42  ;;  %v12171_v60 = vrot.slane %v6827_v17, %v10313_v9  ;;  %v7179_v53 = vld [vmem:[#allocation10 + $0x340] sm:$0xff]  ;;  %v7162_v38 = vld [vmem:[#allocation10 + $0x2b8] sm:$0xff] }
 0x457   :  { %v7486_v55 = vcombine.low %v7451_v62, %v7479_v7  ;;  %v7487_v39 = vcombine.high %v7451_v62, %v7479_v7  ;;  %8958 = vmatprep.subr.mxu0 %v7168_v34  ;;  %8993 = vmatprep.subr.mxu1 %v7200_v33  ;;  %v6836_v47 = vrot.slane %v6826_v5, %v10313_v9  ;;  %v7178_v63 = vld [vmem:[#allocation10 + $0x338] sm:$0xff]  ;;  %v7161_v34 = vld [vmem:[#allocation10 + $0x2b0] sm:$0xff] }
 0x458   :  { %8959 = vmatpush3.msra.mxu0 %v7152_v6  ;;  %8994 = vmatpush3.msra.mxu1 %v7184_v0  ;;  %v6860_v35 = vcombine.low %v12166_v43, %v12157_v49  ;;  %v7016_v26 = vcombine.low %v12160_v51, %v12163_v3  ;;  %v6893_v19 = vcombine.low %v12140_v52, %v12152_v22  ;;  %v7193_v33 = vld [vmem:[#allocation10 + $0x3b0] sm:$0xff] }
 0x459   :  { %7885 = vmatprep.mubr.f32.mxu0 %v7486_v55  ;;  %7955 = vmatprep.mubr.f32.mxu1 %v7487_v39  ;;  %v6858_v5 = vcombine.low %v6836_v47, %v12171_v60  ;;  %v12185_v17 = vrot.slane %v7018_v2, %v10313_v9  ;;  %v7017_v10 = vcombine.high %v12160_v51, %v12163_v3  ;;  %v7145_v62 = vld [vmem:[#allocation10 + $0x230] sm:$0xff]  ;;  %v7160_v51 = vld [vmem:[#allocation10 + $0x2a8] sm:$0xff]  ;;  %v7159_v2 = vld [vmem:[#allocation10 + $0x2a0] sm:$0xff] }
 0x45a   :  { %8960 = vmatprep.subr.mxu0 %v7167_v48  ;;  %8995 = vmatprep.subr.mxu1 %v7199_v46  ;;  %v12188_v15 = vrot.slane %v6860_v35, %v10313_v9  ;;  %v12193_v59 = vrot.slane %v7016_v26, %v10313_v9  ;;  %v6900_v23 = vrot.slane %v6893_v19, %v10313_v9  ;;  %v7177_v7 = vld [vmem:[#allocation10 + $0x330] sm:$0xff]  ;;  %v7192_v3 = vld [vmem:[#allocation10 + $0x3a8] sm:$0xff]  ;;  %v7158_v35 = vld [vmem:[#allocation10 + $0x298] sm:$0xff] }
 0x45b   :  { %8961 = vmatpush3.msra.mxu0 %v7151_v54  ;;  %8996 = vmatpush3.msra.mxu1 %v7183_v44  ;;  %v6859_v8 = vcombine.high %v6836_v47, %v12171_v60  ;;  %v12198_v61 = vrot.slane %v6858_v5, %v10313_v9  ;;  %v12205_v52 = vrot.slane %v7017_v10, %v10313_v9  ;;  %v7144_v39 = vld [vmem:[#allocation10 + $0x228] sm:$0xff]  ;;  %v7191_v54 = vld [vmem:[#allocation10 + $0x3a0] sm:$0xff]  ;;  %v7190_v26 = vld [vmem:[#allocation10 + $0x398] sm:$0xff] }
 0x45c   :  { %8962 = vmatprep.subr.mxu0 %v7166_v13  ;;  %8997 = vmatprep.subr.mxu1 %v7198_v16  ;;  %v7049_v1 = vcombine.high %v12193_v59, %v12185_v17  ;;  %v6901_v22 = vcombine.high %v6900_v23, %v6900_v23  ;;  %v6908_v55 = vrot.slane %v6900_v23, %v10313_v9  ;;  %v7176_v48 = vld [vmem:[#allocation10 + $0x328] sm:$0xff]  ;;  %v7143_v13 = vld [vmem:[#allocation10 + $0x220] sm:$0xff] }
 0x45d   :  { %8963 = vmatpush3.msra.mxu0 %v7150_v29  ;;  %8998 = vmatpush3.msra.mxu1 %v7182_v45  ;;  %v6891_v50 = vcombine.high %v12198_v61, %v12188_v15  ;;  %v6875_v6 = vrot.slane %v6859_v8, %v10313_v9  ;;  %v7058_v60 = vrot.slane %v7051_v56, %v10313_v9  ;;  %v7175_v16 = vld [vmem:[#allocation10 + $0x320] sm:$0xff]  ;;  %v7174_v56 = vld [vmem:[#allocation10 + $0x318] sm:$0xff]  ;;  %v7188_v23 = vld [vmem:[#allocation10 + $0x388] sm:$0xff] }
 0x45e   :  { %8964 = vmatprep.subr.mxu0 %v7165_v27  ;;  %8999 = vmatprep.subr.mxu1 %v7197_v21  ;;  %v8855_v0 = vcombine.low %v12205_v52, %v7049_v1  ;;  %v6915_v44 = vrot.slane %v6901_v22, %v10313_v9  ;;  %v7420_v47 = vcombine.low %v12119_v25, %v12122_v24  ;;  %v7157_v24 = vld [vmem:[#allocation10 + $0x290] sm:$0xff]  ;;  %v7172_v1 = vld [vmem:[#allocation10 + $0x308] sm:$0xff]  ;;  %v7139_v22 = vld [vmem:[#allocation10 + $0x200] sm:$0xff] }
 0x45f   :  { %8965 = vmatpush3.msra.mxu0 %v7149_v18  ;;  %9000 = vmatpush3.msra.mxu1 %v7181_v36  ;;  %v8853_v46 = vcombine.low %v6891_v50, %v12193_v59  ;;  %v8851_v29 = vcombine.low %v12198_v61, %v6875_v6  ;;  %v6916_v19 = vcombine.high %v6908_v55, %v6908_v55  ;;  %v7189_v18 = vld [vmem:[#allocation10 + $0x390] sm:$0xff]  ;;  %v7140_v61 = vld [vmem:[#allocation10 + $0x208] sm:$0xff] }
 0x460   :  { %8966 = vmatprep.subr.mxu0 %v7164_v28  ;;  %9001 = vmatprep.subr.mxu1 %v7196_v57  ;;  %v12220_v45 = vrot.slane %v8855_v0, %v10313_v9  ;;  %v7059_v27 = vcombine.high %v7058_v60, %v7058_v60  ;;  %v7066_v20 = vrot.slane %v7058_v60, %v10313_v9  ;;  %v7141_v57 = vld [vmem:[#allocation10 + $0x210] sm:$0xff]  ;;  %v7250_v60 = vld [vmem:[#allocation10 + $0x578] sm:$0xff] }
 0x461   :  { %8967 = vmatpush3.msra.mxu0 %v7148_v40  ;;  %9002 = vmatpush3.msra.mxu1 %v7180_v37  ;;  %v12224_v21 = vrot.slane %v8853_v46, %v10313_v9  ;;  %v7606_v25 = vcombine.low %v6908_v55, %v6915_v44  ;;  %v7173_v40 = vld [vmem:[#allocation10 + $0x310] sm:$0xff]  ;;  %v7437_v37 = vrot.slane %v7420_v47, %v10313_v9  ;;  %v7266_v55 = vld [vmem:[#allocation10 + $0x5f8] sm:$0xff] }
 0x462   :  { %8968 = vmatprep.subr.mxu0 %v7163_v41  ;;  %9003 = vmatprep.subr.mxu1 %v7195_v12  ;;  %v7073_v36 = vrot.slane %v7059_v27, %v10313_v9  ;;  %v7074_v5 = vcombine.high %v7066_v20, %v7066_v20  ;;  %v7607_v28 = vcombine.low %v6916_v19, %v7066_v20  ;;  %v7156_v12 = vld [vmem:[#allocation10 + $0x288] sm:$0xff]  ;;  %v7218_v46 = vld [vmem:[#allocation10 + $0x478] sm:$0xff]  ;;  %v7233_v47 = vld [vmem:[#allocation10 + $0x4f0] sm:$0xff] }
 0x463   :  { %8969 = vmatpush3.msra.mxu0 %v7147_v32  ;;  %9004 = vmatpush3.msra.mxu1 %v7179_v53  ;;  %v12229_v10 = vrot.slane %v8851_v29, %v10313_v9  ;;  %v7540_v41 = vcombine.high %v12220_v45, %v12220_v45  ;;  %v7615_v53 = vrot.slane %v7606_v25, %v10313_v9  ;;  %v7265_v29 = vld [vmem:[#allocation10 + $0x5f0] sm:$0xff]  ;;  %v7232_v27 = vld [vmem:[#allocation10 + $0x4e8] sm:$0xff]  ;;  %v7231_v25 = vld [vmem:[#allocation10 + $0x4e0] sm:$0xff] }
 0x464   :  { %8970 = vmatprep.subr.mxu0 %v7162_v38  ;;  %9005 = vmatprep.subr.mxu1 %v7194_v4  ;;  %v7608_v32 = vcombine.low %v7073_v36, %v7074_v5  ;;  %v7622_v8 = vrot.slane %v7607_v28, %v10313_v9  ;;  %v7465_v38 = vrot.slane %v12125_v11, %v10313_v9  ;;  %v7249_v19 = vld [vmem:[#allocation10 + $0x570] sm:$0xff]  ;;  %v7264_v20 = vld [vmem:[#allocation10 + $0x5e8] sm:$0xff]  ;;  %v7247_v36 = vld [vmem:[#allocation10 + $0x560] sm:$0xff] }
 0x465   :  { %8971 = vmatpush3.msra.mxu0 %v7146_v58  ;;  %9006 = vmatpush3.msra.mxu1 %v7178_v63  ;;  %v7537_v4 = vcombine.high %v12229_v10, %v12224_v21  ;;  %v7155_v58 = vld [vmem:[#allocation10 + $0x280] sm:$0xff]  ;;  %v7019_v5 = vcombine.high %v12143_v30, %v12146_v42  ;;  %v7230_v28 = vld [vmem:[#allocation10 + $0x4d8] sm:$0xff]  ;;  %v7228_v30 = vld [vmem:[#allocation10 + $0x4c8] sm:$0xff] }
 0x466   :  { %8972 = vmatprep.subr.mxu0 %v7161_v34  ;;  %9007 = vmatprep.subr.mxu1 %v7193_v33  ;;  %v7187_v63 = vld [vmem:[#allocation10 + $0x380] sm:$0xff]  ;;  %v7629_v50 = vrot.slane %v7608_v32, %v10313_v9  ;;  %v7631_v34 = vcombine.high %v7615_v53, %v7622_v8  ;;  %v7630_v33 = vcombine.low %v7615_v53, %v7622_v8  ;;  %v7245_v32 = vld [vmem:[#allocation10 + $0x550] sm:$0xff]  ;;  %v7260_v42 = vld [vmem:[#allocation10 + $0x5c8] sm:$0xff] }
 0x467   :  { %8973 = vmatpush3.msra.mxu0 %v7145_v62  ;;  %9008 = vmatpush3.msra.mxu1 %v7177_v7  ;;  %v7171_v62 = vld [vmem:[#allocation10 + $0x300] sm:$0xff]  ;;  %v7590_v7 = vrot.slane %v7540_v41, %v10313_v9  ;;  %v7482_v11 = vcombine.low %v7437_v37, %v7465_v38  ;;  %v7229_v41 = vld [vmem:[#allocation10 + $0x4d0] sm:$0xff]  ;;  %v7047_v53 = vrot.slane %v7019_v5, %v10313_v9  ;;  %v7212_v8 = vld [vmem:[#allocation10 + $0x448] sm:$0xff] }
 0x468   :  { %8974 = vmatprep.subr.mxu0 %v7160_v51  ;;  %9009 = vmatprep.subr.mxu1 %v7192_v3  ;;  %v7632_v6 = vcombine.high %v7629_v50, %v7629_v50  ;;  %v7639_v0 = vrot.slane %v7630_v33, %v10313_v9  ;;  %v7483_v51 = vcombine.high %v7437_v37, %v7465_v38  ;;  %v7234_v3 = vld [vmem:[#allocation10 + $0x4f8] sm:$0xff]  ;;  %v7227_v38 = vld [vmem:[#allocation10 + $0x4c0] sm:$0xff]  ;;  %v7220_v5 = vld [vmem:[#allocation10 + $0x488] sm:$0xff] }
 0x469   :  { %8975 = vmatpush3.msra.mxu0 %v7144_v39  ;;  %9010 = vmatpush3.msra.mxu1 %v7176_v48  ;;  %v7562_v39 = vrot.slane %v7537_v4, %v10313_v9  ;;  %v7653_v48 = vrot.slane %v7629_v50, %v10313_v9  ;;  %v7246_v37 = vld [vmem:[#allocation10 + $0x558] sm:$0xff]  ;;  %v7259_v4 = vld [vmem:[#allocation10 + $0x5c0] sm:$0xff]  ;;  %v7048_v50 = vcombine.low %v12193_v59, %v12185_v17  ;;  %v7241_v59 = vld [vmem:[#allocation10 + $0x530] sm:$0xff] }
 0x46a   :  { %8976 = vmatprep.subr.mxu0 %v7159_v2  ;;  %9011 = vmatprep.subr.mxu1 %v7191_v54  ;;  %v12245_v2 = vrot.slane %v7631_v34, %v10313_v9  ;;  %v12248_v54 = vrot.slane %v7632_v6, %v10313_v9  ;;  %v7050_v34 = vcombine.low %v12205_v52, %v7047_v53  ;;  %v7226_v33 = vld [vmem:[#allocation10 + $0x4b8] sm:$0xff]  ;;  %v7209_v6 = vld [vmem:[#allocation10 + $0x430] sm:$0xff] }
 0x46b   :  { %8977 = vmatpush3.msra.mxu0 %v7143_v13  ;;  %9012 = vmatpush3.msra.mxu1 %v7175_v16  ;;  %v7602_v44 = vcombine.low %v7562_v39, %v7590_v7  ;;  %v12250_v13 = vcombine.low %v7639_v0, %v7653_v48  ;;  %v7603_v16 = vcombine.high %v7562_v39, %v7590_v7  ;;  %v7225_v7 = vld [vmem:[#allocation10 + $0x4b0] sm:$0xff]  ;;  %v7240_v39 = vld [vmem:[#allocation10 + $0x528] sm:$0xff] }
 0x46c   :  { %8978 = vmatprep.subr.mxu0 %v7158_v35  ;;  %9013 = vmatprep.subr.mxu1 %v7190_v26  ;;  %v7662_v35 = vcombine.low %v12245_v2, %v12248_v54  ;;  %v7217_v26 = vld [vmem:[#allocation10 + $0x470] sm:$0xff]  ;;  %v8854_v52 = vcombine.high %v12188_v15, %v7048_v50  ;;  %v8856_v0 = vcombine.high %v7050_v34, %v12185_v17  ;;  %v7356_v2 = vld [vmem:[#allocation10 + $0x8c8] sm:$0xff] }
 0x46d   :  { %8979 = vmatpush3.msra.mxu0 %v7142_v14  ;;  %9014 = vmatpush3.msra.mxu1 %v7174_v56  ;;  %v7216_v14 = vld [vmem:[#allocation10 + $0x468] sm:$0xff]  ;;  %v7281_v50 = vld [vmem:[#allocation10 + $0x670] sm:$0xff] }
 0x46e   :  { %8980 = vmatprep.subr.mxu0 %v7157_v24  ;;  %9015 = vmatprep.subr.mxu1 %v7189_v18  ;;  %v7248_v56 = vld [vmem:[#allocation10 + $0x568] sm:$0xff]  ;;  %v7263_v24 = vld [vmem:[#allocation10 + $0x5e0] sm:$0xff]  ;;  %v12267_v17 = vrot.slane %v8854_v52, %v10313_v9  ;;  %v7313_v34 = vld [vmem:[#allocation10 + $0x770] sm:$0xff] }
 0x46f   :  { %8981 = vmatpush3.msra.mxu0 %v7141_v57  ;;  %9016 = vmatpush3.msra.mxu1 %v7173_v40  ;;  %v7215_v18 = vld [vmem:[#allocation10 + $0x460] sm:$0xff]  ;;  %v7262_v57 = vld [vmem:[#allocation10 + $0x5d8] sm:$0xff]  ;;  %v7340_v54 = vld [vmem:[#allocation10 + $0x848] sm:$0xff] }
 0x470   :  { %8982 = vmatprep.subr.mxu0 %v7156_v12  ;;  %9017 = vmatprep.subr.mxu1 %v7188_v23  ;;  %v7214_v40 = vld [vmem:[#allocation10 + $0x458] sm:$0xff]  ;;  %v7261_v12 = vld [vmem:[#allocation10 + $0x5d0] sm:$0xff] }
 0x471   :  { %8983 = vmatpush3.msra.mxu0 %v7140_v61  ;;  %9018 = vmatpush3.msra.mxu1 %v7172_v1  ;;  %v7213_v23 = vld [vmem:[#allocation10 + $0x450] sm:$0xff]  ;;  %v7244_v61 = vld [vmem:[#allocation10 + $0x548] sm:$0xff]  ;;  %v6861_v1 = vcombine.high %v12166_v43, %v12157_v49  ;;  %v7210_v49 = vld [vmem:[#allocation10 + $0x438] sm:$0xff] }
 0x472   :  { %8984 = vmatprep.subr.mxu0 %v7155_v58  ;;  %9019 = vmatprep.subr.mxu1 %v7187_v63  ;;  %v7211_v58 = vld [vmem:[#allocation10 + $0x440] sm:$0xff]  ;;  %v7242_v43 = vld [vmem:[#allocation10 + $0x538] sm:$0xff] }
 0x473   :  { %8985 = vmatpush3.msra.mxu0 %v7139_v22  ;;  %9020 = vmatpush3.msra.mxu1 %v7171_v62  ;;  %v7243_v63 = vld [vmem:[#allocation10 + $0x540] sm:$0xff]  ;;  %v7258_v22 = vld [vmem:[#allocation10 + $0x5b8] sm:$0xff]  ;;  %v6889_v62 = vrot.slane %v6861_v1, %v10313_v9 }
 0x474   :  { %7886 = vmatmul.mubr.f32.vlgmr.msra.gmra.mxu0 %v7482_v11  ;;  %7956 = vmatmul.mubr.f32.vlgmr.msra.gmra.mxu1 %v7483_v51  ;;  %v7257_v11 = vld [vmem:[#allocation10 + $0x5b0] sm:$0xff]  ;;  %v7224_v51 = vld [vmem:[#allocation10 + $0x4a8] sm:$0xff]  ;;  %v7326_v52 = vld [vmem:[#allocation10 + $0x7d8] sm:$0xff] }
 0x475   :  { %9024 = vmatprep.subr.mxu0 %v7234_v3  ;;  %9059 = vmatprep.subr.mxu1 %v7266_v55  ;;  %v7256_v3 = vld [vmem:[#allocation10 + $0x5a8] sm:$0xff]  ;;  %v8852_v48 = vcombine.low %v12188_v15, %v6889_v62  ;;  %v7206_v15 = vld [vmem:[#allocation10 + $0x418] sm:$0xff]  ;;  %v7295_v62 = vld [vmem:[#allocation10 + $0x6e0] sm:$0xff] }
 0x476   :  { %9025 = vmatpush3.msra.mxu0 %v7218_v46  ;;  %8025 = vmatprep.mubr.f32.mxu0 %v7602_v44  ;;  %v7208_v55 = vld [vmem:[#allocation10 + $0x428] sm:$0xff]  ;;  %v7223_v46 = vld [vmem:[#allocation10 + $0x4a0] sm:$0xff] }
 0x477   :  { %9060 = vmatpush3.msra.mxu1 %v7250_v60  ;;  %8095 = vmatprep.mubr.f32.mxu1 %v7603_v16  ;;  %v7255_v44 = vld [vmem:[#allocation10 + $0x5a0] sm:$0xff] }
 0x478   :  { %9026 = vmatprep.subr.mxu0 %v7233_v47  ;;  %9061 = vmatprep.subr.mxu1 %v7265_v29  ;;  %v7207_v60 = vld [vmem:[#allocation10 + $0x420] sm:$0xff]  ;;  %v12270_v47 = vrot.slane %v8856_v0, %v10313_v9  ;;  %v7222_v29 = vld [vmem:[#allocation10 + $0x498] sm:$0xff] }
 0x479   :  { %9027 = vmatpush3.msra.mxu0 %v7217_v26  ;;  %9062 = vmatpush3.msra.mxu1 %v7249_v19  ;;  %v7239_v16 = vld [vmem:[#allocation10 + $0x520] sm:$0xff]  ;;  %v7254_v26 = vld [vmem:[#allocation10 + $0x598] sm:$0xff] }
 0x47a   :  { %9028 = vmatprep.subr.mxu0 %v7232_v27  ;;  %9063 = vmatprep.subr.mxu1 %v7264_v20  ;;  %v7238_v19 = vld [vmem:[#allocation10 + $0x518] sm:$0xff]  ;;  %v12273_v27 = vrot.slane %v8852_v48, %v10313_v9  ;;  %v7221_v20 = vld [vmem:[#allocation10 + $0x490] sm:$0xff] }
 0x47b   :  { %9029 = vmatpush3.msra.mxu0 %v7216_v14  ;;  %9064 = vmatpush3.msra.mxu1 %v7248_v56  ;;  %v7253_v14 = vld [vmem:[#allocation10 + $0x590] sm:$0xff]  ;;  %v7278_v0 = vld [vmem:[#allocation10 + $0x658] sm:$0xff] }
 0x47c   :  { %9030 = vmatprep.subr.mxu0 %v7231_v25  ;;  %9065 = vmatprep.subr.mxu1 %v7263_v24  ;;  %v7205_v56 = vld [vmem:[#allocation10 + $0x410] sm:$0xff]  ;;  %v7536_v24 = vcombine.low %v12229_v10, %v12224_v21  ;;  %v7219_v21 = vld [vmem:[#allocation10 + $0x480] sm:$0xff] }
 0x47d   :  { %9031 = vmatpush3.msra.mxu0 %v7215_v18  ;;  %9066 = vmatpush3.msra.mxu1 %v7247_v36  ;;  %v7237_v25 = vld [vmem:[#allocation10 + $0x510] sm:$0xff]  ;;  %v7539_v18 = vcombine.high %v12273_v27, %v12267_v17  ;;  %v7541_v36 = vcombine.high %v12270_v47, %v12270_v47  ;;  %v7251_v10 = vld [vmem:[#allocation10 + $0x580] sm:$0xff] }
 0x47e   :  { %9032 = vmatprep.subr.mxu0 %v7230_v28  ;;  %9067 = vmatprep.subr.mxu1 %v7262_v57  ;;  %v7252_v28 = vld [vmem:[#allocation10 + $0x588] sm:$0xff]  ;;  %v7309_v48 = vld [vmem:[#allocation10 + $0x750] sm:$0xff] }
 0x47f   :  { %9033 = vmatpush3.msra.mxu0 %v7214_v40  ;;  %9068 = vmatpush3.msra.mxu1 %v7246_v37  ;;  %v7204_v57 = vld [vmem:[#allocation10 + $0x408] sm:$0xff]  ;;  %v7576_v37 = vrot.slane %v12220_v45, %v10313_v9  ;;  %v7597_v53 = vrot.slane %v7541_v36, %v10313_v9  ;;  %v7273_v36 = vld [vmem:[#allocation10 + $0x630] sm:$0xff] }
 0x480   :  { %9034 = vmatprep.subr.mxu0 %v7229_v41  ;;  %9069 = vmatprep.subr.mxu1 %v7261_v12  ;;  %v7236_v40 = vld [vmem:[#allocation10 + $0x508] sm:$0xff]  ;;  %v7203_v41 = vld [vmem:[#allocation10 + $0x400] sm:$0xff] }
 0x481   :  { %9035 = vmatpush3.msra.mxu0 %v7213_v23  ;;  %9070 = vmatpush3.msra.mxu1 %v7245_v32  ;;  %v7235_v12 = vld [vmem:[#allocation10 + $0x500] sm:$0xff]  ;;  %v7548_v23 = vrot.slane %v7536_v24, %v10313_v9  ;;  %v7569_v32 = vrot.slane %v7539_v18, %v10313_v9  ;;  %v7289_v24 = vld [vmem:[#allocation10 + $0x6b0] sm:$0xff] }
 0x482   :  { %9036 = vmatprep.subr.mxu0 %v7228_v30  ;;  %9071 = vmatprep.subr.mxu1 %v7260_v42  ;;  %v7298_v42 = vld [vmem:[#allocation10 + $0x6f8] sm:$0xff]  ;;  %v7321_v18 = vld [vmem:[#allocation10 + $0x7b0] sm:$0xff] }
 0x483   :  { %9037 = vmatpush3.msra.mxu0 %v7212_v8  ;;  %9072 = vmatpush3.msra.mxu1 %v7244_v61  ;;  %v7598_v30 = vcombine.low %v7548_v23, %v7576_v37  ;;  %v7599_v45 = vcombine.high %v7548_v23, %v7576_v37  ;;  %v7330_v8 = vld [vmem:[#allocation10 + $0x7f8] sm:$0xff]  ;;  %v7604_v1 = vcombine.low %v7569_v32, %v7597_v53  ;;  %v7304_v37 = vld [vmem:[#allocation10 + $0x728] sm:$0xff] }
 0x484   :  { %9038 = vmatprep.subr.mxu0 %v7227_v38  ;;  %9073 = vmatprep.subr.mxu1 %v7259_v4  ;;  %v7282_v61 = vld [vmem:[#allocation10 + $0x678] sm:$0xff]  ;;  %v7605_v4 = vcombine.high %v7569_v32, %v7597_v53 }
 0x485   :  { %9039 = vmatpush3.msra.mxu0 %v7211_v58  ;;  %9074 = vmatpush3.msra.mxu1 %v7243_v63  ;;  %v7314_v38 = vld [vmem:[#allocation10 + $0x778] sm:$0xff]  ;;  %v7297_v58 = vld [vmem:[#allocation10 + $0x6f0] sm:$0xff] }
 0x486   :  { %9040 = vmatprep.subr.mxu0 %v7226_v33  ;;  %9075 = vmatprep.subr.mxu1 %v7258_v22  ;;  %v7329_v63 = vld [vmem:[#allocation10 + $0x7f0] sm:$0xff]  ;;  %v7296_v33 = vld [vmem:[#allocation10 + $0x6e8] sm:$0xff]  ;;  %v7286_v23 = vld [vmem:[#allocation10 + $0x698] sm:$0xff] }
 0x487   :  { %9041 = vmatpush3.msra.mxu0 %v7210_v49  ;;  %9076 = vmatpush3.msra.mxu1 %v7242_v43  ;;  %v7328_v22 = vld [vmem:[#allocation10 + $0x7e8] sm:$0xff]  ;;  %v7318_v32 = vld [vmem:[#allocation10 + $0x798] sm:$0xff] }
 0x488   :  { %9042 = vmatprep.subr.mxu0 %v7225_v7  ;;  %9077 = vmatprep.subr.mxu1 %v7257_v11  ;;  %v7280_v49 = vld [vmem:[#allocation10 + $0x668] sm:$0xff]  ;;  %v7327_v7 = vld [vmem:[#allocation10 + $0x7e0] sm:$0xff]  ;;  %v7270_v53 = vld [vmem:[#allocation10 + $0x618] sm:$0xff] }
 0x489   :  { %9043 = vmatpush3.msra.mxu0 %v7209_v6  ;;  %9078 = vmatpush3.msra.mxu1 %v7241_v59  ;;  %v7312_v43 = vld [vmem:[#allocation10 + $0x768] sm:$0xff]  ;;  %v7279_v11 = vld [vmem:[#allocation10 + $0x660] sm:$0xff]  ;;  %v7294_v59 = vld [vmem:[#allocation10 + $0x6d8] sm:$0xff] }
 0x48a   :  { %9044 = vmatprep.subr.mxu0 %v7224_v51  ;;  %9079 = vmatprep.subr.mxu1 %v7256_v3  ;;  %v7311_v6 = vld [vmem:[#allocation10 + $0x760] sm:$0xff]  ;;  %v7310_v51 = vld [vmem:[#allocation10 + $0x758] sm:$0xff]  ;;  %v7293_v3 = vld [vmem:[#allocation10 + $0x6d0] sm:$0xff] }
 0x48b   :  { %9045 = vmatpush3.msra.mxu0 %v7208_v55  ;;  %9080 = vmatpush3.msra.mxu1 %v7240_v39  ;;  %v7325_v55 = vld [vmem:[#allocation10 + $0x7d0] sm:$0xff] }
 0x48c   :  { %9046 = vmatprep.subr.mxu0 %v7223_v46  ;;  %9081 = vmatprep.subr.mxu1 %v7255_v44  ;;  %v7277_v39 = vld [vmem:[#allocation10 + $0x650] sm:$0xff]  ;;  %v7292_v46 = vld [vmem:[#allocation10 + $0x6c8] sm:$0xff] }
 0x48d   :  { %9047 = vmatpush3.msra.mxu0 %v7207_v60  ;;  %9082 = vmatpush3.msra.mxu1 %v7239_v16  ;;  %v7324_v44 = vld [vmem:[#allocation10 + $0x7c8] sm:$0xff] }
 0x48e   :  { %9048 = vmatprep.subr.mxu0 %v7222_v29  ;;  %9083 = vmatprep.subr.mxu1 %v7254_v26  ;;  %v7276_v60 = vld [vmem:[#allocation10 + $0x648] sm:$0xff]  ;;  %v7291_v29 = vld [vmem:[#allocation10 + $0x6c0] sm:$0xff] }
 0x48f   :  { %9049 = vmatpush3.msra.mxu0 %v7206_v15  ;;  %9084 = vmatpush3.msra.mxu1 %v7238_v19  ;;  %v7308_v16 = vld [vmem:[#allocation10 + $0x748] sm:$0xff]  ;;  %v7323_v26 = vld [vmem:[#allocation10 + $0x7c0] sm:$0xff] }
 0x490   :  { %9050 = vmatprep.subr.mxu0 %v7221_v20  ;;  %9085 = vmatprep.subr.mxu1 %v7253_v14  ;;  %v7275_v15 = vld [vmem:[#allocation10 + $0x640] sm:$0xff]  ;;  %v7290_v20 = vld [vmem:[#allocation10 + $0x6b8] sm:$0xff] }
 0x491   :  { %9051 = vmatpush3.msra.mxu0 %v7205_v56  ;;  %9086 = vmatpush3.msra.mxu1 %v7237_v25  ;;  %v7307_v19 = vld [vmem:[#allocation10 + $0x740] sm:$0xff]  ;;  %v7322_v14 = vld [vmem:[#allocation10 + $0x7b8] sm:$0xff] }
 0x492   :  { %9052 = vmatprep.subr.mxu0 %v7220_v5  ;;  %9087 = vmatprep.subr.mxu1 %v7252_v28  ;;  %v7274_v56 = vld [vmem:[#allocation10 + $0x638] sm:$0xff]  ;;  %v7305_v5 = vld [vmem:[#allocation10 + $0x730] sm:$0xff]  ;;  %v7288_v28 = vld [vmem:[#allocation10 + $0x6a8] sm:$0xff] }
 0x493   :  { %9053 = vmatpush3.msra.mxu0 %v7204_v57  ;;  %9088 = vmatpush3.msra.mxu1 %v7236_v40  ;;  %v7306_v25 = vld [vmem:[#allocation10 + $0x738] sm:$0xff]  ;;  %v7320_v57 = vld [vmem:[#allocation10 + $0x7a8] sm:$0xff] }
 0x494   :  { %9054 = vmatprep.subr.mxu0 %v7219_v21  ;;  %9089 = vmatprep.subr.mxu1 %v7251_v10  ;;  %v7272_v40 = vld [vmem:[#allocation10 + $0x628] sm:$0xff]  ;;  %v7287_v21 = vld [vmem:[#allocation10 + $0x6a0] sm:$0xff] }
 0x495   :  { %9055 = vmatpush3.msra.mxu0 %v7203_v41  ;;  %9090 = vmatpush3.msra.mxu1 %v7235_v12  ;;  %v7319_v10 = vld [vmem:[#allocation10 + $0x7a0] sm:$0xff] }
 0x496   :  { %8026 = vmatmul.mubr.f32.vlgmr.msra.gmra.mxu0 %v7598_v30  ;;  %8096 = vmatmul.mubr.f32.vlgmr.msra.gmra.mxu1 %v7599_v45  ;;  %v7271_v41 = vld [vmem:[#allocation10 + $0x620] sm:$0xff]  ;;  %v7302_v30 = vld [vmem:[#allocation10 + $0x718] sm:$0xff]  ;;  %v7538_v45 = vcombine.low %v12273_v27, %v12267_v17 }
 0x497   :  { %9094 = vmatprep.subr.mxu0 %v7298_v42  ;;  %9129 = vmatprep.subr.mxu1 %v7330_v8  ;;  %v7303_v12 = vld [vmem:[#allocation10 + $0x720] sm:$0xff]  ;;  %v7285_v42 = vld [vmem:[#allocation10 + $0x690] sm:$0xff] }
 0x498   :  { %9095 = vmatpush3.msra.mxu0 %v7282_v61  ;;  %8165 = vmatprep.mubr.f32.mxu0 %v7604_v1  ;;  %v7317_v8 = vld [vmem:[#allocation10 + $0x790] sm:$0xff]  ;;  %v7283_v17 = vld [vmem:[#allocation10 + $0x680] sm:$0xff] }
 0x499   :  { %9130 = vmatpush3.msra.mxu1 %v7314_v38  ;;  %8235 = vmatprep.mubr.f32.mxu1 %v7605_v4  ;;  %v7269_v61 = vld [vmem:[#allocation10 + $0x610] sm:$0xff]  ;;  %v7284_v38 = vld [vmem:[#allocation10 + $0x688] sm:$0xff]  ;;  %v7315_v27 = vld [vmem:[#allocation10 + $0x780] sm:$0xff] }
 0x49a   :  { %9096 = vmatprep.subr.mxu0 %v7297_v58  ;;  %9131 = vmatprep.subr.mxu1 %v7329_v63  ;;  %v7301_v1 = vld [vmem:[#allocation10 + $0x710] sm:$0xff]  ;;  %v7316_v4 = vld [vmem:[#allocation10 + $0x788] sm:$0xff] }
 0x49b   :  { %9097 = vmatpush3.msra.mxu0 %v7281_v50  ;;  %9132 = vmatpush3.msra.mxu1 %v7313_v34  ;;  %v7268_v58 = vld [vmem:[#allocation10 + $0x608] sm:$0xff]  ;;  %v7555_v50 = vrot.slane %v7538_v45, %v10313_v9  ;;  %v7267_v34 = vld [vmem:[#allocation10 + $0x600] sm:$0xff] }
 0x49c   :  { %9098 = vmatprep.subr.mxu0 %v7296_v33  ;;  %9133 = vmatprep.subr.mxu1 %v7328_v22  ;;  %v7300_v63 = vld [vmem:[#allocation10 + $0x708] sm:$0xff]  ;;  %v7299_v33 = vld [vmem:[#allocation10 + $0x700] sm:$0xff]  ;;  %v7583_v22 = vrot.slane %v12270_v47, %v10313_v9 }
 0x49d   :  { %9099 = vmatpush3.msra.mxu0 %v7280_v49  ;;  %9134 = vmatpush3.msra.mxu1 %v7312_v43  ;;  %v7360_v9 = vld [vmem:[#allocation10 + $0x8e8] sm:$0xff]  ;;  %v8335_v45 = vld [vmem:[#allocation13 + $0x58] sm:$0xff] }
 0x49e   :  { %9100 = vmatprep.subr.mxu0 %v7295_v62  ;;  %9135 = vmatprep.subr.mxu1 %v7327_v7  ;;  %v7600_v49 = vcombine.low %v7555_v50, %v7583_v22  ;;  %v7601_v43 = vcombine.high %v7555_v50, %v7583_v22  ;;  %v7362_v62 = vld [vmem:[#allocation10 + $0x8f8] sm:$0xff]  ;;  %v7344_v47 = vld [vmem:[#allocation10 + $0x868] sm:$0xff] }
 0x49f   :  { %9101 = vmatpush3.msra.mxu0 %v7279_v11  ;;  %9136 = vmatpush3.msra.mxu1 %v7311_v6  ;;  %v7346_v7 = vld [vmem:[#allocation10 + $0x878] sm:$0xff]  ;;  %v7361_v11 = vld [vmem:[#allocation10 + $0x8f0] sm:$0xff]  ;;  %v8332_v50 = vld [vmem:[#allocation13 + $0x40] sm:$0xff] }
 0x4a0   :  { %9102 = vmatprep.subr.mxu0 %v7294_v59  ;;  %9137 = vmatprep.subr.mxu1 %v7326_v52  ;;  %v7345_v6 = vld [vmem:[#allocation10 + $0x870] sm:$0xff]  ;;  %v7359_v59 = vld [vmem:[#allocation10 + $0x8e0] sm:$0xff] }
 0x4a1   :  { %9103 = vmatpush3.msra.mxu0 %v7278_v0  ;;  %9138 = vmatpush3.msra.mxu1 %v7310_v51  ;;  %v7343_v52 = vld [vmem:[#allocation10 + $0x860] sm:$0xff]  ;;  %v7358_v0 = vld [vmem:[#allocation10 + $0x8d8] sm:$0xff] }
 0x4a2   :  { %9104 = vmatprep.subr.mxu0 %v7293_v3  ;;  %9139 = vmatprep.subr.mxu1 %v7325_v55  ;;  %v7342_v51 = vld [vmem:[#allocation10 + $0x858] sm:$0xff]  ;;  %v7357_v3 = vld [vmem:[#allocation10 + $0x8d0] sm:$0xff] }
 0x4a3   :  { %9105 = vmatpush3.msra.mxu0 %v7277_v39  ;;  %9140 = vmatpush3.msra.mxu1 %v7309_v48  ;;  %v7341_v55 = vld [vmem:[#allocation10 + $0x850] sm:$0xff]  ;;  %v7339_v39 = vld [vmem:[#allocation10 + $0x840] sm:$0xff]  ;;  %v7354_v48 = vld [vmem:[#allocation10 + $0x8b8] sm:$0xff] }
 0x4a4   :  { %9106 = vmatprep.subr.mxu0 %v7292_v46  ;;  %9141 = vmatprep.subr.mxu1 %v7324_v44  ;;  %v7338_v46 = vld [vmem:[#allocation10 + $0x838] sm:$0xff]  ;;  %v7353_v44 = vld [vmem:[#allocation10 + $0x8b0] sm:$0xff] }
 0x4a5   :  { %9107 = vmatpush3.msra.mxu0 %v7276_v60  ;;  %9142 = vmatpush3.msra.mxu1 %v7308_v16  ;;  %v7337_v60 = vld [vmem:[#allocation10 + $0x830] sm:$0xff]  ;;  %v7352_v16 = vld [vmem:[#allocation10 + $0x8a8] sm:$0xff] }
 0x4a6   :  { %9108 = vmatprep.subr.mxu0 %v7291_v29  ;;  %9143 = vmatprep.subr.mxu1 %v7323_v26  ;;  %v7336_v29 = vld [vmem:[#allocation10 + $0x828] sm:$0xff]  ;;  %v7351_v26 = vld [vmem:[#allocation10 + $0x8a0] sm:$0xff]  ;;  %v8362_v22 = vld [vmem:[#allocation13 + $0x130] sm:$0xff] }
 0x4a7   :  { %9109 = vmatpush3.msra.mxu0 %v7275_v15  ;;  %9144 = vmatpush3.msra.mxu1 %v7307_v19  ;;  %v7335_v15 = vld [vmem:[#allocation10 + $0x820] sm:$0xff]  ;;  %v7350_v19 = vld [vmem:[#allocation10 + $0x898] sm:$0xff] }
 0x4a8   :  { %9110 = vmatprep.subr.mxu0 %v7290_v20  ;;  %9145 = vmatprep.subr.mxu1 %v7322_v14  ;;  %v7334_v20 = vld [vmem:[#allocation10 + $0x818] sm:$0xff]  ;;  %v7349_v14 = vld [vmem:[#allocation10 + $0x890] sm:$0xff] }
 0x4a9   :  { %9111 = vmatpush3.msra.mxu0 %v7274_v56  ;;  %9146 = vmatpush3.msra.mxu1 %v7306_v25  ;;  %v7333_v56 = vld [vmem:[#allocation10 + $0x810] sm:$0xff]  ;;  %v7348_v25 = vld [vmem:[#allocation10 + $0x888] sm:$0xff] }
 0x4aa   :  { %9112 = vmatprep.subr.mxu0 %v7289_v24  ;;  %9147 = vmatprep.subr.mxu1 %v7321_v18  ;;  %v7332_v24 = vld [vmem:[#allocation10 + $0x808] sm:$0xff]  ;;  %v7347_v18 = vld [vmem:[#allocation10 + $0x880] sm:$0xff] }
 0x4ab   :  { %9113 = vmatpush3.msra.mxu0 %v7273_v36  ;;  %9148 = vmatpush3.msra.mxu1 %v7305_v5  ;;  %v7331_v36 = vld [vmem:[#allocation10 + $0x800] sm:$0xff] }
 0x4ac   :  { %9114 = vmatprep.subr.mxu0 %v7288_v28  ;;  %9149 = vmatprep.subr.mxu1 %v7320_v57  ;;  %v8355_v5 = vld [vmem:[#allocation13 + $0xf8] sm:$0xff] }
 0x4ad   :  { %9115 = vmatpush3.msra.mxu0 %v7272_v40  ;;  %9150 = vmatpush3.msra.mxu1 %v7304_v37  ;;  %v8371_v28 = vld [vmem:[#allocation13 + $0x178] sm:$0xff]  ;;  %v8354_v40 = vld [vmem:[#allocation13 + $0xf0] sm:$0xff] }
 0x4ae   :  { %9116 = vmatprep.subr.mxu0 %v7287_v21  ;;  %9151 = vmatprep.subr.mxu1 %v7319_v10  ;;  %v8339_v57 = vld [vmem:[#allocation13 + $0x78] sm:$0xff]  ;;  %v8370_v37 = vld [vmem:[#allocation13 + $0x170] sm:$0xff]  ;;  %v8353_v10 = vld [vmem:[#allocation13 + $0xe8] sm:$0xff] }
 0x4af   :  { %9117 = vmatpush3.msra.mxu0 %v7271_v41  ;;  %9152 = vmatpush3.msra.mxu1 %v7303_v12  ;;  %v8338_v21 = vld [vmem:[#allocation13 + $0x70] sm:$0xff]  ;;  %v8369_v41 = vld [vmem:[#allocation13 + $0x168] sm:$0xff]  ;;  %v8352_v12 = vld [vmem:[#allocation13 + $0xe0] sm:$0xff] }
 0x4b0   :  { %9118 = vmatprep.subr.mxu0 %v7286_v23  ;;  %9153 = vmatprep.subr.mxu1 %v7318_v32  ;;  %v8368_v23 = vld [vmem:[#allocation13 + $0x160] sm:$0xff] }
 0x4b1   :  { %9119 = vmatpush3.msra.mxu0 %v7270_v53  ;;  %9154 = vmatpush3.msra.mxu1 %v7302_v30  ;;  %v8336_v32 = vld [vmem:[#allocation13 + $0x60] sm:$0xff]  ;;  %v8351_v53 = vld [vmem:[#allocation13 + $0xd8] sm:$0xff] }
 0x4b2   :  { %9120 = vmatprep.subr.mxu0 %v7285_v42  ;;  %9155 = vmatprep.subr.mxu1 %v7317_v8  ;;  %v8367_v30 = vld [vmem:[#allocation13 + $0x158] sm:$0xff]  ;;  %v8350_v42 = vld [vmem:[#allocation13 + $0xd0] sm:$0xff] }
 0x4b3   :  { %9121 = vmatpush3.msra.mxu0 %v7269_v61  ;;  %9156 = vmatpush3.msra.mxu1 %v7301_v1  ;;  %v8366_v8 = vld [vmem:[#allocation13 + $0x150] sm:$0xff]  ;;  %v8349_v1 = vld [vmem:[#allocation13 + $0xc8] sm:$0xff] }
 0x4b4   :  { %9122 = vmatprep.subr.mxu0 %v7284_v38  ;;  %9157 = vmatprep.subr.mxu1 %v7316_v4  ;;  %v8334_v61 = vld [vmem:[#allocation13 + $0x50] sm:$0xff]  ;;  %v8365_v38 = vld [vmem:[#allocation13 + $0x148] sm:$0xff] }
 0x4b5   :  { %9123 = vmatpush3.msra.mxu0 %v7268_v58  ;;  %9158 = vmatpush3.msra.mxu1 %v7300_v63  ;;  %v8333_v4 = vld [vmem:[#allocation13 + $0x48] sm:$0xff]  ;;  %v8348_v58 = vld [vmem:[#allocation13 + $0xc0] sm:$0xff] }
 0x4b6   :  { %9124 = vmatprep.subr.mxu0 %v7283_v17  ;;  %9159 = vmatprep.subr.mxu1 %v7315_v27  ;;  %v8364_v63 = vld [vmem:[#allocation13 + $0x140] sm:$0xff]  ;;  %v8347_v17 = vld [vmem:[#allocation13 + $0xb8] sm:$0xff] }
 0x4b7   :  { %9125 = vmatpush3.msra.mxu0 %v7267_v34  ;;  %9160 = vmatpush3.msra.mxu1 %v7299_v33  ;;  %v8363_v27 = vld [vmem:[#allocation13 + $0x138] sm:$0xff]  ;;  %v8346_v33 = vld [vmem:[#allocation13 + $0xb0] sm:$0xff] }
 0x4b8   :  { %8166 = vmatmul.mubr.f32.vlgmr.msra.gmra.mxu0 %v7600_v49  ;;  %8236 = vmatmul.mubr.f32.vlgmr.msra.gmra.mxu1 %v7601_v43  ;;  %v8331_v34 = vld [vmem:[#allocation13 + $0x38] sm:$0xff]  ;;  %v8330_v49 = vld [vmem:[#allocation13 + $0x30] sm:$0xff]  ;;  %v8345_v43 = vld [vmem:[#allocation13 + $0xa8] sm:$0xff] }
 0x4b9   :  { %9164 = vmatprep.subr.mxu0 %v7362_v62  ;;  %8305 = vmatprep.mubr.f32.mxu0 %v7662_v35  ;;  %v7355_v35 = vld [vmem:[#allocation10 + $0x8c0] sm:$0xff]  ;;  %v8361_v62 = vld [vmem:[#allocation13 + $0x128] sm:$0xff] }
 0x4ba   :  { %9165 = vmatpush3.msra.mxu0 %v7346_v7  ;;  %9199 = vmatprep.subr.mxu1 %v8355_v5  ;;  %v8329_v7 = vld [vmem:[#allocation13 + $0x28] sm:$0xff] }
 0x4bb   :  { %9166 = vmatprep.subr.mxu0 %v7361_v11  ;;  %9200 = vmatpush3.msra.mxu1 %v8339_v57  ;;  %v8344_v11 = vld [vmem:[#allocation13 + $0xa0] sm:$0xff] }
 0x4bc   :  { %9167 = vmatpush3.msra.mxu0 %v7345_v6  ;;  %9201 = vmatprep.subr.mxu1 %v8354_v40  ;;  %v8360_v6 = vld [vmem:[#allocation13 + $0x120] sm:$0xff] }
 0x4bd   :  { %9168 = vmatprep.subr.mxu0 %v7360_v9  ;;  %9202 = vmatpush3.msra.mxu1 %v8338_v21  ;;  %v8328_v9 = vld [vmem:[#allocation13 + $0x20] sm:$0xff] }
 0x4be   :  { %9169 = vmatpush3.msra.mxu0 %v7344_v47  ;;  %9203 = vmatprep.subr.mxu1 %v8353_v10  ;;  %v8343_v47 = vld [vmem:[#allocation13 + $0x98] sm:$0xff] }
 0x4bf   :  { %9170 = vmatprep.subr.mxu0 %v7359_v59  ;;  %v8359_v59 = vld [vmem:[#allocation13 + $0x118] sm:$0xff] }
 0x4c0   :  { %9171 = vmatpush3.msra.mxu0 %v7343_v52  ;;  %v8327_v52 = vld [vmem:[#allocation13 + $0x18] sm:$0xff] }
 0x4c1   :  { %9172 = vmatprep.subr.mxu0 %v7358_v0  ;;  %v8342_v0 = vld [vmem:[#allocation13 + $0x90] sm:$0xff] }
 0x4c2   :  { %9173 = vmatpush3.msra.mxu0 %v7342_v51  ;;  %v8358_v51 = vld [vmem:[#allocation13 + $0x110] sm:$0xff] }
 0x4c3   :  { %9174 = vmatprep.subr.mxu0 %v7357_v3  ;;  %v8326_v3 = vld [vmem:[#allocation13 + $0x10] sm:$0xff] }
 0x4c4   :  { %9175 = vmatpush3.msra.mxu0 %v7341_v55  ;;  %v8341_v55 = vld [vmem:[#allocation13 + $0x88] sm:$0xff] }
 0x4c5   :  { %9176 = vmatprep.subr.mxu0 %v7356_v2  ;;  %v8357_v2 = vld [vmem:[#allocation13 + $0x108] sm:$0xff] }
 0x4c6   :  { %9177 = vmatpush3.msra.mxu0 %v7340_v54  ;;  %v8325_v54 = vld [vmem:[#allocation13 + $0x8] sm:$0xff] }
 0x4c7   :  { %9178 = vmatprep.subr.mxu0 %v7355_v35  ;;  %v8340_v35 = vld [vmem:[#allocation13 + $0x80] sm:$0xff] }
 0x4c8   :  { %9179 = vmatpush3.msra.mxu0 %v7339_v39  ;;  %v8356_v39 = vld [vmem:[#allocation13 + $0x100] sm:$0xff] }
 0x4c9   :  { %9180 = vmatprep.subr.mxu0 %v7354_v48  ;;  %v8324_v48 = vld [vmem:[#allocation13] sm:$0xff] }
 0x4ca   :  { %9181 = vmatpush3.msra.mxu0 %v7338_v46 }
 0x4cb   :  { %9182 = vmatprep.subr.mxu0 %v7353_v44 }
 0x4cc   :  { %9183 = vmatpush3.msra.mxu0 %v7337_v60 }
 0x4cd   :  { %9184 = vmatprep.subr.mxu0 %v7352_v16 }
 0x4ce   :  { %9185 = vmatpush3.msra.mxu0 %v7336_v29 }
 0x4cf   :  { %9186 = vmatprep.subr.mxu0 %v7351_v26  ;;  %v8844_v26 = vld [vmem:[#allocation11] ss:$0 sm:$0xff] }
 0x4d0   :  { %9187 = vmatpush3.msra.mxu0 %v7335_v15 }
 0x4d1   :  { %9188 = vmatprep.subr.mxu0 %v7350_v19 }
 0x4d2   :  { %9189 = vmatpush3.msra.mxu0 %v7334_v20 }
 0x4d3   :  { %9190 = vmatprep.subr.mxu0 %v7349_v14 }
 0x4d4   :  { %9191 = vmatpush3.msra.mxu0 %v7333_v56 }
 0x4d5   :  { %9192 = vmatprep.subr.mxu0 %v7348_v25 }
 0x4d6   :  { %9193 = vmatpush3.msra.mxu0 %v7332_v24 }
 0x4d7   :  { %9194 = vmatprep.subr.mxu0 %v7347_v18 }
 0x4d8   :  { %9195 = vmatpush3.msra.mxu0 %v7331_v36 }
 0x4d9   :  { %8306 = vmatmul.mubr.f32.vlgmr.msra.gmra.mxu0 %v12250_v13  ;;  %9342 = vmatprep.subr.mxu0 %v12391_v31  ;;  %v8337_v13 = vld [vmem:[#allocation13 + $0x68] sm:$0xff] }
 0x4da   :  { %9374 = vmatprep.mubr.msk.f32.mxu0 %vm12376_vm2, %v12391_v31  ;;  %9343 = vmatpush3.msra.mxu0 %v8371_v28 }
 0x4db   :  { %9344 = vmatprep.subr.mxu0 %v12391_v31  ;;  %9204 = vmatpush3.msra.mxu1 %v8337_v13 }
 0x4dc   :  { %9345 = vmatpush3.msra.mxu0 %v8370_v37  ;;  %9205 = vmatprep.subr.mxu1 %v8352_v12 }
 0x4dd   :  { %9346 = vmatprep.subr.mxu0 %v12391_v31  ;;  %9206 = vmatpush3.msra.mxu1 %v8336_v32 }
 0x4de   :  { %9347 = vmatpush3.msra.mxu0 %v8369_v41  ;;  %9207 = vmatprep.subr.mxu1 %v8351_v53 }
 0x4df   :  { %9348 = vmatprep.subr.mxu0 %v12391_v31  ;;  %9208 = vmatpush3.msra.mxu1 %v8335_v45 }
 0x4e0   :  { %9349 = vmatpush3.msra.mxu0 %v8368_v23  ;;  %9209 = vmatprep.subr.mxu1 %v8350_v42 }
 0x4e1   :  { %9350 = vmatprep.subr.mxu0 %v12391_v31  ;;  %9210 = vmatpush3.msra.mxu1 %v8334_v61 }
 0x4e2   :  { %9351 = vmatpush3.msra.mxu0 %v8367_v30  ;;  %9211 = vmatprep.subr.mxu1 %v8349_v1 }
 0x4e3   :  { %9352 = vmatprep.subr.mxu0 %v12391_v31  ;;  %9212 = vmatpush3.msra.mxu1 %v8333_v4 }
 0x4e4   :  { %9353 = vmatpush3.msra.mxu0 %v8366_v8  ;;  %9213 = vmatprep.subr.mxu1 %v8348_v58 }
 0x4e5   :  { %9354 = vmatprep.subr.mxu0 %v12391_v31  ;;  %9214 = vmatpush3.msra.mxu1 %v8332_v50 }
 0x4e6   :  { %9355 = vmatpush3.msra.mxu0 %v8365_v38  ;;  %9215 = vmatprep.subr.mxu1 %v8347_v17 }
 0x4e7   :  { %9356 = vmatprep.subr.mxu0 %v12391_v31  ;;  %9216 = vmatpush3.msra.mxu1 %v8331_v34 }
 0x4e8   :  { %9357 = vmatpush3.msra.mxu0 %v8364_v63  ;;  %9217 = vmatprep.subr.mxu1 %v8346_v33 }
 0x4e9   :  { %9358 = vmatprep.subr.mxu0 %v12391_v31  ;;  %9218 = vmatpush3.msra.mxu1 %v8330_v49 }
 0x4ea   :  { %9359 = vmatpush3.msra.mxu0 %v8363_v27  ;;  %9219 = vmatprep.subr.mxu1 %v8345_v43 }
 0x4eb   :  { %9360 = vmatprep.subr.mxu0 %v12391_v31  ;;  %9220 = vmatpush3.msra.mxu1 %v8329_v7  ;;  %v8535_v7 = vld [vmem:[#allocation16 + $0x78] sm:$0xff] }
 0x4ec   :  { %9361 = vmatpush3.msra.mxu0 %v8362_v22  ;;  %9221 = vmatprep.subr.mxu1 %v8344_v11 }
 0x4ed   :  { %9362 = vmatprep.subr.mxu0 %v12391_v31  ;;  %9222 = vmatpush3.msra.mxu1 %v8328_v9  ;;  %v8533_v9 = vld [vmem:[#allocation16 + $0x68] sm:$0xff] }
 0x4ee   :  { %9363 = vmatpush3.msra.mxu0 %v8361_v62  ;;  %9223 = vmatprep.subr.mxu1 %v8343_v47  ;;  %v8532_v47 = vld [vmem:[#allocation16 + $0x60] sm:$0xff] }
 0x4ef   :  { %9364 = vmatprep.subr.mxu0 %v12391_v31  ;;  %9224 = vmatpush3.msra.mxu1 %v8327_v52  ;;  %v8530_v52 = vld [vmem:[#allocation16 + $0x50] sm:$0xff] }
 0x4f0   :  { %9365 = vmatpush3.msra.mxu0 %v8360_v6  ;;  %9225 = vmatprep.subr.mxu1 %v8342_v0  ;;  %v8534_v6 = vld [vmem:[#allocation16 + $0x70] sm:$0xff]  ;;  %v8529_v0 = vld [vmem:[#allocation16 + $0x48] sm:$0xff] }
 0x4f1   :  { %9366 = vmatprep.subr.mxu0 %v12391_v31  ;;  %9226 = vmatpush3.msra.mxu1 %v8326_v3  ;;  %v8527_v3 = vld [vmem:[#allocation16 + $0x38] sm:$0xff] }
 0x4f2   :  { %9367 = vmatpush3.msra.mxu0 %v8359_v59  ;;  %9227 = vmatprep.subr.mxu1 %v8341_v55  ;;  %v8531_v59 = vld [vmem:[#allocation16 + $0x58] sm:$0xff]  ;;  %v8526_v55 = vld [vmem:[#allocation16 + $0x30] sm:$0xff] }
 0x4f3   :  { %9368 = vmatprep.subr.mxu0 %v12391_v31  ;;  %9228 = vmatpush3.msra.mxu1 %v8325_v54  ;;  %v8524_v54 = vld [vmem:[#allocation16 + $0x20] sm:$0xff] }
 0x4f4   :  { %9369 = vmatpush3.msra.mxu0 %v8358_v51  ;;  %9229 = vmatprep.subr.mxu1 %v8340_v35  ;;  %v8528_v51 = vld [vmem:[#allocation16 + $0x40] sm:$0xff]  ;;  %v8523_v35 = vld [vmem:[#allocation16 + $0x18] sm:$0xff] }
 0x4f5   :  { %9370 = vmatprep.subr.mxu0 %v12391_v31  ;;  %9230 = vmatpush3.msra.mxu1 %v8324_v48  ;;  %v8629_v48 = vld [vmem:[#allocation19 + $0x78] sm:$0xff] }
 0x4f6   :  { %9371 = vmatpush3.msra.mxu0 %v8357_v2  ;;  %9377 = vmatprep.subr.mxu1 %v12391_v31  ;;  %v8525_v2 = vld [vmem:[#allocation16 + $0x28] sm:$0xff] }
 0x4f7   :  { %9372 = vmatprep.subr.mxu0 %v12391_v31 }
 0x4f8   :  { %9373 = vmatpush3.msra.mxu0 %v8356_v39  ;;  %v8522_v39 = vld [vmem:[#allocation16 + $0x10] sm:$0xff] }
 0x4f9   :  { %9412 = vmatprep.subr.mxu0 %v12391_v31 }
 0x513   :  { %v8916_v46 = vpop.f32.mrf.mxu0  ;;  %v8951_v60 = vpop.f32.mrf.mxu1 }
 0x515   :  { %v8917_v44 = vpop.f32.mrf.mxu0  ;;  %v8952_v15 = vpop.f32.mrf.mxu1 }
 0x516   :  { %v8918_v29 = vadd.f32 %v8917_v44, %v8916_v46  ;;  %v8953_v25 = vadd.f32 %v8952_v15, %v8951_v60  ;;  %v8628_v46 = vld [vmem:[#allocation19 + $0x70] sm:$0xff]  ;;  %v8521_v44 = vld [vmem:[#allocation16 + $0x8] sm:$0xff] }
 0x517   :  { %v8627_v60 = vld [vmem:[#allocation19 + $0x68] sm:$0xff]  ;;  %v8624_v15 = vld [vmem:[#allocation19 + $0x50] sm:$0xff] }
 0x518   :  { %v7748_v20 = vadd.f32 %v8918_v29, %v8844_v26  ;;  %v8626_v29 = vld [vmem:[#allocation19 + $0x60] sm:$0xff]  ;;  %v8625_v26 = vld [vmem:[#allocation19 + $0x58] sm:$0xff] }
 0x51a   :  { %v7818_v18 = vadd.f32 %v8953_v25, %v7748_v20  ;;  %v8622_v20 = vld [vmem:[#allocation19 + $0x40] sm:$0xff]  ;;  %v8619_v25 = vld [vmem:[#allocation19 + $0x28] sm:$0xff] }
 0x534   :  { %v8986_v16 = vpop.f32.mrf.mxu0  ;;  %v9021_v14 = vpop.f32.mrf.mxu1 }
 0x536   :  { %v8987_v19 = vpop.f32.mrf.mxu0  ;;  %v9022_v36 = vpop.f32.mrf.mxu1 }
 0x537   :  { %v8988_v24 = vadd.f32 %v8987_v19, %v8986_v16  ;;  %v9023_v37 = vadd.f32 %v9022_v36, %v9021_v14  ;;  %v8520_v16 = vld [vmem:[#allocation16] sm:$0xff]  ;;  %v8623_v19 = vld [vmem:[#allocation19 + $0x48] sm:$0xff] }
 0x538   :  { %v8621_v14 = vld [vmem:[#allocation19 + $0x38] sm:$0xff] }
 0x539   :  { %v7888_v28 = vadd.f32 %v8988_v24, %v7818_v18  ;;  %v8618_v24 = vld [vmem:[#allocation19 + $0x20] sm:$0xff]  ;;  %v8617_v18 = vld [vmem:[#allocation19 + $0x18] sm:$0xff] }
 0x53b   :  { %v7958_v10 = vadd.f32 %v9023_v37, %v7888_v28 }
 0x556   :  { %v9056_v56 = vpop.f32.mrf.mxu0  ;;  %v9091_v57 = vpop.f32.mrf.mxu1 }
 0x558   :  { %v9057_v5 = vpop.f32.mrf.mxu0  ;;  %v9092_v41 = vpop.f32.mrf.mxu1 }
 0x559   :  { %v9058_v21 = vadd.f32 %v9057_v5, %v9056_v56  ;;  %v9093_v32 = vadd.f32 %v9092_v41, %v9091_v57  ;;  %v8620_v56 = vld [vmem:[#allocation19 + $0x30] sm:$0xff]  ;;  %v8857_v57 = vld [vmem:[#allocation14] ss:$0 sm:$0xff] }
 0x55b   :  { %v8028_v12 = vadd.f32 %v9058_v21, %v7958_v10 }
 0x55d   :  { %v8098_v30 = vadd.f32 %v9093_v32, %v8028_v12  ;;  %v8615_v12 = vld [vmem:[#allocation19 + $0x8] sm:$0xff]  ;;  %v8858_v32 = vld [vmem:[#allocation17] ss:$0 sm:$0xff] }
 0x578   :  { %v9126_v40 = vpop.f32.mrf.mxu0  ;;  %v9161_v23 = vpop.f32.mrf.mxu1 }
 0x57a   :  { %v9127_v13 = vpop.f32.mrf.mxu0  ;;  %v9162_v45 = vpop.f32.mrf.mxu1 }
 0x57b   :  { %v9128_v53 = vadd.f32 %v9127_v13, %v9126_v40  ;;  %v9163_v61 = vadd.f32 %v9162_v45, %v9161_v23  ;;  %v8616_v13 = vld [vmem:[#allocation19 + $0x10] sm:$0xff]  ;;  %v8614_v23 = vld [vmem:[#allocation19] sm:$0xff] }
 0x57d   :  { %v8168_v42 = vadd.f32 %v9128_v53, %v8098_v30 }
 0x57f   :  { %v8238_v38 = vadd.f32 %v9163_v61, %v8168_v42 }
 0x599   :  { %v9196_v8 = vpop.f32.mrf.mxu0 }
 0x59b   :  { %v9197_v1 = vpop.f32.mrf.mxu0 }
 0x59c   :  { %v9198_v4 = vadd.f32 %v9197_v1, %v9196_v8  ;;  %v8859_v8 = vld [vmem:[#allocation20] ss:$0 sm:$0xff] }
 0x59e   :  { %v8308_v58 = vadd.f32 %v9198_v4, %v8238_v38 }
 0x5a0   :  { %v8311_v63 = vmax.f32 %v8308_v58, 0.0 }
 0x5a2   :  { %v8317_v50 = vrot.slane %v8311_v63, 1  ;;  %v8319_v17 = vrot.slane %v8311_v63, 3  ;;  %v8314_v27 = vrot.slane %v8311_v63, 2  ;;  %v8322_v34 = vrot.slane %v8311_v63, 4 }
 0x5a3   :  { %v8313_v33 = vsel %vm8312_vm3, %v8311_v63, 0.0 }
 0x5a4   :  { %v8318_v22 = vsel %vm8312_vm3, %v8317_v50, 0.0  ;;  %v8321_v49 = vsel %vm8312_vm3, %v8314_v27, 0.0  ;;  %v8316_v11 = vsel %vm8315_vm7, %v8314_v27, %v8313_v33 }
 0x5a5   :  { %v8320_v43 = vsel %vm8315_vm7, %v8319_v17, %v8318_v22  ;;  %v8323_v62 = vsel %vm8315_vm7, %v8322_v34, %v8321_v49 }
 0x5a6   :  { %8443 = vmatprep.mubr.f32.mxu1 %v8320_v43  ;;  %9375 = vmatmul.mubr.f32.vlgmr.msra.gmra.mxu0 %v8323_v62 }
 0x5a7   :  { %8444 = vmatmul.mubr.f32.vlgmr.msra.gmra.mxu1 %v8316_v11  ;;  %9444 = vmatprep.mubr.msk.f32.mxu0 %vm12376_vm2, %v12391_v31 }
 0x5a8   :  { %9378 = vmatpush3.msra.mxu1 %v8535_v7  ;;  %9409 = vmatprep.mubr.msk.f32.mxu1 %vm12376_vm2, %v12391_v31 }
 0x5a9   :  { %9379 = vmatprep.subr.mxu1 %v12391_v31  ;;  %9413 = vmatpush3.msra.mxu0 %v8629_v48 }
 0x5aa   :  { %9380 = vmatpush3.msra.mxu1 %v8534_v6  ;;  %9414 = vmatprep.subr.mxu0 %v12391_v31 }
 0x5ab   :  { %9381 = vmatprep.subr.mxu1 %v12391_v31  ;;  %9415 = vmatpush3.msra.mxu0 %v8628_v46 }
 0x5ac   :  { %9382 = vmatpush3.msra.mxu1 %v8533_v9  ;;  %9416 = vmatprep.subr.mxu0 %v12391_v31 }
 0x5ad   :  { %9383 = vmatprep.subr.mxu1 %v12391_v31  ;;  %9417 = vmatpush3.msra.mxu0 %v8627_v60 }
 0x5ae   :  { %9384 = vmatpush3.msra.mxu1 %v8532_v47  ;;  %9418 = vmatprep.subr.mxu0 %v12391_v31 }
 0x5af   :  { %9385 = vmatprep.subr.mxu1 %v12391_v31  ;;  %9419 = vmatpush3.msra.mxu0 %v8626_v29 }
 0x5b0   :  { %9386 = vmatpush3.msra.mxu1 %v8531_v59  ;;  %9420 = vmatprep.subr.mxu0 %v12391_v31 }
 0x5b1   :  { %9387 = vmatprep.subr.mxu1 %v12391_v31  ;;  %9421 = vmatpush3.msra.mxu0 %v8625_v26 }
 0x5b2   :  { %9388 = vmatpush3.msra.mxu1 %v8530_v52  ;;  %9422 = vmatprep.subr.mxu0 %v12391_v31 }
 0x5b3   :  { %9389 = vmatprep.subr.mxu1 %v12391_v31  ;;  %9423 = vmatpush3.msra.mxu0 %v8624_v15 }
 0x5b4   :  { %9390 = vmatpush3.msra.mxu1 %v8529_v0  ;;  %9424 = vmatprep.subr.mxu0 %v12391_v31 }
 0x5b5   :  { %9391 = vmatprep.subr.mxu1 %v12391_v31  ;;  %9425 = vmatpush3.msra.mxu0 %v8623_v19 }
 0x5b6   :  { %9392 = vmatpush3.msra.mxu1 %v8528_v51  ;;  %9426 = vmatprep.subr.mxu0 %v12391_v31 }
 0x5b7   :  { %9393 = vmatprep.subr.mxu1 %v12391_v31  ;;  %9427 = vmatpush3.msra.mxu0 %v8622_v20 }
 0x5b8   :  { %9394 = vmatpush3.msra.mxu1 %v8527_v3  ;;  %9428 = vmatprep.subr.mxu0 %v12391_v31 }
 0x5b9   :  { %9395 = vmatprep.subr.mxu1 %v12391_v31  ;;  %9429 = vmatpush3.msra.mxu0 %v8621_v14 }
 0x5ba   :  { %9396 = vmatpush3.msra.mxu1 %v8526_v55  ;;  %9430 = vmatprep.subr.mxu0 %v12391_v31 }
 0x5bb   :  { %9397 = vmatprep.subr.mxu1 %v12391_v31  ;;  %9431 = vmatpush3.msra.mxu0 %v8620_v56 }
 0x5bc   :  { %9398 = vmatpush3.msra.mxu1 %v8525_v2  ;;  %9432 = vmatprep.subr.mxu0 %v12391_v31 }
 0x5bd   :  { %9399 = vmatprep.subr.mxu1 %v12391_v31  ;;  %9433 = vmatpush3.msra.mxu0 %v8619_v25 }
 0x5be   :  { %9400 = vmatpush3.msra.mxu1 %v8524_v54  ;;  %9434 = vmatprep.subr.mxu0 %v12391_v31 }
 0x5bf   :  { %9401 = vmatprep.subr.mxu1 %v12391_v31  ;;  %9435 = vmatpush3.msra.mxu0 %v8618_v24 }
 0x5c0   :  { %9402 = vmatpush3.msra.mxu1 %v8523_v35  ;;  %9436 = vmatprep.subr.mxu0 %v12391_v31 }
 0x5c1   :  { %9403 = vmatprep.subr.mxu1 %v12391_v31  ;;  %9437 = vmatpush3.msra.mxu0 %v8617_v18 }
 0x5c2   :  { %9404 = vmatpush3.msra.mxu1 %v8522_v39  ;;  %9438 = vmatprep.subr.mxu0 %v12391_v31 }
 0x5c3   :  { %9405 = vmatprep.subr.mxu1 %v12391_v31  ;;  %9439 = vmatpush3.msra.mxu0 %v8616_v13 }
 0x5c4   :  { %9406 = vmatpush3.msra.mxu1 %v8521_v44  ;;  %9440 = vmatprep.subr.mxu0 %v12391_v31 }
 0x5c5   :  { %9407 = vmatprep.subr.mxu1 %v12391_v31  ;;  %9441 = vmatpush3.msra.mxu0 %v8615_v12 }
 0x5c6   :  { %9408 = vmatpush3.msra.mxu1 %v8520_v16  ;;  %9442 = vmatprep.subr.mxu0 %v12391_v31 }
 0x5c7   :  { %9443 = vmatpush3.msra.mxu0 %v8614_v23 }
 0x666   :  { %v8515_v36 = vpop.f32.mrf.mxu0 }
 0x667   :  { %v9231_v5 = vpop.f32.mrf.mxu1 }
 0x668   :  { %v9376_v28 = vpop.f32.mrf.mxu0 }
 0x669   :  { %v9232_v40 = vpop.f32.mrf.mxu1 }
 0x66a   :  { %v9233_v37 = vadd.f32 %v9232_v40, %v9231_v5 }
 0x66c   :  { %v8446_v21 = vadd.f32 %v9233_v37, %v8857_v57 }
 0x66e   :  { %v8516_v10 = vadd.f32 %v8515_v36, %v8446_v21 }
 0x670   :  { %v8519_v41 = vmax.f32 %v8516_v10, 0.0 }
 0x672   :  { %9410 = vmatmul.mubr.f32.vlgmr.msra.gmra.mxu1 %v8519_v41 }
 0x732   :  { %v8609_v53 = vpop.f32.mrf.mxu1 }
 0x733   :  { %v8610_v30 = vadd.f32 %v8858_v32, %v8609_v53 }
 0x734   :  { %v9411_v45 = vpop.f32.mrf.mxu1 }
 0x735   :  { %v8613_v42 = vmax.f32 %v8610_v30, 0.0 }
 0x737   :  { %9445 = vmatmul.mubr.f32.vlgmr.msra.gmra.mxu0 %v8613_v42 }
 0x7f7   :  { %v8703_v61 = vpop.f32.mrf.mxu0 }
 0x7f8   :  { %v8704_v1 = vadd.f32 %v8859_v8, %v8703_v61 }
 0x7f9   :  { %v9446_v38 = vpop.f32.mrf.mxu0 }
 0x7fa   :  { %8707 = vst [vmem:[#allocation22] sm:$0x3] %v8704_v1 }
 0x7fb   :  { %9732 = shalt.err (!%p9729_p8)
}
 0x7fc   :  { %8717 = dma.vmem_to_hbm [thread:$0]  %s8715_s24, 32, %s12365_s13, [#allocation4]  }
 0x7fd   :  { %9755 = dma.done.wait [#allocation4], 32  }
 0x7fe   :  { %9756 = vsyncadd [#allocation4], 4294967264 }
 0x7ff   :  { %8721 = vsyncpa [#allocation3], 1 }
 0x800   :  { %8722 = vsyncpa [#allocation6], 1 }
 0x801   :  { %8723 = vsyncpa [#allocation9], 1 }
 0x802   :  { %8724 = vsyncpa [#allocation12], 1 }
 0x803   :  { %8725 = vsyncpa [#allocation15], 1 }
 0x804   :  { %8726 = vsyncpa [#allocation18], 1 }
 0x805   :  { %8727 = vsyncpa [#allocation21], 1 }
 0x806   :  { %8728 = vsyncpa [#allocation4], 1 }

</bundles_post_ra>
